<compile_context>
chip_gen: v7x
topology: tpu7x:2x2x1
jax: 0.10.0
libtpu: 0.0.40
codegen_flags: <defaults>
</compile_context>

<pallas_src>
import numpy as np
import jax
import jax.numpy as jnp
from jax import lax
from jax.experimental import pallas as pl
from jax.experimental.pallas import tpu as pltpu


# ---------------------------------------------------------------------------
# fused forward kernel
# ---------------------------------------------------------------------------
def _fused_detect_events(x_pad, p, B, H, W):
    C = 64                              # conv channels
    CIN = x_pad.shape[1]                # 512 (concat of the two 256-channel branches)
    P = H * W                           # real pixels per image (10)
    WP = W + 2                          # padded width
    PADIMG = (H + 2) * WP               # padded pixels per image (28)
    PADROWS = B * PADIMG                # rows the conv math runs over (56)
    G = (W + 3) * B                     # guard rows so every tap slice stays in-bounds (16)
    BUFROWS = PADROWS + 2 * G           # activation scratch rows (88)
    F1 = p["b_fc1"].shape[1]            # 512
    F2 = p["b_fc2"].shape[1]            # 2

    def kernel(x_ref, w1_ref, w3_ref, bconv_ref, mask_ref,
               wfc1_hbm, bfc1_ref, wfc2_ref, bfc2_ref,
               o_ref, act_ref, wfc1_vmem, fc1_sem):
        # Hide the (single biggest) fc1-weight HBM->VMEM transfer behind the conv phase.
        fc1_copy = pltpu.make_async_copy(wfc1_hbm, wfc1_vmem, fc1_sem)
        fc1_copy.start()

        # Guard rows start (and stay) zero; the per-image halo rows are kept zero by
        # the mask multiply below, so out-of-image taps contribute exactly 0.
        act_ref[...] = jnp.zeros_like(act_ref)

        mask = mask_ref[...]                         # (PADROWS, 1) f32, 1 on real pixels
        bconv = bconv_ref[...]                       # (2, 64) f32: row0 conv1, row1 block

        # --- conv1 (1x1, 512->64) + folded BN + ReLU, over the padded layout ----------
        a = jnp.dot(x_ref[...], w1_ref[...], preferred_element_type=jnp.float32)
        a = jnp.maximum(a + bconv[0:1, :], 0.0) * mask
        act_ref[pl.ds(G, PADROWS), :] = a.astype(jnp.bfloat16)

        # --- Events_Conv_Block (3x3 conv + BN + ReLU), shared weights, applied twice --
        # Tap (kh, kw) of every output pixel is at constant row offset
        # d = ((kh-1)*WP + (kw-1)) * B, so each tap is one static slice and one
        # accumulating MXU matmul — no im2col copies, no zero-padded K.
        for _ in range(2):
            acc = jnp.zeros((PADROWS, C), jnp.float32)
            for kh in range(3):
                for kw in range(3):
                    k = kh * 3 + kw
                    d = ((kh - 1) * WP + (kw - 1)) * B
                    tap = act_ref[pl.ds(G + d, PADROWS), :]
                    acc = acc + jnp.dot(tap, w3_ref[pl.ds(k * C, C), :],
                                        preferred_element_type=jnp.float32)
            a = jnp.maximum(acc + bconv[1:2, :], 0.0) * mask
            act_ref[pl.ds(G, PADROWS), :] = a.astype(jnp.bfloat16)

        # --- fc1 + ReLU as 10 accumulating per-pixel matmuls (no flatten buffer) -------
        # The PyTorch NCHW flatten is folded into the pixel-major permutation of the fc1
        # weight rows (row p*64 + c  <->  flatten feature c*P + p).
        fc1_copy.wait()
        hid = jnp.zeros((B, F1), jnp.float32)
        for pp in range(P):
            hh, ww = divmod(pp, W)
            start = G + ((hh + 1) * WP + (ww + 1)) * B
            rows = act_ref[pl.ds(start, B), :]                     # (B, 64) bf16
            hid = hid + jnp.dot(rows, wfc1_vmem[pl.ds(pp * C, C), :],
                                preferred_element_type=jnp.float32)
        hid = jnp.maximum(hid + bfc1_ref[...], 0.0)

        # --- fc2 + Sigmoid (f32 epilogue: v5e-safe) ------------------------------------
        logits = jnp.dot(hid.astype(jnp.bfloat16), wfc2_ref[...],
                         preferred_element_type=jnp.float32) + bfc2_ref[...]
        o_ref[...] = 1.0 / (1.0 + jnp.exp(-logits))

    def fs(shape):
        nd = len(shape)
        return pl.BlockSpec(shape, lambda i, _n=nd: (0,) * _n)

    return pl.pallas_call(
        kernel,
        out_shape=jax.ShapeDtypeStruct((B, F2), jnp.float32),
        grid=(1,),
        in_specs=[fs((PADROWS, CIN)),                 # padded bf16 input pixels
                  fs((CIN, C)),                       # conv1 weight (BN scale folded)
                  fs((9 * C, C)),                     # 3x3 conv weight taps (BN folded)
                  fs((2, C)),                         # packed conv biases
                  fs((PADROWS, 1)),                   # interior-pixel (halo) mask
                  pl.BlockSpec(memory_space=pl.ANY),  # fc1 weight: manual overlapped DMA
                  fs((1, F1)), fs((F1, F2)), fs((1, F2))],
        out_specs=fs((B, F2)),
        scratch_shapes=[
            pltpu.VMEM((BUFROWS, C), jnp.bfloat16),   # padded activations (+ guard rows)
            pltpu.VMEM((P * C, F1), jnp.bfloat16),    # fc1 weight landing buffer
            pltpu.SemaphoreType.DMA(()),              # fc1 weight DMA completion
        ],
    )(x_pad, p["w1"], p["w3"], p["b_conv"], p["halo_mask"],
      p["w_fc1"], p["b_fc1"], p["w_fc2"], p["b_fc2"])


# ---------------------------------------------------------------------------
# Detect_Events forward: one layout change in XLA, then the fused kernel
# ---------------------------------------------------------------------------
@jax.jit
def detect_events_forward(params, global_features, local_features):
    b, cin, h, w = global_features.shape
    x = jnp.concatenate([global_features, local_features], axis=1)   # (B, 512, H, W)
    # NCHW -> padded pixel-major rows (batch fastest), bf16 — the kernel's layout.
    x = jnp.transpose(x, (2, 3, 0, 1)).astype(jnp.bfloat16)          # (H, W, B, 512)
    x = jnp.pad(x, ((1, 1), (1, 1), (0, 0), (0, 0)))                 # (H+2, W+2, B, 512)
    x_pad = x.reshape((h + 2) * (w + 2) * b, 2 * cin)                # (PADROWS, 512)
    return _fused_detect_events(x_pad, params, b, h, w)


# ---------------------------------------------------------------------------
# deterministic synthetic parameters (shapes from the PyTorch __init__)
# ---------------------------------------------------------------------------
def init_params(key, H=2, W=5, B=2):
    eps = 1e-5
    P = H * W                      # fc1 expects 64 * P = 640 input features -> P = 10
    k = jax.random.split(key, 16)
    conv1_w = 0.02 * jax.random.normal(k[0], (64, 512, 1, 1), jnp.float32)
    conv1_b = 0.02 * jax.random.normal(k[1], (64,), jnp.float32)
    bn1_g = 1.0 + 0.05 * jax.random.normal(k[2], (64,), jnp.float32)
    bn1_b = 0.05 * jax.random.normal(k[3], (64,), jnp.float32)
    bn1_m = 0.05 * jax.random.normal(k[4], (64,), jnp.float32)
    bn1_v = 1.0 + 0.1 * jax.random.uniform(k[5], (64,), jnp.float32)
    cb_w = 0.05 * jax.random.normal(k[6], (64, 64, 3, 3), jnp.float32)
    cb_b = 0.02 * jax.random.normal(k[7], (64,), jnp.float32)
    cbbn_g = 1.0 + 0.05 * jax.random.normal(k[8], (64,), jnp.float32)
    cbbn_b = 0.05 * jax.random.normal(k[9], (64,), jnp.float32)
    cbbn_m = 0.05 * jax.random.normal(k[10], (64,), jnp.float32)
    cbbn_v = 1.0 + 0.1 * jax.random.uniform(k[11], (64,), jnp.float32)
    fc1_w = 0.05 * jax.random.normal(k[12], (512, 64 * P), jnp.float32)
    fc1_b = 0.02 * jax.random.normal(k[13], (512,), jnp.float32)
    fc2_w = 0.05 * jax.random.normal(k[14], (2, 512), jnp.float32)
    fc2_b = 0.02 * jax.random.normal(k[15], (2,), jnp.float32)

    # Fold inference BatchNorm: scale into the weight's output channels, bias kept in f32.
    s1 = bn1_g / jnp.sqrt(bn1_v + eps)
    b1 = bn1_b + (conv1_b - bn1_m) * s1
    scb = cbbn_g / jnp.sqrt(cbbn_v + eps)
    bcb = cbbn_b + (cb_b - cbbn_m) * scb

    # --- bf16 matmul operands (MXU-native); biases / epilogue math stay f32 --------------
    w1 = (jnp.transpose(conv1_w[:, :, 0, 0]) * s1[None, :]).astype(jnp.bfloat16)  # (512,64)
    w3_hwio = jnp.transpose(cb_w, (2, 3, 1, 0)) * scb[None, None, None, :]        # (3,3,64,64)
    w3 = w3_hwio.reshape(9 * 64, 64).astype(jnp.bfloat16)       # rows (kh*3+kw)*64 + cin

    # fc1 rows permuted to pixel-major (row p*64 + c  <->  NCHW flatten feature c*P + p).
    fc1_wT = fc1_w.T.astype(jnp.bfloat16)                                          # (640,512)
    fc1_pix = fc1_wT.reshape(64, P, 512).transpose(1, 0, 2).reshape(P * 64, 512)   # (640,512)
    fc2_wT = fc2_w.T.astype(jnp.bfloat16)                                          # (512,2)

    # Interior-pixel mask for the padded, batch-interleaved row layout.
    m2d = np.zeros((H + 2, W + 2), np.float32)
    m2d[1:H + 1, 1:W + 1] = 1.0
    halo_mask = jnp.asarray(np.repeat(m2d.reshape(-1), B).reshape(-1, 1))          # (PADROWS,1)

    return {
        # kernel parameters
        "w1": w1, "w3": w3,
        "b_conv": jnp.stack([b1, bcb], axis=0),        # (2, 64) f32 packed conv biases
        "halo_mask": halo_mask,
        "w_fc1": fc1_pix, "b_fc1": fc1_b.reshape(1, 512),
        "w_fc2": fc2_wT, "b_fc2": fc2_b.reshape(1, 2),
        # f32 copies of the same (bf16-rounded, BN-folded) weights for the pure-JAX ref
        "ref_w1x1_hwio": w1.astype(jnp.float32).reshape(1, 1, 512, 64),
        "ref_b1": b1,
        "ref_w3x3_hwio": w3.astype(jnp.float32).reshape(3, 3, 64, 64),
        "ref_bcb": bcb,
        "ref_w_fc1": fc1_wT.astype(jnp.float32),
        "ref_w_fc2": fc2_wT.astype(jnp.float32),
    }


# ---------------------------------------------------------------------------
# pure-JAX reference (same bf16 roundings as the kernel, f32 math) for checking
# ---------------------------------------------------------------------------
def reference_forward(p, gf, lf):
    dn = ("NHWC", "HWIO", "NHWC")
    hp = lax.Precision.HIGHEST
    x = jnp.concatenate([gf, lf], axis=1)
    x = jnp.transpose(x, (0, 2, 3, 1))
    x = x.astype(jnp.bfloat16).astype(jnp.float32)      # kernel consumes bf16 inputs
    y = lax.conv_general_dilated(x, p["ref_w1x1_hwio"], (1, 1), "VALID",
                                 dimension_numbers=dn, precision=hp)
    y = jnp.maximum(y + p["ref_b1"], 0.0)
    y = y.astype(jnp.bfloat16).astype(jnp.float32)      # kernel stores activations in bf16
    for _ in range(2):
        y = lax.conv_general_dilated(y, p["ref_w3x3_hwio"], (1, 1), "SAME",
                                     dimension_numbers=dn, precision=hp)
        y = jnp.maximum(y + p["ref_bcb"], 0.0)
        y = y.astype(jnp.bfloat16).astype(jnp.float32)
    flat = jnp.transpose(y, (0, 3, 1, 2)).reshape(y.shape[0], -1)   # PyTorch NCHW flatten
    h = jnp.maximum(jnp.dot(flat, p["ref_w_fc1"], precision=hp) + p["b_fc1"], 0.0)
    h = h.astype(jnp.bfloat16).astype(jnp.float32)
    o = jnp.dot(h, p["ref_w_fc2"], precision=hp) + p["b_fc2"]
    return jax.nn.sigmoid(o)


if __name__ == "__main__":
    key = jax.random.PRNGKey(0)
    kp, kg, kl = jax.random.split(key, 3)

    # fc1 expects 640 = 64 * H * W input features -> H*W = 10; the concat of two
    # 256-channel maps gives conv1's 512 input channels.
    B, H, W = 2, 2, 5
    params = init_params(kp, H, W, B)
    global_features = jax.random.normal(kg, (B, 256, H, W), jnp.float32)
    local_features = jax.random.normal(kl, (B, 256, H, W), jnp.float32)

    out = detect_events_forward(params, global_features, local_features)
    out = jax.block_until_ready(out)
    assert out.shape == (B, 2), out.shape

    ref = reference_forward(params, global_features, local_features)
    # bf16 matmul operands (same rounding in kernel and reference); only accumulation
    # order differs, so the tolerance is comfortable.
    if not jnp.allclose(out, ref, atol=1e-2, rtol=1e-2):
        raise AssertionError(f"Pallas output mismatch:\n{out}\nvs reference:\n{ref}")

    print("KERNEL_OK")
</pallas_src>

<mosaic_0001>
module attributes {stable_mosaic.version = 11 : i64} {
  func.func @kernel(%arg0: i32, %arg1: memref<56x512xbf16, #tpu.memory_space<vmem>>, %arg2: memref<512x64xbf16, #tpu.memory_space<vmem>>, %arg3: memref<576x64xbf16, #tpu.memory_space<vmem>>, %arg4: memref<2x64xf32, #tpu.memory_space<vmem>>, %arg5: memref<56x1xf32, #tpu.memory_space<vmem>>, %arg6: memref<640x512xbf16, #tpu.memory_space<any>>, %arg7: memref<1x512xf32, #tpu.memory_space<vmem>>, %arg8: memref<512x2xbf16, #tpu.memory_space<vmem>>, %arg9: memref<1x2xf32, #tpu.memory_space<vmem>>, %arg10: memref<2x2xf32, #tpu.memory_space<vmem>>, %arg11: memref<88x64xbf16, #tpu.memory_space<vmem>>, %arg12: memref<640x512xbf16, #tpu.memory_space<vmem>>, %arg13: memref<!tpu.dma_semaphore, #tpu.memory_space<semaphore_mem>>) attributes {dimension_semantics = [#tpu.dimension_semantics<arbitrary>], iteration_bounds = array<i64: 1>, scalar_prefetch = 0 : i64, scratch_operands = 3 : i64, tpu.core_type = #tpu.core_type<tc>, window_params = [{pipeline_mode = #tpu.pipeline_mode<synchronous>, transform_indices = @transform_0, window_bounds = array<i64: 56, 512>}, {pipeline_mode = #tpu.pipeline_mode<synchronous>, transform_indices = @transform_1, window_bounds = array<i64: 512, 64>}, {pipeline_mode = #tpu.pipeline_mode<synchronous>, transform_indices = @transform_2, window_bounds = array<i64: 576, 64>}, {pipeline_mode = #tpu.pipeline_mode<synchronous>, transform_indices = @transform_3, window_bounds = array<i64: 2, 64>}, {pipeline_mode = #tpu.pipeline_mode<synchronous>, transform_indices = @transform_4, window_bounds = array<i64: 56, 1>}, {}, {pipeline_mode = #tpu.pipeline_mode<synchronous>, transform_indices = @transform_6, window_bounds = array<i64: 1, 512>}, {pipeline_mode = #tpu.pipeline_mode<synchronous>, transform_indices = @transform_7, window_bounds = array<i64: 512, 2>}, {pipeline_mode = #tpu.pipeline_mode<synchronous>, transform_indices = @transform_8, window_bounds = array<i64: 1, 2>}, {pipeline_mode = #tpu.pipeline_mode<synchronous>, transform_indices = @transform_9, window_bounds = array<i64: 2, 2>}]} {
    tpu.enqueue_dma source(%arg6 : memref<640x512xbf16, #tpu.memory_space<any>>) target(%arg12 : memref<640x512xbf16, #tpu.memory_space<vmem>>) target_semaphore(%arg13 : memref<!tpu.dma_semaphore, #tpu.memory_space<semaphore_mem>>)
    %cst = arith.constant 0.000000e+00 : bf16
    %0 = vector.broadcast %cst : bf16 to vector<88x64xbf16>
    %c0 = arith.constant 0 : index
    %c0_0 = arith.constant 0 : index
    %1 = vector.load %arg11[%c0, %c0_0] : memref<88x64xbf16, #tpu.memory_space<vmem>>, vector<88x64xbf16>
    tpu.vector_store %arg11[%c0, %c0_0], %0 {strides = array<i32>} : memref<88x64xbf16, #tpu.memory_space<vmem>>, vector<88x64xbf16>,
    %c0_1 = arith.constant 0 : index
    %c0_2 = arith.constant 0 : index
    %2 = vector.load %arg5[%c0_1, %c0_2] : memref<56x1xf32, #tpu.memory_space<vmem>>, vector<56x1xf32>
    %c0_3 = arith.constant 0 : index
    %c0_4 = arith.constant 0 : index
    %3 = vector.load %arg4[%c0_3, %c0_4] : memref<2x64xf32, #tpu.memory_space<vmem>>, vector<2x64xf32>
    %c0_5 = arith.constant 0 : index
    %c0_6 = arith.constant 0 : index
    %4 = vector.load %arg1[%c0_5, %c0_6] : memref<56x512xbf16, #tpu.memory_space<vmem>>, vector<56x512xbf16>
    %c0_7 = arith.constant 0 : index
    %c0_8 = arith.constant 0 : index
    %5 = vector.load %arg2[%c0_7, %c0_8] : memref<512x64xbf16, #tpu.memory_space<vmem>>, vector<512x64xbf16>
    %cst_9 = arith.constant dense<0.000000e+00> : vector<56x64xf32>
    %6 = tpu.matmul %4, %5, %cst_9 {dimension_numbers = #tpu.dot_dimension_numbers<[1], [0], [0], [1], [0, 0, 1, 1], [], []>} : vector<56x512xbf16>, vector<512x64xbf16>, vector<56x64xf32> -> vector<56x64xf32>
    %7 = vector.extract_strided_slice %3 {offsets = [0, 0], sizes = [1, 64], strides = [1, 1]} : vector<2x64xf32> to vector<1x64xf32>
    %8 = vector.broadcast %7 : vector<1x64xf32> to vector<56x64xf32>
    %9 = arith.addf %6, %8 : vector<56x64xf32>
    %cst_10 = arith.constant 0.000000e+00 : f32
    %10 = vector.broadcast %cst_10 : f32 to vector<56x64xf32>
    %11 = arith.maximumf %9, %10 : vector<56x64xf32>
    %12 = vector.broadcast %2 : vector<56x1xf32> to vector<56x64xf32>
    %13 = arith.mulf %11, %12 : vector<56x64xf32>
    %14 = arith.truncf %13 : vector<56x64xf32> to vector<56x64xbf16>
    %c16 = arith.constant 16 : index
    %c0_11 = arith.constant 0 : index
    %15 = vector.load %arg11[%c16, %c0_11] : memref<88x64xbf16, #tpu.memory_space<vmem>>, vector<56x64xbf16>
    tpu.vector_store %arg11[%c16, %c0_11], %14 {strides = array<i32>} : memref<88x64xbf16, #tpu.memory_space<vmem>>, vector<56x64xbf16>,
    %cst_12 = arith.constant 0.000000e+00 : f32
    %16 = vector.broadcast %cst_12 : f32 to vector<56x64xf32>
    %c0_13 = arith.constant 0 : index
    %c0_14 = arith.constant 0 : index
    %17 = vector.load %arg11[%c0_13, %c0_14] : memref<88x64xbf16, #tpu.memory_space<vmem>>, vector<56x64xbf16>
    %c0_15 = arith.constant 0 : index
    %c0_16 = arith.constant 0 : index
    %18 = vector.load %arg3[%c0_15, %c0_16] : memref<576x64xbf16, #tpu.memory_space<vmem>>, vector<64x64xbf16>
    %cst_17 = arith.constant dense<0.000000e+00> : vector<56x64xf32>
    %19 = tpu.matmul %17, %18, %cst_17 {dimension_numbers = #tpu.dot_dimension_numbers<[1], [0], [0], [1], [0, 0, 1, 1], [], []>} : vector<56x64xbf16>, vector<64x64xbf16>, vector<56x64xf32> -> vector<56x64xf32>
    %20 = arith.addf %16, %19 : vector<56x64xf32>
    %c2 = arith.constant 2 : index
    %c0_18 = arith.constant 0 : index
    %21 = vector.load %arg11[%c2, %c0_18] : memref<88x64xbf16, #tpu.memory_space<vmem>>, vector<56x64xbf16>
    %c64 = arith.constant 64 : index
    %c0_19 = arith.constant 0 : index
    %22 = vector.load %arg3[%c64, %c0_19] : memref<576x64xbf16, #tpu.memory_space<vmem>>, vector<64x64xbf16>
    %cst_20 = arith.constant dense<0.000000e+00> : vector<56x64xf32>
    %23 = tpu.matmul %21, %22, %cst_20 {dimension_numbers = #tpu.dot_dimension_numbers<[1], [0], [0], [1], [0, 0, 1, 1], [], []>} : vector<56x64xbf16>, vector<64x64xbf16>, vector<56x64xf32> -> vector<56x64xf32>
    %24 = arith.addf %20, %23 : vector<56x64xf32>
    %c4 = arith.constant 4 : index
    %c0_21 = arith.constant 0 : index
    %25 = vector.load %arg11[%c4, %c0_21] : memref<88x64xbf16, #tpu.memory_space<vmem>>, vector<56x64xbf16>
    %c128 = arith.constant 128 : index
    %c0_22 = arith.constant 0 : index
    %26 = vector.load %arg3[%c128, %c0_22] : memref<576x64xbf16, #tpu.memory_space<vmem>>, vector<64x64xbf16>
    %cst_23 = arith.constant dense<0.000000e+00> : vector<56x64xf32>
    %27 = tpu.matmul %25, %26, %cst_23 {dimension_numbers = #tpu.dot_dimension_numbers<[1], [0], [0], [1], [0, 0, 1, 1], [], []>} : vector<56x64xbf16>, vector<64x64xbf16>, vector<56x64xf32> -> vector<56x64xf32>
    %28 = arith.addf %24, %27 : vector<56x64xf32>
    %c14 = arith.constant 14 : index
    %c0_24 = arith.constant 0 : index
    %29 = vector.load %arg11[%c14, %c0_24] : memref<88x64xbf16, #tpu.memory_space<vmem>>, vector<56x64xbf16>
    %c192 = arith.constant 192 : index
    %c0_25 = arith.constant 0 : index
    %30 = vector.load %arg3[%c192, %c0_25] : memref<576x64xbf16, #tpu.memory_space<vmem>>, vector<64x64xbf16>
    %cst_26 = arith.constant dense<0.000000e+00> : vector<56x64xf32>
    %31 = tpu.matmul %29, %30, %cst_26 {dimension_numbers = #tpu.dot_dimension_numbers<[1], [0], [0], [1], [0, 0, 1, 1], [], []>} : vector<56x64xbf16>, vector<64x64xbf16>, vector<56x64xf32> -> vector<56x64xf32>
    %32 = arith.addf %28, %31 : vector<56x64xf32>
    %c16_27 = arith.constant 16 : index
    %c0_28 = arith.constant 0 : index
    %33 = vector.load %arg11[%c16_27, %c0_28] : memref<88x64xbf16, #tpu.memory_space<vmem>>, vector<56x64xbf16>
    %c256 = arith.constant 256 : index
    %c0_29 = arith.constant 0 : index
    %34 = vector.load %arg3[%c256, %c0_29] : memref<576x64xbf16, #tpu.memory_space<vmem>>, vector<64x64xbf16>
    %cst_30 = arith.constant dense<0.000000e+00> : vector<56x64xf32>
    %35 = tpu.matmul %33, %34, %cst_30 {dimension_numbers = #tpu.dot_dimension_numbers<[1], [0], [0], [1], [0, 0, 1, 1], [], []>} : vector<56x64xbf16>, vector<64x64xbf16>, vector<56x64xf32> -> vector<56x64xf32>
    %36 = arith.addf %32, %35 : vector<56x64xf32>
    %c18 = arith.constant 18 : index
    %c0_31 = arith.constant 0 : index
    %37 = vector.load %arg11[%c18, %c0_31] : memref<88x64xbf16, #tpu.memory_space<vmem>>, vector<56x64xbf16>
    %c320 = arith.constant 320 : index
    %c0_32 = arith.constant 0 : index
    %38 = vector.load %arg3[%c320, %c0_32] : memref<576x64xbf16, #tpu.memory_space<vmem>>, vector<64x64xbf16>
    %cst_33 = arith.constant dense<0.000000e+00> : vector<56x64xf32>
    %39 = tpu.matmul %37, %38, %cst_33 {dimension_numbers = #tpu.dot_dimension_numbers<[1], [0], [0], [1], [0, 0, 1, 1], [], []>} : vector<56x64xbf16>, vector<64x64xbf16>, vector<56x64xf32> -> vector<56x64xf32>
    %40 = arith.addf %36, %39 : vector<56x64xf32>
    %c28 = arith.constant 28 : index
    %c0_34 = arith.constant 0 : index
    %41 = vector.load %arg11[%c28, %c0_34] : memref<88x64xbf16, #tpu.memory_space<vmem>>, vector<56x64xbf16>
    %c384 = arith.constant 384 : index
    %c0_35 = arith.constant 0 : index
    %42 = vector.load %arg3[%c384, %c0_35] : memref<576x64xbf16, #tpu.memory_space<vmem>>, vector<64x64xbf16>
    %cst_36 = arith.constant dense<0.000000e+00> : vector<56x64xf32>
    %43 = tpu.matmul %41, %42, %cst_36 {dimension_numbers = #tpu.dot_dimension_numbers<[1], [0], [0], [1], [0, 0, 1, 1], [], []>} : vector<56x64xbf16>, vector<64x64xbf16>, vector<56x64xf32> -> vector<56x64xf32>
    %44 = arith.addf %40, %43 : vector<56x64xf32>
    %c30 = arith.constant 30 : index
    %c0_37 = arith.constant 0 : index
    %45 = vector.load %arg11[%c30, %c0_37] : memref<88x64xbf16, #tpu.memory_space<vmem>>, vector<56x64xbf16>
    %c448 = arith.constant 448 : index
    %c0_38 = arith.constant 0 : index
    %46 = vector.load %arg3[%c448, %c0_38] : memref<576x64xbf16, #tpu.memory_space<vmem>>, vector<64x64xbf16>
    %cst_39 = arith.constant dense<0.000000e+00> : vector<56x64xf32>
    %47 = tpu.matmul %45, %46, %cst_39 {dimension_numbers = #tpu.dot_dimension_numbers<[1], [0], [0], [1], [0, 0, 1, 1], [], []>} : vector<56x64xbf16>, vector<64x64xbf16>, vector<56x64xf32> -> vector<56x64xf32>
    %48 = arith.addf %44, %47 : vector<56x64xf32>
    %c32 = arith.constant 32 : index
    %c0_40 = arith.constant 0 : index
    %49 = vector.load %arg11[%c32, %c0_40] : memref<88x64xbf16, #tpu.memory_space<vmem>>, vector<56x64xbf16>
    %c512 = arith.constant 512 : index
    %c0_41 = arith.constant 0 : index
    %50 = vector.load %arg3[%c512, %c0_41] : memref<576x64xbf16, #tpu.memory_space<vmem>>, vector<64x64xbf16>
    %cst_42 = arith.constant dense<0.000000e+00> : vector<56x64xf32>
    %51 = tpu.matmul %49, %50, %cst_42 {dimension_numbers = #tpu.dot_dimension_numbers<[1], [0], [0], [1], [0, 0, 1, 1], [], []>} : vector<56x64xbf16>, vector<64x64xbf16>, vector<56x64xf32> -> vector<56x64xf32>
    %52 = arith.addf %48, %51 : vector<56x64xf32>
    %53 = vector.extract_strided_slice %3 {offsets = [1, 0], sizes = [1, 64], strides = [1, 1]} : vector<2x64xf32> to vector<1x64xf32>
    %54 = vector.broadcast %53 : vector<1x64xf32> to vector<56x64xf32>
    %55 = arith.addf %52, %54 : vector<56x64xf32>
    %cst_43 = arith.constant 0.000000e+00 : f32
    %56 = vector.broadcast %cst_43 : f32 to vector<56x64xf32>
    %57 = arith.maximumf %55, %56 : vector<56x64xf32>
    %58 = vector.broadcast %2 : vector<56x1xf32> to vector<56x64xf32>
    %59 = arith.mulf %57, %58 : vector<56x64xf32>
    %60 = arith.truncf %59 : vector<56x64xf32> to vector<56x64xbf16>
    %c16_44 = arith.constant 16 : index
    %c0_45 = arith.constant 0 : index
    %61 = vector.load %arg11[%c16_44, %c0_45] : memref<88x64xbf16, #tpu.memory_space<vmem>>, vector<56x64xbf16>
    tpu.vector_store %arg11[%c16_44, %c0_45], %60 {strides = array<i32>} : memref<88x64xbf16, #tpu.memory_space<vmem>>, vector<56x64xbf16>,
    %cst_46 = arith.constant 0.000000e+00 : f32
    %62 = vector.broadcast %cst_46 : f32 to vector<56x64xf32>
    %c0_47 = arith.constant 0 : index
    %c0_48 = arith.constant 0 : index
    %63 = vector.load %arg11[%c0_47, %c0_48] : memref<88x64xbf16, #tpu.memory_space<vmem>>, vector<56x64xbf16>
    %c0_49 = arith.constant 0 : index
    %c0_50 = arith.constant 0 : index
    %64 = vector.load %arg3[%c0_49, %c0_50] : memref<576x64xbf16, #tpu.memory_space<vmem>>, vector<64x64xbf16>
    %cst_51 = arith.constant dense<0.000000e+00> : vector<56x64xf32>
    %65 = tpu.matmul %63, %64, %cst_51 {dimension_numbers = #tpu.dot_dimension_numbers<[1], [0], [0], [1], [0, 0, 1, 1], [], []>} : vector<56x64xbf16>, vector<64x64xbf16>, vector<56x64xf32> -> vector<56x64xf32>
    %66 = arith.addf %62, %65 : vector<56x64xf32>
    %c2_52 = arith.constant 2 : index
    %c0_53 = arith.constant 0 : index
    %67 = vector.load %arg11[%c2_52, %c0_53] : memref<88x64xbf16, #tpu.memory_space<vmem>>, vector<56x64xbf16>
    %c64_54 = arith.constant 64 : index
    %c0_55 = arith.constant 0 : index
    %68 = vector.load %arg3[%c64_54, %c0_55] : memref<576x64xbf16, #tpu.memory_space<vmem>>, vector<64x64xbf16>
    %cst_56 = arith.constant dense<0.000000e+00> : vector<56x64xf32>
    %69 = tpu.matmul %67, %68, %cst_56 {dimension_numbers = #tpu.dot_dimension_numbers<[1], [0], [0], [1], [0, 0, 1, 1], [], []>} : vector<56x64xbf16>, vector<64x64xbf16>, vector<56x64xf32> -> vector<56x64xf32>
    %70 = arith.addf %66, %69 : vector<56x64xf32>
    %c4_57 = arith.constant 4 : index
    %c0_58 = arith.constant 0 : index
    %71 = vector.load %arg11[%c4_57, %c0_58] : memref<88x64xbf16, #tpu.memory_space<vmem>>, vector<56x64xbf16>
    %c128_59 = arith.constant 128 : index
    %c0_60 = arith.constant 0 : index
    %72 = vector.load %arg3[%c128_59, %c0_60] : memref<576x64xbf16, #tpu.memory_space<vmem>>, vector<64x64xbf16>
    %cst_61 = arith.constant dense<0.000000e+00> : vector<56x64xf32>
    %73 = tpu.matmul %71, %72, %cst_61 {dimension_numbers = #tpu.dot_dimension_numbers<[1], [0], [0], [1], [0, 0, 1, 1], [], []>} : vector<56x64xbf16>, vector<64x64xbf16>, vector<56x64xf32> -> vector<56x64xf32>
    %74 = arith.addf %70, %73 : vector<56x64xf32>
    %c14_62 = arith.constant 14 : index
    %c0_63 = arith.constant 0 : index
    %75 = vector.load %arg11[%c14_62, %c0_63] : memref<88x64xbf16, #tpu.memory_space<vmem>>, vector<56x64xbf16>
    %c192_64 = arith.constant 192 : index
    %c0_65 = arith.constant 0 : index
    %76 = vector.load %arg3[%c192_64, %c0_65] : memref<576x64xbf16, #tpu.memory_space<vmem>>, vector<64x64xbf16>
    %cst_66 = arith.constant dense<0.000000e+00> : vector<56x64xf32>
    %77 = tpu.matmul %75, %76, %cst_66 {dimension_numbers = #tpu.dot_dimension_numbers<[1], [0], [0], [1], [0, 0, 1, 1], [], []>} : vector<56x64xbf16>, vector<64x64xbf16>, vector<56x64xf32> -> vector<56x64xf32>
    %78 = arith.addf %74, %77 : vector<56x64xf32>
    %c16_67 = arith.constant 16 : index
    %c0_68 = arith.constant 0 : index
    %79 = vector.load %arg11[%c16_67, %c0_68] : memref<88x64xbf16, #tpu.memory_space<vmem>>, vector<56x64xbf16>
    %c256_69 = arith.constant 256 : index
    %c0_70 = arith.constant 0 : index
    %80 = vector.load %arg3[%c256_69, %c0_70] : memref<576x64xbf16, #tpu.memory_space<vmem>>, vector<64x64xbf16>
    %cst_71 = arith.constant dense<0.000000e+00> : vector<56x64xf32>
    %81 = tpu.matmul %79, %80, %cst_71 {dimension_numbers = #tpu.dot_dimension_numbers<[1], [0], [0], [1], [0, 0, 1, 1], [], []>} : vector<56x64xbf16>, vector<64x64xbf16>, vector<56x64xf32> -> vector<56x64xf32>
    %82 = arith.addf %78, %81 : vector<56x64xf32>
    %c18_72 = arith.constant 18 : index
    %c0_73 = arith.constant 0 : index
    %83 = vector.load %arg11[%c18_72, %c0_73] : memref<88x64xbf16, #tpu.memory_space<vmem>>, vector<56x64xbf16>
    %c320_74 = arith.constant 320 : index
    %c0_75 = arith.constant 0 : index
    %84 = vector.load %arg3[%c320_74, %c0_75] : memref<576x64xbf16, #tpu.memory_space<vmem>>, vector<64x64xbf16>
    %cst_76 = arith.constant dense<0.000000e+00> : vector<56x64xf32>
    %85 = tpu.matmul %83, %84, %cst_76 {dimension_numbers = #tpu.dot_dimension_numbers<[1], [0], [0], [1], [0, 0, 1, 1], [], []>} : vector<56x64xbf16>, vector<64x64xbf16>, vector<56x64xf32> -> vector<56x64xf32>
    %86 = arith.addf %82, %85 : vector<56x64xf32>
    %c28_77 = arith.constant 28 : index
    %c0_78 = arith.constant 0 : index
    %87 = vector.load %arg11[%c28_77, %c0_78] : memref<88x64xbf16, #tpu.memory_space<vmem>>, vector<56x64xbf16>
    %c384_79 = arith.constant 384 : index
    %c0_80 = arith.constant 0 : index
    %88 = vector.load %arg3[%c384_79, %c0_80] : memref<576x64xbf16, #tpu.memory_space<vmem>>, vector<64x64xbf16>
    %cst_81 = arith.constant dense<0.000000e+00> : vector<56x64xf32>
    %89 = tpu.matmul %87, %88, %cst_81 {dimension_numbers = #tpu.dot_dimension_numbers<[1], [0], [0], [1], [0, 0, 1, 1], [], []>} : vector<56x64xbf16>, vector<64x64xbf16>, vector<56x64xf32> -> vector<56x64xf32>
    %90 = arith.addf %86, %89 : vector<56x64xf32>
    %c30_82 = arith.constant 30 : index
    %c0_83 = arith.constant 0 : index
    %91 = vector.load %arg11[%c30_82, %c0_83] : memref<88x64xbf16, #tpu.memory_space<vmem>>, vector<56x64xbf16>
    %c448_84 = arith.constant 448 : index
    %c0_85 = arith.constant 0 : index
    %92 = vector.load %arg3[%c448_84, %c0_85] : memref<576x64xbf16, #tpu.memory_space<vmem>>, vector<64x64xbf16>
    %cst_86 = arith.constant dense<0.000000e+00> : vector<56x64xf32>
    %93 = tpu.matmul %91, %92, %cst_86 {dimension_numbers = #tpu.dot_dimension_numbers<[1], [0], [0], [1], [0, 0, 1, 1], [], []>} : vector<56x64xbf16>, vector<64x64xbf16>, vector<56x64xf32> -> vector<56x64xf32>
    %94 = arith.addf %90, %93 : vector<56x64xf32>
    %c32_87 = arith.constant 32 : index
    %c0_88 = arith.constant 0 : index
    %95 = vector.load %arg11[%c32_87, %c0_88] : memref<88x64xbf16, #tpu.memory_space<vmem>>, vector<56x64xbf16>
    %c512_89 = arith.constant 512 : index
    %c0_90 = arith.constant 0 : index
    %96 = vector.load %arg3[%c512_89, %c0_90] : memref<576x64xbf16, #tpu.memory_space<vmem>>, vector<64x64xbf16>
    %cst_91 = arith.constant dense<0.000000e+00> : vector<56x64xf32>
    %97 = tpu.matmul %95, %96, %cst_91 {dimension_numbers = #tpu.dot_dimension_numbers<[1], [0], [0], [1], [0, 0, 1, 1], [], []>} : vector<56x64xbf16>, vector<64x64xbf16>, vector<56x64xf32> -> vector<56x64xf32>
    %98 = arith.addf %94, %97 : vector<56x64xf32>
    %99 = vector.extract_strided_slice %3 {offsets = [1, 0], sizes = [1, 64], strides = [1, 1]} : vector<2x64xf32> to vector<1x64xf32>
    %100 = vector.broadcast %99 : vector<1x64xf32> to vector<56x64xf32>
    %101 = arith.addf %98, %100 : vector<56x64xf32>
    %cst_92 = arith.constant 0.000000e+00 : f32
    %102 = vector.broadcast %cst_92 : f32 to vector<56x64xf32>
    %103 = arith.maximumf %101, %102 : vector<56x64xf32>
    %104 = vector.broadcast %2 : vector<56x1xf32> to vector<56x64xf32>
    %105 = arith.mulf %103, %104 : vector<56x64xf32>
    %106 = arith.truncf %105 : vector<56x64xf32> to vector<56x64xbf16>
    %c16_93 = arith.constant 16 : index
    %c0_94 = arith.constant 0 : index
    %107 = vector.load %arg11[%c16_93, %c0_94] : memref<88x64xbf16, #tpu.memory_space<vmem>>, vector<56x64xbf16>
    tpu.vector_store %arg11[%c16_93, %c0_94], %106 {strides = array<i32>} : memref<88x64xbf16, #tpu.memory_space<vmem>>, vector<56x64xbf16>,
    tpu.wait_dma2 semaphore(%arg13 : memref<!tpu.dma_semaphore, #tpu.memory_space<semaphore_mem>>) src(%arg6 : memref<640x512xbf16, #tpu.memory_space<any>>) dst(%arg12 : memref<640x512xbf16, #tpu.memory_space<vmem>>)
    %cst_95 = arith.constant 0.000000e+00 : f32
    %108 = vector.broadcast %cst_95 : f32 to vector<2x512xf32>
    %c32_96 = arith.constant 32 : index
    %c0_97 = arith.constant 0 : index
    %109 = vector.load %arg11[%c32_96, %c0_97] : memref<88x64xbf16, #tpu.memory_space<vmem>>, vector<2x64xbf16>
    %c0_98 = arith.constant 0 : index
    %c0_99 = arith.constant 0 : index
    %110 = vector.load %arg12[%c0_98, %c0_99] : memref<640x512xbf16, #tpu.memory_space<vmem>>, vector<64x512xbf16>
    %cst_100 = arith.constant dense<0.000000e+00> : vector<2x512xf32>
    %111 = tpu.matmul %109, %110, %cst_100 {dimension_numbers = #tpu.dot_dimension_numbers<[1], [0], [0], [1], [0, 0, 1, 1], [], []>} : vector<2x64xbf16>, vector<64x512xbf16>, vector<2x512xf32> -> vector<2x512xf32>
    %112 = arith.addf %108, %111 : vector<2x512xf32>
    %c34 = arith.constant 34 : index
    %c0_101 = arith.constant 0 : index
    %113 = vector.load %arg11[%c34, %c0_101] : memref<88x64xbf16, #tpu.memory_space<vmem>>, vector<2x64xbf16>
    %c64_102 = arith.constant 64 : index
    %c0_103 = arith.constant 0 : index
    %114 = vector.load %arg12[%c64_102, %c0_103] : memref<640x512xbf16, #tpu.memory_space<vmem>>, vector<64x512xbf16>
    %cst_104 = arith.constant dense<0.000000e+00> : vector<2x512xf32>
    %115 = tpu.matmul %113, %114, %cst_104 {dimension_numbers = #tpu.dot_dimension_numbers<[1], [0], [0], [1], [0, 0, 1, 1], [], []>} : vector<2x64xbf16>, vector<64x512xbf16>, vector<2x512xf32> -> vector<2x512xf32>
    %116 = arith.addf %112, %115 : vector<2x512xf32>
    %c36 = arith.constant 36 : index
    %c0_105 = arith.constant 0 : index
    %117 = vector.load %arg11[%c36, %c0_105] : memref<88x64xbf16, #tpu.memory_space<vmem>>, vector<2x64xbf16>
    %c128_106 = arith.constant 128 : index
    %c0_107 = arith.constant 0 : index
    %118 = vector.load %arg12[%c128_106, %c0_107] : memref<640x512xbf16, #tpu.memory_space<vmem>>, vector<64x512xbf16>
    %cst_108 = arith.constant dense<0.000000e+00> : vector<2x512xf32>
    %119 = tpu.matmul %117, %118, %cst_108 {dimension_numbers = #tpu.dot_dimension_numbers<[1], [0], [0], [1], [0, 0, 1, 1], [], []>} : vector<2x64xbf16>, vector<64x512xbf16>, vector<2x512xf32> -> vector<2x512xf32>
    %120 = arith.addf %116, %119 : vector<2x512xf32>
    %c38 = arith.constant 38 : index
    %c0_109 = arith.constant 0 : index
    %121 = vector.load %arg11[%c38, %c0_109] : memref<88x64xbf16, #tpu.memory_space<vmem>>, vector<2x64xbf16>
    %c192_110 = arith.constant 192 : index
    %c0_111 = arith.constant 0 : index
    %122 = vector.load %arg12[%c192_110, %c0_111] : memref<640x512xbf16, #tpu.memory_space<vmem>>, vector<64x512xbf16>
    %cst_112 = arith.constant dense<0.000000e+00> : vector<2x512xf32>
    %123 = tpu.matmul %121, %122, %cst_112 {dimension_numbers = #tpu.dot_dimension_numbers<[1], [0], [0], [1], [0, 0, 1, 1], [], []>} : vector<2x64xbf16>, vector<64x512xbf16>, vector<2x512xf32> -> vector<2x512xf32>
    %124 = arith.addf %120, %123 : vector<2x512xf32>
    %c40 = arith.constant 40 : index
    %c0_113 = arith.constant 0 : index
    %125 = vector.load %arg11[%c40, %c0_113] : memref<88x64xbf16, #tpu.memory_space<vmem>>, vector<2x64xbf16>
    %c256_114 = arith.constant 256 : index
    %c0_115 = arith.constant 0 : index
    %126 = vector.load %arg12[%c256_114, %c0_115] : memref<640x512xbf16, #tpu.memory_space<vmem>>, vector<64x512xbf16>
    %cst_116 = arith.constant dense<0.000000e+00> : vector<2x512xf32>
    %127 = tpu.matmul %125, %126, %cst_116 {dimension_numbers = #tpu.dot_dimension_numbers<[1], [0], [0], [1], [0, 0, 1, 1], [], []>} : vector<2x64xbf16>, vector<64x512xbf16>, vector<2x512xf32> -> vector<2x512xf32>
    %128 = arith.addf %124, %127 : vector<2x512xf32>
    %c46 = arith.constant 46 : index
    %c0_117 = arith.constant 0 : index
    %129 = vector.load %arg11[%c46, %c0_117] : memref<88x64xbf16, #tpu.memory_space<vmem>>, vector<2x64xbf16>
    %c320_118 = arith.constant 320 : index
    %c0_119 = arith.constant 0 : index
    %130 = vector.load %arg12[%c320_118, %c0_119] : memref<640x512xbf16, #tpu.memory_space<vmem>>, vector<64x512xbf16>
    %cst_120 = arith.constant dense<0.000000e+00> : vector<2x512xf32>
    %131 = tpu.matmul %129, %130, %cst_120 {dimension_numbers = #tpu.dot_dimension_numbers<[1], [0], [0], [1], [0, 0, 1, 1], [], []>} : vector<2x64xbf16>, vector<64x512xbf16>, vector<2x512xf32> -> vector<2x512xf32>
    %132 = arith.addf %128, %131 : vector<2x512xf32>
    %c48 = arith.constant 48 : index
    %c0_121 = arith.constant 0 : index
    %133 = vector.load %arg11[%c48, %c0_121] : memref<88x64xbf16, #tpu.memory_space<vmem>>, vector<2x64xbf16>
    %c384_122 = arith.constant 384 : index
    %c0_123 = arith.constant 0 : index
    %134 = vector.load %arg12[%c384_122, %c0_123] : memref<640x512xbf16, #tpu.memory_space<vmem>>, vector<64x512xbf16>
    %cst_124 = arith.constant dense<0.000000e+00> : vector<2x512xf32>
    %135 = tpu.matmul %133, %134, %cst_124 {dimension_numbers = #tpu.dot_dimension_numbers<[1], [0], [0], [1], [0, 0, 1, 1], [], []>} : vector<2x64xbf16>, vector<64x512xbf16>, vector<2x512xf32> -> vector<2x512xf32>
    %136 = arith.addf %132, %135 : vector<2x512xf32>
    %c50 = arith.constant 50 : index
    %c0_125 = arith.constant 0 : index
    %137 = vector.load %arg11[%c50, %c0_125] : memref<88x64xbf16, #tpu.memory_space<vmem>>, vector<2x64xbf16>
    %c448_126 = arith.constant 448 : index
    %c0_127 = arith.constant 0 : index
    %138 = vector.load %arg12[%c448_126, %c0_127] : memref<640x512xbf16, #tpu.memory_space<vmem>>, vector<64x512xbf16>
    %cst_128 = arith.constant dense<0.000000e+00> : vector<2x512xf32>
    %139 = tpu.matmul %137, %138, %cst_128 {dimension_numbers = #tpu.dot_dimension_numbers<[1], [0], [0], [1], [0, 0, 1, 1], [], []>} : vector<2x64xbf16>, vector<64x512xbf16>, vector<2x512xf32> -> vector<2x512xf32>
    %140 = arith.addf %136, %139 : vector<2x512xf32>
    %c52 = arith.constant 52 : index
    %c0_129 = arith.constant 0 : index
    %141 = vector.load %arg11[%c52, %c0_129] : memref<88x64xbf16, #tpu.memory_space<vmem>>, vector<2x64xbf16>
    %c512_130 = arith.constant 512 : index
    %c0_131 = arith.constant 0 : index
    %142 = vector.load %arg12[%c512_130, %c0_131] : memref<640x512xbf16, #tpu.memory_space<vmem>>, vector<64x512xbf16>
    %cst_132 = arith.constant dense<0.000000e+00> : vector<2x512xf32>
    %143 = tpu.matmul %141, %142, %cst_132 {dimension_numbers = #tpu.dot_dimension_numbers<[1], [0], [0], [1], [0, 0, 1, 1], [], []>} : vector<2x64xbf16>, vector<64x512xbf16>, vector<2x512xf32> -> vector<2x512xf32>
    %144 = arith.addf %140, %143 : vector<2x512xf32>
    %c54 = arith.constant 54 : index
    %c0_133 = arith.constant 0 : index
    %145 = vector.load %arg11[%c54, %c0_133] : memref<88x64xbf16, #tpu.memory_space<vmem>>, vector<2x64xbf16>
    %c576 = arith.constant 576 : index
    %c0_134 = arith.constant 0 : index
    %146 = vector.load %arg12[%c576, %c0_134] : memref<640x512xbf16, #tpu.memory_space<vmem>>, vector<64x512xbf16>
    %cst_135 = arith.constant dense<0.000000e+00> : vector<2x512xf32>
    %147 = tpu.matmul %145, %146, %cst_135 {dimension_numbers = #tpu.dot_dimension_numbers<[1], [0], [0], [1], [0, 0, 1, 1], [], []>} : vector<2x64xbf16>, vector<64x512xbf16>, vector<2x512xf32> -> vector<2x512xf32>
    %148 = arith.addf %144, %147 : vector<2x512xf32>
    %c0_136 = arith.constant 0 : index
    %c0_137 = arith.constant 0 : index
    %149 = vector.load %arg7[%c0_136, %c0_137] : memref<1x512xf32, #tpu.memory_space<vmem>>, vector<1x512xf32>
    %150 = vector.broadcast %149 : vector<1x512xf32> to vector<2x512xf32>
    %151 = arith.addf %148, %150 : vector<2x512xf32>
    %cst_138 = arith.constant 0.000000e+00 : f32
    %152 = vector.broadcast %cst_138 : f32 to vector<2x512xf32>
    %153 = arith.maximumf %151, %152 : vector<2x512xf32>
    %154 = arith.truncf %153 : vector<2x512xf32> to vector<2x512xbf16>
    %c0_139 = arith.constant 0 : index
    %c0_140 = arith.constant 0 : index
    %155 = vector.load %arg8[%c0_139, %c0_140] : memref<512x2xbf16, #tpu.memory_space<vmem>>, vector<512x2xbf16>
    %cst_141 = arith.constant dense<0.000000e+00> : vector<2x2xf32>
    %156 = tpu.matmul %154, %155, %cst_141 {dimension_numbers = #tpu.dot_dimension_numbers<[1], [0], [0], [1], [0, 0, 1, 1], [], []>} : vector<2x512xbf16>, vector<512x2xbf16>, vector<2x2xf32> -> vector<2x2xf32>
    %c0_142 = arith.constant 0 : index
    %c0_143 = arith.constant 0 : index
    %157 = vector.load %arg9[%c0_142, %c0_143] : memref<1x2xf32, #tpu.memory_space<vmem>>, vector<1x2xf32>
    %158 = vector.broadcast %157 : vector<1x2xf32> to vector<2x2xf32>
    %159 = arith.addf %156, %158 : vector<2x2xf32>
    %cst_144 = arith.constant 0.000000e+00 : f32
    %160 = vector.broadcast %cst_144 : f32 to vector<2x2xf32>
    %161 = arith.subf %160, %159 : vector<2x2xf32>
    %162 = math.exp %161 : vector<2x2xf32>
    %cst_145 = arith.constant 1.000000e+00 : f32
    %163 = vector.broadcast %cst_145 : f32 to vector<2x2xf32>
    %164 = arith.addf %163, %162 : vector<2x2xf32>
    %cst_146 = arith.constant 1.000000e+00 : f32
    %165 = vector.broadcast %cst_146 : f32 to vector<2x2xf32>
    %166 = arith.divf %165, %164 : vector<2x2xf32>
    %c0_147 = arith.constant 0 : index
    %c0_148 = arith.constant 0 : index
    %167 = vector.load %arg10[%c0_147, %c0_148] : memref<2x2xf32, #tpu.memory_space<vmem>>, vector<2x2xf32>
    tpu.vector_store %arg10[%c0_147, %c0_148], %166 {strides = array<i32>} : memref<2x2xf32, #tpu.memory_space<vmem>>, vector<2x2xf32>,
    return
  }
  func.func @transform_0(%arg0: i32) -> (i32, i32) {
    %c0_i32 = arith.constant 0 : i32
    %c0_i32_0 = arith.constant 0 : i32
    %c0_i32_1 = arith.constant 0 : i32
    return %c0_i32, %c0_i32_0 : i32, i32
  }
  func.func @transform_1(%arg0: i32) -> (i32, i32) {
    %c0_i32 = arith.constant 0 : i32
    %c0_i32_0 = arith.constant 0 : i32
    %c0_i32_1 = arith.constant 0 : i32
    return %c0_i32, %c0_i32_0 : i32, i32
  }
  func.func @transform_2(%arg0: i32) -> (i32, i32) {
    %c0_i32 = arith.constant 0 : i32
    %c0_i32_0 = arith.constant 0 : i32
    %c0_i32_1 = arith.constant 0 : i32
    return %c0_i32, %c0_i32_0 : i32, i32
  }
  func.func @transform_3(%arg0: i32) -> (i32, i32) {
    %c0_i32 = arith.constant 0 : i32
    %c0_i32_0 = arith.constant 0 : i32
    %c0_i32_1 = arith.constant 0 : i32
    return %c0_i32, %c0_i32_0 : i32, i32
  }
  func.func @transform_4(%arg0: i32) -> (i32, i32) {
    %c0_i32 = arith.constant 0 : i32
    %c0_i32_0 = arith.constant 0 : i32
    %c0_i32_1 = arith.constant 0 : i32
    return %c0_i32, %c0_i32_0 : i32, i32
  }
  func.func @transform_6(%arg0: i32) -> (i32, i32) {
    %c0_i32 = arith.constant 0 : i32
    %c0_i32_0 = arith.constant 0 : i32
    %c0_i32_1 = arith.constant 0 : i32
    return %c0_i32, %c0_i32_0 : i32, i32
  }
  func.func @transform_7(%arg0: i32) -> (i32, i32) {
    %c0_i32 = arith.constant 0 : i32
    %c0_i32_0 = arith.constant 0 : i32
    %c0_i32_1 = arith.constant 0 : i32
    return %c0_i32, %c0_i32_0 : i32, i32
  }
  func.func @transform_8(%arg0: i32) -> (i32, i32) {
    %c0_i32 = arith.constant 0 : i32
    %c0_i32_0 = arith.constant 0 : i32
    %c0_i32_1 = arith.constant 0 : i32
    return %c0_i32, %c0_i32_0 : i32, i32
  }
  func.func @transform_9(%arg0: i32) -> (i32, i32) {
    %c0_i32 = arith.constant 0 : i32
    %c0_i32_0 = arith.constant 0 : i32
    %c0_i32_1 = arith.constant 0 : i32
    return %c0_i32, %c0_i32_0 : i32, i32
  }
}

</mosaic_0001>

<bundles_post_ra>
// kernel: detect_events_forward.1
= control target key start
LH: loop header
LB: loop body
LE: loop exit
PB: predicated region body
PF: predicated region fallthrough
CT: control target
= control target key end

     0   :  { %14 = vsyncpa [#allocation6], 0  ;;  %s8946_s0 = inlined_call_operand.vmem [shape: bf16[56,512], index: 0, kind: input, shape index: {}]   ;;  %s8947_s1 = inlined_call_operand.vmem [shape: bf16[512,64], index: 1, kind: input, shape index: {}]   ;;  %s8948_s2 = inlined_call_operand.vmem [shape: bf16[576,64], index: 2, kind: input, shape index: {}]   ;;  %s8949_s3 = inlined_call_operand.vmem [shape: f32[2,64], index: 3, kind: input, shape index: {}]   ;;  %s8950_s4 = inlined_call_operand.vmem [shape: f32[56,1], index: 4, kind: input, shape index: {}]   ;;  %s8951_s5 = inlined_call_operand.vmem [shape: bf16[640,512], index: 5, kind: input, shape index: {}]   ;;  %s8952_s6 = inlined_call_operand.vmem [shape: f32[1,512], index: 6, kind: input, shape index: {}]   ;;  %s8953_s7 = inlined_call_operand.vmem [shape: bf16[512,2], index: 7, kind: input, shape index: {}]   ;;  %s8954_s8 = inlined_call_operand.vmem [shape: f32[1,2], index: 8, kind: input, shape index: {}]   ;;  %s8955_s9 = inlined_call_operand.hbm [shape: f32[2,2], index: 9, kind: output, shape index: {}]  }
   0x1   :  { %v49_v0 = vld [vmem:[%s8951_s5] sm:$0xf]  ;;  %v51_v1 = vld [vmem:[%s8951_s5 + $0x10] sm:$0xf]  ;;  %v53_v2 = vld [vmem:[%s8951_s5 + $0x4] sm:$0xf] }
   0x2   :  { %50 = vst [vmem:[#allocation3] sm:$0xf] %v49_v0  ;;  %52 = vst [vmem:[#allocation3 + $0x4] sm:$0xf] %v51_v1  ;;  %v55_v3 = vld [vmem:[%s8951_s5 + $0x14] sm:$0xf] }
   0x3   :  { %v57_v4 = vld [vmem:[%s8951_s5 + $0x8] sm:$0xf]  ;;  %54 = vst [vmem:[#allocation3 + $0x8] sm:$0xf] %v53_v2  ;;  %56 = vst [vmem:[#allocation3 + $0xc] sm:$0xf] %v55_v3 }
   0x4   :  { %58 = vst [vmem:[#allocation3 + $0x10] sm:$0xf] %v57_v4  ;;  %v59_v5 = vld [vmem:[%s8951_s5 + $0x18] sm:$0xf]  ;;  %v61_v6 = vld [vmem:[%s8951_s5 + $0xc] sm:$0xf] }
   0x5   :  { %v63_v7 = vld [vmem:[%s8951_s5 + $0x1c] sm:$0xff]   ;;  %60 = vst [vmem:[#allocation3 + $0x14] sm:$0xf] %v59_v5  ;;  %62 = vst [vmem:[#allocation3 + $0x18] sm:$0xf] %v61_v6 }
   0x6   :  { %64 = vst [vmem:[#allocation3 + $0x1c] sm:$0xff] %v63_v7   ;;  %v67_v8 = vld [vmem:[%s8951_s5 + $0x30] sm:$0xf]  ;;  %v69_v9 = vld [vmem:[%s8951_s5 + $0x24] sm:$0xf]  ;;  %v79_v14 = vld [vmem:[%s8951_s5 + $0x3c] sm:$0xff]  }
   0x7   :  { %v71_v10 = vld [vmem:[%s8951_s5 + $0x34] sm:$0xf]  ;;  %68 = vst [vmem:[#allocation3 + $0x24] sm:$0xf] %v67_v8  ;;  %70 = vst [vmem:[#allocation3 + $0x28] sm:$0xf] %v69_v9 }
   0x8   :  { %72 = vst [vmem:[#allocation3 + $0x2c] sm:$0xf] %v71_v10  ;;  %v73_v11 = vld [vmem:[%s8951_s5 + $0x28] sm:$0xf]  ;;  %v75_v12 = vld [vmem:[%s8951_s5 + $0x38] sm:$0xf] }
   0x9   :  { %v77_v13 = vld [vmem:[%s8951_s5 + $0x2c] sm:$0xf]  ;;  %74 = vst [vmem:[#allocation3 + $0x30] sm:$0xf] %v73_v11  ;;  %76 = vst [vmem:[#allocation3 + $0x34] sm:$0xf] %v75_v12 }
   0xa   :  { %78 = vst [vmem:[#allocation3 + $0x38] sm:$0xf] %v77_v13  ;;  %v83_v15 = vld [vmem:[%s8951_s5 + $0x50] sm:$0xf]  ;;  %v85_v16 = vld [vmem:[%s8951_s5 + $0x44] sm:$0xf] }
   0xb   :  { %80 = vst [vmem:[#allocation3 + $0x3c] sm:$0xff] %v79_v14   ;;  %84 = vst [vmem:[#allocation3 + $0x44] sm:$0xf] %v83_v15  ;;  %v87_v17 = vld [vmem:[%s8951_s5 + $0x54] sm:$0xf]  ;;  %v95_v21 = vld [vmem:[%s8951_s5 + $0x5c] sm:$0xff]  }
   0xc   :  { %86 = vst [vmem:[#allocation3 + $0x48] sm:$0xf] %v85_v16  ;;  %v89_v18 = vld [vmem:[%s8951_s5 + $0x48] sm:$0xf]  ;;  %v91_v19 = vld [vmem:[%s8951_s5 + $0x58] sm:$0xf] }
   0xd   :  { %88 = vst [vmem:[#allocation3 + $0x4c] sm:$0xf] %v87_v17  ;;  %90 = vst [vmem:[#allocation3 + $0x50] sm:$0xf] %v89_v18  ;;  %v93_v20 = vld [vmem:[%s8951_s5 + $0x4c] sm:$0xf] }
   0xe   :  { %92 = vst [vmem:[#allocation3 + $0x54] sm:$0xf] %v91_v19  ;;  %v99_v22 = vld [vmem:[%s8951_s5 + $0x70] sm:$0xf]  ;;  %94 = vst [vmem:[#allocation3 + $0x58] sm:$0xf] %v93_v20 }
   0xf   :  { %96 = vst [vmem:[#allocation3 + $0x5c] sm:$0xff] %v95_v21   ;;  %100 = vst [vmem:[#allocation3 + $0x64] sm:$0xf] %v99_v22  ;;  %v101_v23 = vld [vmem:[%s8951_s5 + $0x64] sm:$0xf]  ;;  %v111_v28 = vld [vmem:[%s8951_s5 + $0x7c] sm:$0xff]  }
  0x10   :  { %v103_v24 = vld [vmem:[%s8951_s5 + $0x74] sm:$0xf]  ;;  %v105_v25 = vld [vmem:[%s8951_s5 + $0x68] sm:$0xf]  ;;  %102 = vst [vmem:[#allocation3 + $0x68] sm:$0xf] %v101_v23 }
  0x11   :  { %104 = vst [vmem:[#allocation3 + $0x6c] sm:$0xf] %v103_v24  ;;  %106 = vst [vmem:[#allocation3 + $0x70] sm:$0xf] %v105_v25  ;;  %v107_v26 = vld [vmem:[%s8951_s5 + $0x78] sm:$0xf] }
  0x12   :  { %v109_v27 = vld [vmem:[%s8951_s5 + $0x6c] sm:$0xf]  ;;  %108 = vst [vmem:[#allocation3 + $0x74] sm:$0xf] %v107_v26  ;;  %112 = vst [vmem:[#allocation3 + $0x7c] sm:$0xff] %v111_v28   ;;  %v127_v35 = vld [vmem:[%s8951_s5 + $0x9c] sm:$0xff]  }
  0x13   :  { %110 = vst [vmem:[#allocation3 + $0x78] sm:$0xf] %v109_v27  ;;  %v115_v29 = vld [vmem:[%s8951_s5 + $0x90] sm:$0xf]  ;;  %v117_v30 = vld [vmem:[%s8951_s5 + $0x84] sm:$0xf] }
  0x14   :  { %v119_v31 = vld [vmem:[%s8951_s5 + $0x94] sm:$0xf]  ;;  %116 = vst [vmem:[#allocation3 + $0x84] sm:$0xf] %v115_v29  ;;  %118 = vst [vmem:[#allocation3 + $0x88] sm:$0xf] %v117_v30 }
  0x15   :  { %120 = vst [vmem:[#allocation3 + $0x8c] sm:$0xf] %v119_v31  ;;  %v121_v32 = vld [vmem:[%s8951_s5 + $0x88] sm:$0xf]  ;;  %v123_v33 = vld [vmem:[%s8951_s5 + $0x98] sm:$0xf] }
  0x16   :  { %v125_v34 = vld [vmem:[%s8951_s5 + $0x8c] sm:$0xf]  ;;  %122 = vst [vmem:[#allocation3 + $0x90] sm:$0xf] %v121_v32  ;;  %124 = vst [vmem:[#allocation3 + $0x94] sm:$0xf] %v123_v33 }
  0x17   :  { %126 = vst [vmem:[#allocation3 + $0x98] sm:$0xf] %v125_v34  ;;  %v131_v36 = vld [vmem:[%s8951_s5 + $0xb0] sm:$0xf]  ;;  %v133_v37 = vld [vmem:[%s8951_s5 + $0xa4] sm:$0xf] }
  0x18   :  { %128 = vst [vmem:[#allocation3 + $0x9c] sm:$0xff] %v127_v35   ;;  %132 = vst [vmem:[#allocation3 + $0xa4] sm:$0xf] %v131_v36  ;;  %v135_v38 = vld [vmem:[%s8951_s5 + $0xb4] sm:$0xf]  ;;  %v143_v42 = vld [vmem:[%s8951_s5 + $0xbc] sm:$0xff]  }
  0x19   :  { %134 = vst [vmem:[#allocation3 + $0xa8] sm:$0xf] %v133_v37  ;;  %v137_v39 = vld [vmem:[%s8951_s5 + $0xa8] sm:$0xf]  ;;  %v139_v40 = vld [vmem:[%s8951_s5 + $0xb8] sm:$0xf] }
  0x1a   :  { %136 = vst [vmem:[#allocation3 + $0xac] sm:$0xf] %v135_v38  ;;  %138 = vst [vmem:[#allocation3 + $0xb0] sm:$0xf] %v137_v39  ;;  %v141_v41 = vld [vmem:[%s8951_s5 + $0xac] sm:$0xf] }
  0x1b   :  { %140 = vst [vmem:[#allocation3 + $0xb4] sm:$0xf] %v139_v40  ;;  %v147_v43 = vld [vmem:[%s8951_s5 + $0xd0] sm:$0xf]  ;;  %142 = vst [vmem:[#allocation3 + $0xb8] sm:$0xf] %v141_v41 }
  0x1c   :  { %144 = vst [vmem:[#allocation3 + $0xbc] sm:$0xff] %v143_v42   ;;  %148 = vst [vmem:[#allocation3 + $0xc4] sm:$0xf] %v147_v43  ;;  %v149_v44 = vld [vmem:[%s8951_s5 + $0xc4] sm:$0xf]  ;;  %v159_v49 = vld [vmem:[%s8951_s5 + $0xdc] sm:$0xff]  }
  0x1d   :  { %v151_v45 = vld [vmem:[%s8951_s5 + $0xd4] sm:$0xf]  ;;  %v153_v46 = vld [vmem:[%s8951_s5 + $0xc8] sm:$0xf]  ;;  %150 = vst [vmem:[#allocation3 + $0xc8] sm:$0xf] %v149_v44 }
  0x1e   :  { %152 = vst [vmem:[#allocation3 + $0xcc] sm:$0xf] %v151_v45  ;;  %154 = vst [vmem:[#allocation3 + $0xd0] sm:$0xf] %v153_v46  ;;  %v155_v47 = vld [vmem:[%s8951_s5 + $0xd8] sm:$0xf] }
  0x1f   :  { %v157_v48 = vld [vmem:[%s8951_s5 + $0xcc] sm:$0xf]  ;;  %156 = vst [vmem:[#allocation3 + $0xd4] sm:$0xf] %v155_v47  ;;  %160 = vst [vmem:[#allocation3 + $0xdc] sm:$0xff] %v159_v49   ;;  %v175_v56 = vld [vmem:[%s8951_s5 + $0xfc] sm:$0xff]  }
  0x20   :  { %158 = vst [vmem:[#allocation3 + $0xd8] sm:$0xf] %v157_v48  ;;  %v163_v50 = vld [vmem:[%s8951_s5 + $0xf0] sm:$0xf]  ;;  %v165_v51 = vld [vmem:[%s8951_s5 + $0xe4] sm:$0xf] }
  0x21   :  { %v167_v52 = vld [vmem:[%s8951_s5 + $0xf4] sm:$0xf]  ;;  %164 = vst [vmem:[#allocation3 + $0xe4] sm:$0xf] %v163_v50  ;;  %166 = vst [vmem:[#allocation3 + $0xe8] sm:$0xf] %v165_v51 }
  0x22   :  { %168 = vst [vmem:[#allocation3 + $0xec] sm:$0xf] %v167_v52  ;;  %v169_v53 = vld [vmem:[%s8951_s5 + $0xe8] sm:$0xf]  ;;  %v171_v54 = vld [vmem:[%s8951_s5 + $0xf8] sm:$0xf] }
  0x23   :  { %v173_v55 = vld [vmem:[%s8951_s5 + $0xec] sm:$0xf]  ;;  %170 = vst [vmem:[#allocation3 + $0xf0] sm:$0xf] %v169_v53  ;;  %172 = vst [vmem:[#allocation3 + $0xf4] sm:$0xf] %v171_v54 }
  0x24   :  { %174 = vst [vmem:[#allocation3 + $0xf8] sm:$0xf] %v173_v55  ;;  %v179_v57 = vld [vmem:[%s8951_s5 + $0x110] sm:$0xf]  ;;  %v181_v58 = vld [vmem:[%s8951_s5 + $0x104] sm:$0xf] }
  0x25   :  { %176 = vst [vmem:[#allocation3 + $0xfc] sm:$0xff] %v175_v56   ;;  %180 = vst [vmem:[#allocation3 + $0x104] sm:$0xf] %v179_v57  ;;  %v183_v59 = vld [vmem:[%s8951_s5 + $0x114] sm:$0xf]  ;;  %v191_v63 = vld [vmem:[%s8951_s5 + $0x11c] sm:$0xff]  }
  0x26   :  { %182 = vst [vmem:[#allocation3 + $0x108] sm:$0xf] %v181_v58  ;;  %v185_v60 = vld [vmem:[%s8951_s5 + $0x108] sm:$0xf]  ;;  %v187_v61 = vld [vmem:[%s8951_s5 + $0x118] sm:$0xf] }
  0x27   :  { %184 = vst [vmem:[#allocation3 + $0x10c] sm:$0xf] %v183_v59  ;;  %186 = vst [vmem:[#allocation3 + $0x110] sm:$0xf] %v185_v60  ;;  %v189_v62 = vld [vmem:[%s8951_s5 + $0x10c] sm:$0xf] }
  0x28   :  { %188 = vst [vmem:[#allocation3 + $0x114] sm:$0xf] %v187_v61  ;;  %v195_v0 = vld [vmem:[%s8951_s5 + $0x130] sm:$0xf]  ;;  %190 = vst [vmem:[#allocation3 + $0x118] sm:$0xf] %v189_v62 }
  0x29   :  { %192 = vst [vmem:[#allocation3 + $0x11c] sm:$0xff] %v191_v63   ;;  %196 = vst [vmem:[#allocation3 + $0x124] sm:$0xf] %v195_v0  ;;  %v197_v1 = vld [vmem:[%s8951_s5 + $0x124] sm:$0xf]  ;;  %v207_v6 = vld [vmem:[%s8951_s5 + $0x13c] sm:$0xff]  }
  0x2a   :  { %v199_v2 = vld [vmem:[%s8951_s5 + $0x134] sm:$0xf]  ;;  %v201_v3 = vld [vmem:[%s8951_s5 + $0x128] sm:$0xf]  ;;  %198 = vst [vmem:[#allocation3 + $0x128] sm:$0xf] %v197_v1 }
  0x2b   :  { %200 = vst [vmem:[#allocation3 + $0x12c] sm:$0xf] %v199_v2  ;;  %202 = vst [vmem:[#allocation3 + $0x130] sm:$0xf] %v201_v3  ;;  %v203_v4 = vld [vmem:[%s8951_s5 + $0x138] sm:$0xf] }
  0x2c   :  { %v205_v5 = vld [vmem:[%s8951_s5 + $0x12c] sm:$0xf]  ;;  %204 = vst [vmem:[#allocation3 + $0x134] sm:$0xf] %v203_v4  ;;  %208 = vst [vmem:[#allocation3 + $0x13c] sm:$0xff] %v207_v6   ;;  %v223_v13 = vld [vmem:[%s8951_s5 + $0x15c] sm:$0xff]  }
  0x2d   :  { %206 = vst [vmem:[#allocation3 + $0x138] sm:$0xf] %v205_v5  ;;  %v211_v7 = vld [vmem:[%s8951_s5 + $0x150] sm:$0xf]  ;;  %v213_v8 = vld [vmem:[%s8951_s5 + $0x144] sm:$0xf] }
  0x2e   :  { %v215_v9 = vld [vmem:[%s8951_s5 + $0x154] sm:$0xf]  ;;  %212 = vst [vmem:[#allocation3 + $0x144] sm:$0xf] %v211_v7  ;;  %214 = vst [vmem:[#allocation3 + $0x148] sm:$0xf] %v213_v8 }
  0x2f   :  { %216 = vst [vmem:[#allocation3 + $0x14c] sm:$0xf] %v215_v9  ;;  %v217_v10 = vld [vmem:[%s8951_s5 + $0x148] sm:$0xf]  ;;  %v219_v11 = vld [vmem:[%s8951_s5 + $0x158] sm:$0xf] }
  0x30   :  { %v221_v12 = vld [vmem:[%s8951_s5 + $0x14c] sm:$0xf]  ;;  %218 = vst [vmem:[#allocation3 + $0x150] sm:$0xf] %v217_v10  ;;  %220 = vst [vmem:[#allocation3 + $0x154] sm:$0xf] %v219_v11 }
  0x31   :  { %222 = vst [vmem:[#allocation3 + $0x158] sm:$0xf] %v221_v12  ;;  %v227_v14 = vld [vmem:[%s8951_s5 + $0x170] sm:$0xf]  ;;  %v229_v15 = vld [vmem:[%s8951_s5 + $0x164] sm:$0xf] }
  0x32   :  { %224 = vst [vmem:[#allocation3 + $0x15c] sm:$0xff] %v223_v13   ;;  %228 = vst [vmem:[#allocation3 + $0x164] sm:$0xf] %v227_v14  ;;  %v231_v16 = vld [vmem:[%s8951_s5 + $0x174] sm:$0xf]  ;;  %v239_v20 = vld [vmem:[%s8951_s5 + $0x17c] sm:$0xff]  }
  0x33   :  { %230 = vst [vmem:[#allocation3 + $0x168] sm:$0xf] %v229_v15  ;;  %v233_v17 = vld [vmem:[%s8951_s5 + $0x168] sm:$0xf]  ;;  %v235_v18 = vld [vmem:[%s8951_s5 + $0x178] sm:$0xf] }
  0x34   :  { %232 = vst [vmem:[#allocation3 + $0x16c] sm:$0xf] %v231_v16  ;;  %234 = vst [vmem:[#allocation3 + $0x170] sm:$0xf] %v233_v17  ;;  %v237_v19 = vld [vmem:[%s8951_s5 + $0x16c] sm:$0xf] }
  0x35   :  { %236 = vst [vmem:[#allocation3 + $0x174] sm:$0xf] %v235_v18  ;;  %v243_v21 = vld [vmem:[%s8951_s5 + $0x190] sm:$0xf]  ;;  %238 = vst [vmem:[#allocation3 + $0x178] sm:$0xf] %v237_v19 }
  0x36   :  { %240 = vst [vmem:[#allocation3 + $0x17c] sm:$0xff] %v239_v20   ;;  %244 = vst [vmem:[#allocation3 + $0x184] sm:$0xf] %v243_v21  ;;  %v245_v22 = vld [vmem:[%s8951_s5 + $0x184] sm:$0xf]  ;;  %v255_v27 = vld [vmem:[%s8951_s5 + $0x19c] sm:$0xff]  }
  0x37   :  { %v247_v23 = vld [vmem:[%s8951_s5 + $0x194] sm:$0xf]  ;;  %v249_v24 = vld [vmem:[%s8951_s5 + $0x188] sm:$0xf]  ;;  %246 = vst [vmem:[#allocation3 + $0x188] sm:$0xf] %v245_v22 }
  0x38   :  { %248 = vst [vmem:[#allocation3 + $0x18c] sm:$0xf] %v247_v23  ;;  %250 = vst [vmem:[#allocation3 + $0x190] sm:$0xf] %v249_v24  ;;  %v251_v25 = vld [vmem:[%s8951_s5 + $0x198] sm:$0xf] }
  0x39   :  { %v253_v26 = vld [vmem:[%s8951_s5 + $0x18c] sm:$0xf]  ;;  %252 = vst [vmem:[#allocation3 + $0x194] sm:$0xf] %v251_v25  ;;  %256 = vst [vmem:[#allocation3 + $0x19c] sm:$0xff] %v255_v27   ;;  %v271_v34 = vld [vmem:[%s8951_s5 + $0x1bc] sm:$0xff]  }
  0x3a   :  { %254 = vst [vmem:[#allocation3 + $0x198] sm:$0xf] %v253_v26  ;;  %v259_v28 = vld [vmem:[%s8951_s5 + $0x1b0] sm:$0xf]  ;;  %v261_v29 = vld [vmem:[%s8951_s5 + $0x1a4] sm:$0xf] }
  0x3b   :  { %v263_v30 = vld [vmem:[%s8951_s5 + $0x1b4] sm:$0xf]  ;;  %260 = vst [vmem:[#allocation3 + $0x1a4] sm:$0xf] %v259_v28  ;;  %262 = vst [vmem:[#allocation3 + $0x1a8] sm:$0xf] %v261_v29 }
  0x3c   :  { %264 = vst [vmem:[#allocation3 + $0x1ac] sm:$0xf] %v263_v30  ;;  %v265_v31 = vld [vmem:[%s8951_s5 + $0x1a8] sm:$0xf]  ;;  %v267_v32 = vld [vmem:[%s8951_s5 + $0x1b8] sm:$0xf] }
  0x3d   :  { %v269_v33 = vld [vmem:[%s8951_s5 + $0x1ac] sm:$0xf]  ;;  %266 = vst [vmem:[#allocation3 + $0x1b0] sm:$0xf] %v265_v31  ;;  %268 = vst [vmem:[#allocation3 + $0x1b4] sm:$0xf] %v267_v32 }
  0x3e   :  { %270 = vst [vmem:[#allocation3 + $0x1b8] sm:$0xf] %v269_v33  ;;  %v275_v35 = vld [vmem:[%s8951_s5 + $0x1d0] sm:$0xf]  ;;  %v277_v36 = vld [vmem:[%s8951_s5 + $0x1c4] sm:$0xf] }
  0x3f   :  { %272 = vst [vmem:[#allocation3 + $0x1bc] sm:$0xff] %v271_v34   ;;  %276 = vst [vmem:[#allocation3 + $0x1c4] sm:$0xf] %v275_v35  ;;  %v279_v37 = vld [vmem:[%s8951_s5 + $0x1d4] sm:$0xf]  ;;  %v287_v41 = vld [vmem:[%s8951_s5 + $0x1dc] sm:$0xff]  }
  0x40   :  { %278 = vst [vmem:[#allocation3 + $0x1c8] sm:$0xf] %v277_v36  ;;  %v281_v38 = vld [vmem:[%s8951_s5 + $0x1c8] sm:$0xf]  ;;  %v283_v39 = vld [vmem:[%s8951_s5 + $0x1d8] sm:$0xf] }
  0x41   :  { %280 = vst [vmem:[#allocation3 + $0x1cc] sm:$0xf] %v279_v37  ;;  %282 = vst [vmem:[#allocation3 + $0x1d0] sm:$0xf] %v281_v38  ;;  %v285_v40 = vld [vmem:[%s8951_s5 + $0x1cc] sm:$0xf] }
  0x42   :  { %284 = vst [vmem:[#allocation3 + $0x1d4] sm:$0xf] %v283_v39  ;;  %v291_v42 = vld [vmem:[%s8951_s5 + $0x1f0] sm:$0xf]  ;;  %286 = vst [vmem:[#allocation3 + $0x1d8] sm:$0xf] %v285_v40 }
  0x43   :  { %288 = vst [vmem:[#allocation3 + $0x1dc] sm:$0xff] %v287_v41   ;;  %292 = vst [vmem:[#allocation3 + $0x1e4] sm:$0xf] %v291_v42  ;;  %v293_v43 = vld [vmem:[%s8951_s5 + $0x1e4] sm:$0xf]  ;;  %v303_v48 = vld [vmem:[%s8951_s5 + $0x1fc] sm:$0xff]  }
  0x44   :  { %v295_v44 = vld [vmem:[%s8951_s5 + $0x1f4] sm:$0xf]  ;;  %v297_v45 = vld [vmem:[%s8951_s5 + $0x1e8] sm:$0xf]  ;;  %294 = vst [vmem:[#allocation3 + $0x1e8] sm:$0xf] %v293_v43 }
  0x45   :  { %296 = vst [vmem:[#allocation3 + $0x1ec] sm:$0xf] %v295_v44  ;;  %298 = vst [vmem:[#allocation3 + $0x1f0] sm:$0xf] %v297_v45  ;;  %v299_v46 = vld [vmem:[%s8951_s5 + $0x1f8] sm:$0xf] }
  0x46   :  { %v301_v47 = vld [vmem:[%s8951_s5 + $0x1ec] sm:$0xf]  ;;  %300 = vst [vmem:[#allocation3 + $0x1f4] sm:$0xf] %v299_v46  ;;  %304 = vst [vmem:[#allocation3 + $0x1fc] sm:$0xff] %v303_v48   ;;  %v319_v55 = vld [vmem:[%s8951_s5 + $0x21c] sm:$0xff]  }
  0x47   :  { %302 = vst [vmem:[#allocation3 + $0x1f8] sm:$0xf] %v301_v47  ;;  %v307_v49 = vld [vmem:[%s8951_s5 + $0x210] sm:$0xf]  ;;  %v309_v50 = vld [vmem:[%s8951_s5 + $0x204] sm:$0xf] }
  0x48   :  { %v311_v51 = vld [vmem:[%s8951_s5 + $0x214] sm:$0xf]  ;;  %308 = vst [vmem:[#allocation3 + $0x204] sm:$0xf] %v307_v49  ;;  %310 = vst [vmem:[#allocation3 + $0x208] sm:$0xf] %v309_v50 }
  0x49   :  { %312 = vst [vmem:[#allocation3 + $0x20c] sm:$0xf] %v311_v51  ;;  %v313_v52 = vld [vmem:[%s8951_s5 + $0x208] sm:$0xf]  ;;  %v315_v53 = vld [vmem:[%s8951_s5 + $0x218] sm:$0xf] }
  0x4a   :  { %v317_v54 = vld [vmem:[%s8951_s5 + $0x20c] sm:$0xf]  ;;  %314 = vst [vmem:[#allocation3 + $0x210] sm:$0xf] %v313_v52  ;;  %316 = vst [vmem:[#allocation3 + $0x214] sm:$0xf] %v315_v53 }
  0x4b   :  { %318 = vst [vmem:[#allocation3 + $0x218] sm:$0xf] %v317_v54  ;;  %v323_v56 = vld [vmem:[%s8951_s5 + $0x230] sm:$0xf]  ;;  %v325_v57 = vld [vmem:[%s8951_s5 + $0x224] sm:$0xf] }
  0x4c   :  { %320 = vst [vmem:[#allocation3 + $0x21c] sm:$0xff] %v319_v55   ;;  %324 = vst [vmem:[#allocation3 + $0x224] sm:$0xf] %v323_v56  ;;  %v327_v58 = vld [vmem:[%s8951_s5 + $0x234] sm:$0xf]  ;;  %v335_v62 = vld [vmem:[%s8951_s5 + $0x23c] sm:$0xff]  }
  0x4d   :  { %326 = vst [vmem:[#allocation3 + $0x228] sm:$0xf] %v325_v57  ;;  %v329_v59 = vld [vmem:[%s8951_s5 + $0x228] sm:$0xf]  ;;  %v331_v60 = vld [vmem:[%s8951_s5 + $0x238] sm:$0xf] }
  0x4e   :  { %328 = vst [vmem:[#allocation3 + $0x22c] sm:$0xf] %v327_v58  ;;  %330 = vst [vmem:[#allocation3 + $0x230] sm:$0xf] %v329_v59  ;;  %v333_v61 = vld [vmem:[%s8951_s5 + $0x22c] sm:$0xf] }
  0x4f   :  { %332 = vst [vmem:[#allocation3 + $0x234] sm:$0xf] %v331_v60  ;;  %v339_v63 = vld [vmem:[%s8951_s5 + $0x250] sm:$0xf]  ;;  %334 = vst [vmem:[#allocation3 + $0x238] sm:$0xf] %v333_v61 }
  0x50   :  { %336 = vst [vmem:[#allocation3 + $0x23c] sm:$0xff] %v335_v62   ;;  %340 = vst [vmem:[#allocation3 + $0x244] sm:$0xf] %v339_v63  ;;  %v341_v0 = vld [vmem:[%s8951_s5 + $0x244] sm:$0xf]  ;;  %v351_v5 = vld [vmem:[%s8951_s5 + $0x25c] sm:$0xff]  }
  0x51   :  { %v343_v1 = vld [vmem:[%s8951_s5 + $0x254] sm:$0xf]  ;;  %v345_v2 = vld [vmem:[%s8951_s5 + $0x248] sm:$0xf]  ;;  %342 = vst [vmem:[#allocation3 + $0x248] sm:$0xf] %v341_v0 }
  0x52   :  { %344 = vst [vmem:[#allocation3 + $0x24c] sm:$0xf] %v343_v1  ;;  %346 = vst [vmem:[#allocation3 + $0x250] sm:$0xf] %v345_v2  ;;  %v347_v3 = vld [vmem:[%s8951_s5 + $0x258] sm:$0xf] }
  0x53   :  { %v349_v4 = vld [vmem:[%s8951_s5 + $0x24c] sm:$0xf]  ;;  %348 = vst [vmem:[#allocation3 + $0x254] sm:$0xf] %v347_v3  ;;  %352 = vst [vmem:[#allocation3 + $0x25c] sm:$0xff] %v351_v5   ;;  %v367_v12 = vld [vmem:[%s8951_s5 + $0x27c] sm:$0xff]  }
  0x54   :  { %350 = vst [vmem:[#allocation3 + $0x258] sm:$0xf] %v349_v4  ;;  %v355_v6 = vld [vmem:[%s8951_s5 + $0x270] sm:$0xf]  ;;  %v357_v7 = vld [vmem:[%s8951_s5 + $0x264] sm:$0xf] }
  0x55   :  { %v359_v8 = vld [vmem:[%s8951_s5 + $0x274] sm:$0xf]  ;;  %356 = vst [vmem:[#allocation3 + $0x264] sm:$0xf] %v355_v6  ;;  %358 = vst [vmem:[#allocation3 + $0x268] sm:$0xf] %v357_v7 }
  0x56   :  { %360 = vst [vmem:[#allocation3 + $0x26c] sm:$0xf] %v359_v8  ;;  %v361_v9 = vld [vmem:[%s8951_s5 + $0x268] sm:$0xf]  ;;  %v363_v10 = vld [vmem:[%s8951_s5 + $0x278] sm:$0xf] }
  0x57   :  { %v365_v11 = vld [vmem:[%s8951_s5 + $0x26c] sm:$0xf]  ;;  %362 = vst [vmem:[#allocation3 + $0x270] sm:$0xf] %v361_v9  ;;  %364 = vst [vmem:[#allocation3 + $0x274] sm:$0xf] %v363_v10 }
  0x58   :  { %366 = vst [vmem:[#allocation3 + $0x278] sm:$0xf] %v365_v11  ;;  %v371_v13 = vld [vmem:[%s8951_s5 + $0x290] sm:$0xf]  ;;  %v373_v14 = vld [vmem:[%s8951_s5 + $0x284] sm:$0xf] }
  0x59   :  { %368 = vst [vmem:[#allocation3 + $0x27c] sm:$0xff] %v367_v12   ;;  %372 = vst [vmem:[#allocation3 + $0x284] sm:$0xf] %v371_v13  ;;  %v375_v15 = vld [vmem:[%s8951_s5 + $0x294] sm:$0xf]  ;;  %v383_v19 = vld [vmem:[%s8951_s5 + $0x29c] sm:$0xff]  }
  0x5a   :  { %374 = vst [vmem:[#allocation3 + $0x288] sm:$0xf] %v373_v14  ;;  %v377_v16 = vld [vmem:[%s8951_s5 + $0x288] sm:$0xf]  ;;  %v379_v17 = vld [vmem:[%s8951_s5 + $0x298] sm:$0xf] }
  0x5b   :  { %376 = vst [vmem:[#allocation3 + $0x28c] sm:$0xf] %v375_v15  ;;  %378 = vst [vmem:[#allocation3 + $0x290] sm:$0xf] %v377_v16  ;;  %v381_v18 = vld [vmem:[%s8951_s5 + $0x28c] sm:$0xf] }
  0x5c   :  { %380 = vst [vmem:[#allocation3 + $0x294] sm:$0xf] %v379_v17  ;;  %v387_v20 = vld [vmem:[%s8951_s5 + $0x2b0] sm:$0xf]  ;;  %382 = vst [vmem:[#allocation3 + $0x298] sm:$0xf] %v381_v18 }
  0x5d   :  { %384 = vst [vmem:[#allocation3 + $0x29c] sm:$0xff] %v383_v19   ;;  %388 = vst [vmem:[#allocation3 + $0x2a4] sm:$0xf] %v387_v20  ;;  %v389_v21 = vld [vmem:[%s8951_s5 + $0x2a4] sm:$0xf]  ;;  %v399_v26 = vld [vmem:[%s8951_s5 + $0x2bc] sm:$0xff]  }
  0x5e   :  { %v391_v22 = vld [vmem:[%s8951_s5 + $0x2b4] sm:$0xf]  ;;  %v393_v23 = vld [vmem:[%s8951_s5 + $0x2a8] sm:$0xf]  ;;  %390 = vst [vmem:[#allocation3 + $0x2a8] sm:$0xf] %v389_v21 }
  0x5f   :  { %392 = vst [vmem:[#allocation3 + $0x2ac] sm:$0xf] %v391_v22  ;;  %394 = vst [vmem:[#allocation3 + $0x2b0] sm:$0xf] %v393_v23  ;;  %v395_v24 = vld [vmem:[%s8951_s5 + $0x2b8] sm:$0xf] }
  0x60   :  { %v397_v25 = vld [vmem:[%s8951_s5 + $0x2ac] sm:$0xf]  ;;  %396 = vst [vmem:[#allocation3 + $0x2b4] sm:$0xf] %v395_v24  ;;  %400 = vst [vmem:[#allocation3 + $0x2bc] sm:$0xff] %v399_v26   ;;  %v415_v33 = vld [vmem:[%s8951_s5 + $0x2dc] sm:$0xff]  }
  0x61   :  { %398 = vst [vmem:[#allocation3 + $0x2b8] sm:$0xf] %v397_v25  ;;  %v403_v27 = vld [vmem:[%s8951_s5 + $0x2d0] sm:$0xf]  ;;  %v405_v28 = vld [vmem:[%s8951_s5 + $0x2c4] sm:$0xf] }
  0x62   :  { %v407_v29 = vld [vmem:[%s8951_s5 + $0x2d4] sm:$0xf]  ;;  %404 = vst [vmem:[#allocation3 + $0x2c4] sm:$0xf] %v403_v27  ;;  %406 = vst [vmem:[#allocation3 + $0x2c8] sm:$0xf] %v405_v28 }
  0x63   :  { %408 = vst [vmem:[#allocation3 + $0x2cc] sm:$0xf] %v407_v29  ;;  %v409_v30 = vld [vmem:[%s8951_s5 + $0x2c8] sm:$0xf]  ;;  %v411_v31 = vld [vmem:[%s8951_s5 + $0x2d8] sm:$0xf] }
  0x64   :  { %v413_v32 = vld [vmem:[%s8951_s5 + $0x2cc] sm:$0xf]  ;;  %410 = vst [vmem:[#allocation3 + $0x2d0] sm:$0xf] %v409_v30  ;;  %412 = vst [vmem:[#allocation3 + $0x2d4] sm:$0xf] %v411_v31 }
  0x65   :  { %414 = vst [vmem:[#allocation3 + $0x2d8] sm:$0xf] %v413_v32  ;;  %v419_v34 = vld [vmem:[%s8951_s5 + $0x2f0] sm:$0xf]  ;;  %v421_v35 = vld [vmem:[%s8951_s5 + $0x2e4] sm:$0xf] }
  0x66   :  { %416 = vst [vmem:[#allocation3 + $0x2dc] sm:$0xff] %v415_v33   ;;  %420 = vst [vmem:[#allocation3 + $0x2e4] sm:$0xf] %v419_v34  ;;  %v423_v36 = vld [vmem:[%s8951_s5 + $0x2f4] sm:$0xf]  ;;  %v431_v40 = vld [vmem:[%s8951_s5 + $0x2fc] sm:$0xff]  }
  0x67   :  { %422 = vst [vmem:[#allocation3 + $0x2e8] sm:$0xf] %v421_v35  ;;  %v425_v37 = vld [vmem:[%s8951_s5 + $0x2e8] sm:$0xf]  ;;  %v427_v38 = vld [vmem:[%s8951_s5 + $0x2f8] sm:$0xf] }
  0x68   :  { %424 = vst [vmem:[#allocation3 + $0x2ec] sm:$0xf] %v423_v36  ;;  %426 = vst [vmem:[#allocation3 + $0x2f0] sm:$0xf] %v425_v37  ;;  %v429_v39 = vld [vmem:[%s8951_s5 + $0x2ec] sm:$0xf] }
  0x69   :  { %428 = vst [vmem:[#allocation3 + $0x2f4] sm:$0xf] %v427_v38  ;;  %v435_v41 = vld [vmem:[%s8951_s5 + $0x310] sm:$0xf]  ;;  %430 = vst [vmem:[#allocation3 + $0x2f8] sm:$0xf] %v429_v39 }
  0x6a   :  { %432 = vst [vmem:[#allocation3 + $0x2fc] sm:$0xff] %v431_v40   ;;  %436 = vst [vmem:[#allocation3 + $0x304] sm:$0xf] %v435_v41  ;;  %v437_v42 = vld [vmem:[%s8951_s5 + $0x304] sm:$0xf]  ;;  %v447_v47 = vld [vmem:[%s8951_s5 + $0x31c] sm:$0xff]  }
  0x6b   :  { %v439_v43 = vld [vmem:[%s8951_s5 + $0x314] sm:$0xf]  ;;  %v441_v44 = vld [vmem:[%s8951_s5 + $0x308] sm:$0xf]  ;;  %438 = vst [vmem:[#allocation3 + $0x308] sm:$0xf] %v437_v42 }
  0x6c   :  { %440 = vst [vmem:[#allocation3 + $0x30c] sm:$0xf] %v439_v43  ;;  %442 = vst [vmem:[#allocation3 + $0x310] sm:$0xf] %v441_v44  ;;  %v443_v45 = vld [vmem:[%s8951_s5 + $0x318] sm:$0xf] }
  0x6d   :  { %v445_v46 = vld [vmem:[%s8951_s5 + $0x30c] sm:$0xf]  ;;  %444 = vst [vmem:[#allocation3 + $0x314] sm:$0xf] %v443_v45  ;;  %448 = vst [vmem:[#allocation3 + $0x31c] sm:$0xff] %v447_v47   ;;  %v463_v54 = vld [vmem:[%s8951_s5 + $0x33c] sm:$0xff]  }
  0x6e   :  { %446 = vst [vmem:[#allocation3 + $0x318] sm:$0xf] %v445_v46  ;;  %v451_v48 = vld [vmem:[%s8951_s5 + $0x330] sm:$0xf]  ;;  %v453_v49 = vld [vmem:[%s8951_s5 + $0x324] sm:$0xf] }
  0x6f   :  { %v455_v50 = vld [vmem:[%s8951_s5 + $0x334] sm:$0xf]  ;;  %452 = vst [vmem:[#allocation3 + $0x324] sm:$0xf] %v451_v48  ;;  %454 = vst [vmem:[#allocation3 + $0x328] sm:$0xf] %v453_v49 }
  0x70   :  { %456 = vst [vmem:[#allocation3 + $0x32c] sm:$0xf] %v455_v50  ;;  %v457_v51 = vld [vmem:[%s8951_s5 + $0x328] sm:$0xf]  ;;  %v459_v52 = vld [vmem:[%s8951_s5 + $0x338] sm:$0xf] }
  0x71   :  { %v461_v53 = vld [vmem:[%s8951_s5 + $0x32c] sm:$0xf]  ;;  %458 = vst [vmem:[#allocation3 + $0x330] sm:$0xf] %v457_v51  ;;  %460 = vst [vmem:[#allocation3 + $0x334] sm:$0xf] %v459_v52 }
  0x72   :  { %462 = vst [vmem:[#allocation3 + $0x338] sm:$0xf] %v461_v53  ;;  %v467_v55 = vld [vmem:[%s8951_s5 + $0x350] sm:$0xf]  ;;  %v469_v56 = vld [vmem:[%s8951_s5 + $0x344] sm:$0xf] }
  0x73   :  { %464 = vst [vmem:[#allocation3 + $0x33c] sm:$0xff] %v463_v54   ;;  %468 = vst [vmem:[#allocation3 + $0x344] sm:$0xf] %v467_v55  ;;  %v471_v57 = vld [vmem:[%s8951_s5 + $0x354] sm:$0xf]  ;;  %v479_v61 = vld [vmem:[%s8951_s5 + $0x35c] sm:$0xff]  }
  0x74   :  { %470 = vst [vmem:[#allocation3 + $0x348] sm:$0xf] %v469_v56  ;;  %v473_v58 = vld [vmem:[%s8951_s5 + $0x348] sm:$0xf]  ;;  %v475_v59 = vld [vmem:[%s8951_s5 + $0x358] sm:$0xf] }
  0x75   :  { %472 = vst [vmem:[#allocation3 + $0x34c] sm:$0xf] %v471_v57  ;;  %474 = vst [vmem:[#allocation3 + $0x350] sm:$0xf] %v473_v58  ;;  %v477_v60 = vld [vmem:[%s8951_s5 + $0x34c] sm:$0xf] }
  0x76   :  { %476 = vst [vmem:[#allocation3 + $0x354] sm:$0xf] %v475_v59  ;;  %v483_v62 = vld [vmem:[%s8951_s5 + $0x370] sm:$0xf]  ;;  %478 = vst [vmem:[#allocation3 + $0x358] sm:$0xf] %v477_v60 }
  0x77   :  { %480 = vst [vmem:[#allocation3 + $0x35c] sm:$0xff] %v479_v61   ;;  %484 = vst [vmem:[#allocation3 + $0x364] sm:$0xf] %v483_v62  ;;  %v485_v63 = vld [vmem:[%s8951_s5 + $0x364] sm:$0xf]  ;;  %v495_v4 = vld [vmem:[%s8951_s5 + $0x37c] sm:$0xff]  }
  0x78   :  { %v487_v0 = vld [vmem:[%s8951_s5 + $0x374] sm:$0xf]  ;;  %v489_v1 = vld [vmem:[%s8951_s5 + $0x368] sm:$0xf]  ;;  %486 = vst [vmem:[#allocation3 + $0x368] sm:$0xf] %v485_v63 }
  0x79   :  { %488 = vst [vmem:[#allocation3 + $0x36c] sm:$0xf] %v487_v0  ;;  %490 = vst [vmem:[#allocation3 + $0x370] sm:$0xf] %v489_v1  ;;  %v491_v2 = vld [vmem:[%s8951_s5 + $0x378] sm:$0xf] }
  0x7a   :  { %v493_v3 = vld [vmem:[%s8951_s5 + $0x36c] sm:$0xf]  ;;  %492 = vst [vmem:[#allocation3 + $0x374] sm:$0xf] %v491_v2  ;;  %496 = vst [vmem:[#allocation3 + $0x37c] sm:$0xff] %v495_v4   ;;  %v511_v11 = vld [vmem:[%s8951_s5 + $0x39c] sm:$0xff]  }
  0x7b   :  { %494 = vst [vmem:[#allocation3 + $0x378] sm:$0xf] %v493_v3  ;;  %v499_v5 = vld [vmem:[%s8951_s5 + $0x390] sm:$0xf]  ;;  %v501_v6 = vld [vmem:[%s8951_s5 + $0x384] sm:$0xf] }
  0x7c   :  { %v503_v7 = vld [vmem:[%s8951_s5 + $0x394] sm:$0xf]  ;;  %500 = vst [vmem:[#allocation3 + $0x384] sm:$0xf] %v499_v5  ;;  %502 = vst [vmem:[#allocation3 + $0x388] sm:$0xf] %v501_v6 }
  0x7d   :  { %504 = vst [vmem:[#allocation3 + $0x38c] sm:$0xf] %v503_v7  ;;  %v505_v8 = vld [vmem:[%s8951_s5 + $0x388] sm:$0xf]  ;;  %v507_v9 = vld [vmem:[%s8951_s5 + $0x398] sm:$0xf] }
  0x7e   :  { %v509_v10 = vld [vmem:[%s8951_s5 + $0x38c] sm:$0xf]  ;;  %506 = vst [vmem:[#allocation3 + $0x390] sm:$0xf] %v505_v8  ;;  %508 = vst [vmem:[#allocation3 + $0x394] sm:$0xf] %v507_v9 }
  0x7f   :  { %510 = vst [vmem:[#allocation3 + $0x398] sm:$0xf] %v509_v10  ;;  %v515_v12 = vld [vmem:[%s8951_s5 + $0x3b0] sm:$0xf]  ;;  %v517_v13 = vld [vmem:[%s8951_s5 + $0x3a4] sm:$0xf] }
  0x80   :  { %512 = vst [vmem:[#allocation3 + $0x39c] sm:$0xff] %v511_v11   ;;  %516 = vst [vmem:[#allocation3 + $0x3a4] sm:$0xf] %v515_v12  ;;  %v519_v14 = vld [vmem:[%s8951_s5 + $0x3b4] sm:$0xf]  ;;  %v527_v18 = vld [vmem:[%s8951_s5 + $0x3bc] sm:$0xff]  }
  0x81   :  { %518 = vst [vmem:[#allocation3 + $0x3a8] sm:$0xf] %v517_v13  ;;  %v521_v15 = vld [vmem:[%s8951_s5 + $0x3a8] sm:$0xf]  ;;  %v523_v16 = vld [vmem:[%s8951_s5 + $0x3b8] sm:$0xf] }
  0x82   :  { %520 = vst [vmem:[#allocation3 + $0x3ac] sm:$0xf] %v519_v14  ;;  %522 = vst [vmem:[#allocation3 + $0x3b0] sm:$0xf] %v521_v15  ;;  %v525_v17 = vld [vmem:[%s8951_s5 + $0x3ac] sm:$0xf] }
  0x83   :  { %524 = vst [vmem:[#allocation3 + $0x3b4] sm:$0xf] %v523_v16  ;;  %v531_v19 = vld [vmem:[%s8951_s5 + $0x3d0] sm:$0xf]  ;;  %526 = vst [vmem:[#allocation3 + $0x3b8] sm:$0xf] %v525_v17 }
  0x84   :  { %528 = vst [vmem:[#allocation3 + $0x3bc] sm:$0xff] %v527_v18   ;;  %532 = vst [vmem:[#allocation3 + $0x3c4] sm:$0xf] %v531_v19  ;;  %v533_v20 = vld [vmem:[%s8951_s5 + $0x3c4] sm:$0xf]  ;;  %v543_v25 = vld [vmem:[%s8951_s5 + $0x3dc] sm:$0xff]  }
  0x85   :  { %v535_v21 = vld [vmem:[%s8951_s5 + $0x3d4] sm:$0xf]  ;;  %v537_v22 = vld [vmem:[%s8951_s5 + $0x3c8] sm:$0xf]  ;;  %534 = vst [vmem:[#allocation3 + $0x3c8] sm:$0xf] %v533_v20 }
  0x86   :  { %536 = vst [vmem:[#allocation3 + $0x3cc] sm:$0xf] %v535_v21  ;;  %538 = vst [vmem:[#allocation3 + $0x3d0] sm:$0xf] %v537_v22  ;;  %v539_v23 = vld [vmem:[%s8951_s5 + $0x3d8] sm:$0xf] }
  0x87   :  { %v541_v24 = vld [vmem:[%s8951_s5 + $0x3cc] sm:$0xf]  ;;  %540 = vst [vmem:[#allocation3 + $0x3d4] sm:$0xf] %v539_v23  ;;  %544 = vst [vmem:[#allocation3 + $0x3dc] sm:$0xff] %v543_v25   ;;  %v559_v32 = vld [vmem:[%s8951_s5 + $0x3fc] sm:$0xff]  }
  0x88   :  { %542 = vst [vmem:[#allocation3 + $0x3d8] sm:$0xf] %v541_v24  ;;  %v547_v26 = vld [vmem:[%s8951_s5 + $0x3f0] sm:$0xf]  ;;  %v549_v27 = vld [vmem:[%s8951_s5 + $0x3e4] sm:$0xf] }
  0x89   :  { %v551_v28 = vld [vmem:[%s8951_s5 + $0x3f4] sm:$0xf]  ;;  %548 = vst [vmem:[#allocation3 + $0x3e4] sm:$0xf] %v547_v26  ;;  %550 = vst [vmem:[#allocation3 + $0x3e8] sm:$0xf] %v549_v27 }
  0x8a   :  { %552 = vst [vmem:[#allocation3 + $0x3ec] sm:$0xf] %v551_v28  ;;  %v553_v29 = vld [vmem:[%s8951_s5 + $0x3e8] sm:$0xf]  ;;  %v555_v30 = vld [vmem:[%s8951_s5 + $0x3f8] sm:$0xf] }
  0x8b   :  { %v557_v31 = vld [vmem:[%s8951_s5 + $0x3ec] sm:$0xf]  ;;  %554 = vst [vmem:[#allocation3 + $0x3f0] sm:$0xf] %v553_v29  ;;  %556 = vst [vmem:[#allocation3 + $0x3f4] sm:$0xf] %v555_v30 }
  0x8c   :  { %558 = vst [vmem:[#allocation3 + $0x3f8] sm:$0xf] %v557_v31  ;;  %v563_v33 = vld [vmem:[%s8951_s5 + $0x410] sm:$0xf]  ;;  %v565_v34 = vld [vmem:[%s8951_s5 + $0x404] sm:$0xf] }
  0x8d   :  { %560 = vst [vmem:[#allocation3 + $0x3fc] sm:$0xff] %v559_v32   ;;  %564 = vst [vmem:[#allocation3 + $0x404] sm:$0xf] %v563_v33  ;;  %v567_v35 = vld [vmem:[%s8951_s5 + $0x414] sm:$0xf]  ;;  %v575_v39 = vld [vmem:[%s8951_s5 + $0x41c] sm:$0xff]  }
  0x8e   :  { %566 = vst [vmem:[#allocation3 + $0x408] sm:$0xf] %v565_v34  ;;  %v569_v36 = vld [vmem:[%s8951_s5 + $0x408] sm:$0xf]  ;;  %v571_v37 = vld [vmem:[%s8951_s5 + $0x418] sm:$0xf] }
  0x8f   :  { %568 = vst [vmem:[#allocation3 + $0x40c] sm:$0xf] %v567_v35  ;;  %570 = vst [vmem:[#allocation3 + $0x410] sm:$0xf] %v569_v36  ;;  %v573_v38 = vld [vmem:[%s8951_s5 + $0x40c] sm:$0xf] }
  0x90   :  { %572 = vst [vmem:[#allocation3 + $0x414] sm:$0xf] %v571_v37  ;;  %v579_v40 = vld [vmem:[%s8951_s5 + $0x430] sm:$0xf]  ;;  %574 = vst [vmem:[#allocation3 + $0x418] sm:$0xf] %v573_v38 }
  0x91   :  { %576 = vst [vmem:[#allocation3 + $0x41c] sm:$0xff] %v575_v39   ;;  %580 = vst [vmem:[#allocation3 + $0x424] sm:$0xf] %v579_v40  ;;  %v581_v41 = vld [vmem:[%s8951_s5 + $0x424] sm:$0xf]  ;;  %v591_v46 = vld [vmem:[%s8951_s5 + $0x43c] sm:$0xff]  }
  0x92   :  { %v583_v42 = vld [vmem:[%s8951_s5 + $0x434] sm:$0xf]  ;;  %v585_v43 = vld [vmem:[%s8951_s5 + $0x428] sm:$0xf]  ;;  %582 = vst [vmem:[#allocation3 + $0x428] sm:$0xf] %v581_v41 }
  0x93   :  { %584 = vst [vmem:[#allocation3 + $0x42c] sm:$0xf] %v583_v42  ;;  %586 = vst [vmem:[#allocation3 + $0x430] sm:$0xf] %v585_v43  ;;  %v587_v44 = vld [vmem:[%s8951_s5 + $0x438] sm:$0xf] }
  0x94   :  { %v589_v45 = vld [vmem:[%s8951_s5 + $0x42c] sm:$0xf]  ;;  %588 = vst [vmem:[#allocation3 + $0x434] sm:$0xf] %v587_v44  ;;  %592 = vst [vmem:[#allocation3 + $0x43c] sm:$0xff] %v591_v46   ;;  %v607_v53 = vld [vmem:[%s8951_s5 + $0x45c] sm:$0xff]  }
  0x95   :  { %590 = vst [vmem:[#allocation3 + $0x438] sm:$0xf] %v589_v45  ;;  %v595_v47 = vld [vmem:[%s8951_s5 + $0x450] sm:$0xf]  ;;  %v597_v48 = vld [vmem:[%s8951_s5 + $0x444] sm:$0xf] }
  0x96   :  { %v599_v49 = vld [vmem:[%s8951_s5 + $0x454] sm:$0xf]  ;;  %596 = vst [vmem:[#allocation3 + $0x444] sm:$0xf] %v595_v47  ;;  %598 = vst [vmem:[#allocation3 + $0x448] sm:$0xf] %v597_v48 }
  0x97   :  { %600 = vst [vmem:[#allocation3 + $0x44c] sm:$0xf] %v599_v49  ;;  %v601_v50 = vld [vmem:[%s8951_s5 + $0x448] sm:$0xf]  ;;  %v603_v51 = vld [vmem:[%s8951_s5 + $0x458] sm:$0xf] }
  0x98   :  { %v605_v52 = vld [vmem:[%s8951_s5 + $0x44c] sm:$0xf]  ;;  %602 = vst [vmem:[#allocation3 + $0x450] sm:$0xf] %v601_v50  ;;  %604 = vst [vmem:[#allocation3 + $0x454] sm:$0xf] %v603_v51 }
  0x99   :  { %606 = vst [vmem:[#allocation3 + $0x458] sm:$0xf] %v605_v52  ;;  %v611_v54 = vld [vmem:[%s8951_s5 + $0x470] sm:$0xf]  ;;  %v613_v55 = vld [vmem:[%s8951_s5 + $0x464] sm:$0xf] }
  0x9a   :  { %608 = vst [vmem:[#allocation3 + $0x45c] sm:$0xff] %v607_v53   ;;  %612 = vst [vmem:[#allocation3 + $0x464] sm:$0xf] %v611_v54  ;;  %v615_v56 = vld [vmem:[%s8951_s5 + $0x474] sm:$0xf]  ;;  %v623_v60 = vld [vmem:[%s8951_s5 + $0x47c] sm:$0xff]  }
  0x9b   :  { %614 = vst [vmem:[#allocation3 + $0x468] sm:$0xf] %v613_v55  ;;  %v617_v57 = vld [vmem:[%s8951_s5 + $0x468] sm:$0xf]  ;;  %v619_v58 = vld [vmem:[%s8951_s5 + $0x478] sm:$0xf] }
  0x9c   :  { %616 = vst [vmem:[#allocation3 + $0x46c] sm:$0xf] %v615_v56  ;;  %618 = vst [vmem:[#allocation3 + $0x470] sm:$0xf] %v617_v57  ;;  %v621_v59 = vld [vmem:[%s8951_s5 + $0x46c] sm:$0xf] }
  0x9d   :  { %620 = vst [vmem:[#allocation3 + $0x474] sm:$0xf] %v619_v58  ;;  %v627_v61 = vld [vmem:[%s8951_s5 + $0x490] sm:$0xf]  ;;  %622 = vst [vmem:[#allocation3 + $0x478] sm:$0xf] %v621_v59 }
  0x9e   :  { %624 = vst [vmem:[#allocation3 + $0x47c] sm:$0xff] %v623_v60   ;;  %628 = vst [vmem:[#allocation3 + $0x484] sm:$0xf] %v627_v61  ;;  %v629_v62 = vld [vmem:[%s8951_s5 + $0x484] sm:$0xf]  ;;  %v639_v3 = vld [vmem:[%s8951_s5 + $0x49c] sm:$0xff]  }
  0x9f   :  { %v631_v63 = vld [vmem:[%s8951_s5 + $0x494] sm:$0xf]  ;;  %v633_v0 = vld [vmem:[%s8951_s5 + $0x488] sm:$0xf]  ;;  %630 = vst [vmem:[#allocation3 + $0x488] sm:$0xf] %v629_v62 }
  0xa0   :  { %632 = vst [vmem:[#allocation3 + $0x48c] sm:$0xf] %v631_v63  ;;  %634 = vst [vmem:[#allocation3 + $0x490] sm:$0xf] %v633_v0  ;;  %v635_v1 = vld [vmem:[%s8951_s5 + $0x498] sm:$0xf] }
  0xa1   :  { %v637_v2 = vld [vmem:[%s8951_s5 + $0x48c] sm:$0xf]  ;;  %636 = vst [vmem:[#allocation3 + $0x494] sm:$0xf] %v635_v1  ;;  %640 = vst [vmem:[#allocation3 + $0x49c] sm:$0xff] %v639_v3   ;;  %v655_v10 = vld [vmem:[%s8951_s5 + $0x4bc] sm:$0xff]  }
  0xa2   :  { %638 = vst [vmem:[#allocation3 + $0x498] sm:$0xf] %v637_v2  ;;  %v643_v4 = vld [vmem:[%s8951_s5 + $0x4b0] sm:$0xf]  ;;  %v645_v5 = vld [vmem:[%s8951_s5 + $0x4a4] sm:$0xf] }
  0xa3   :  { %v647_v6 = vld [vmem:[%s8951_s5 + $0x4b4] sm:$0xf]  ;;  %644 = vst [vmem:[#allocation3 + $0x4a4] sm:$0xf] %v643_v4  ;;  %646 = vst [vmem:[#allocation3 + $0x4a8] sm:$0xf] %v645_v5 }
  0xa4   :  { %648 = vst [vmem:[#allocation3 + $0x4ac] sm:$0xf] %v647_v6  ;;  %v649_v7 = vld [vmem:[%s8951_s5 + $0x4a8] sm:$0xf]  ;;  %v651_v8 = vld [vmem:[%s8951_s5 + $0x4b8] sm:$0xf] }
  0xa5   :  { %v653_v9 = vld [vmem:[%s8951_s5 + $0x4ac] sm:$0xf]  ;;  %650 = vst [vmem:[#allocation3 + $0x4b0] sm:$0xf] %v649_v7  ;;  %652 = vst [vmem:[#allocation3 + $0x4b4] sm:$0xf] %v651_v8 }
  0xa6   :  { %654 = vst [vmem:[#allocation3 + $0x4b8] sm:$0xf] %v653_v9  ;;  %v659_v11 = vld [vmem:[%s8951_s5 + $0x4d0] sm:$0xf]  ;;  %v661_v12 = vld [vmem:[%s8951_s5 + $0x4c4] sm:$0xf] }
  0xa7   :  { %656 = vst [vmem:[#allocation3 + $0x4bc] sm:$0xff] %v655_v10   ;;  %660 = vst [vmem:[#allocation3 + $0x4c4] sm:$0xf] %v659_v11  ;;  %v663_v13 = vld [vmem:[%s8951_s5 + $0x4d4] sm:$0xf]  ;;  %v671_v17 = vld [vmem:[%s8951_s5 + $0x4dc] sm:$0xff]  }
  0xa8   :  { %662 = vst [vmem:[#allocation3 + $0x4c8] sm:$0xf] %v661_v12  ;;  %v665_v14 = vld [vmem:[%s8951_s5 + $0x4c8] sm:$0xf]  ;;  %v667_v15 = vld [vmem:[%s8951_s5 + $0x4d8] sm:$0xf] }
  0xa9   :  { %664 = vst [vmem:[#allocation3 + $0x4cc] sm:$0xf] %v663_v13  ;;  %666 = vst [vmem:[#allocation3 + $0x4d0] sm:$0xf] %v665_v14  ;;  %v669_v16 = vld [vmem:[%s8951_s5 + $0x4cc] sm:$0xf] }
  0xaa   :  { %668 = vst [vmem:[#allocation3 + $0x4d4] sm:$0xf] %v667_v15  ;;  %v675_v18 = vld [vmem:[%s8951_s5 + $0x4f0] sm:$0xf]  ;;  %670 = vst [vmem:[#allocation3 + $0x4d8] sm:$0xf] %v669_v16 }
  0xab   :  { %672 = vst [vmem:[#allocation3 + $0x4dc] sm:$0xff] %v671_v17   ;;  %676 = vst [vmem:[#allocation3 + $0x4e4] sm:$0xf] %v675_v18  ;;  %v677_v19 = vld [vmem:[%s8951_s5 + $0x4e4] sm:$0xf] }
  0xac   :  { %v679_v20 = vld [vmem:[%s8951_s5 + $0x4f4] sm:$0xf]  ;;  %v681_v21 = vld [vmem:[%s8951_s5 + $0x4e8] sm:$0xf]  ;;  %678 = vst [vmem:[#allocation3 + $0x4e8] sm:$0xf] %v677_v19 }
  0xad   :  { %680 = vst [vmem:[#allocation3 + $0x4ec] sm:$0xf] %v679_v20  ;;  %682 = vst [vmem:[#allocation3 + $0x4f0] sm:$0xf] %v681_v21  ;;  %v683_v22 = vld [vmem:[%s8951_s5 + $0x4f8] sm:$0xf] }
  0xae   :  { %v685_v23 = vld [vmem:[%s8951_s5 + $0x4ec] sm:$0xf]  ;;  %v687_v24 = vld [vmem:[%s8951_s5 + $0x4fc] sm:$0xf]  ;;  %684 = vst [vmem:[#allocation3 + $0x4f4] sm:$0xf] %v683_v22 }
  0xaf   :  { %686 = vst [vmem:[#allocation3 + $0x4f8] sm:$0xf] %v685_v23  ;;  %688 = vst [vmem:[#allocation3 + $0x4fc] sm:$0xf] %v687_v24 }
  0xb0   :  { %1359 = vsyncadd [#allocation4], 20480  ;;  %v6965_v25 = vld [vmem:[%s8947_s1 + $0x40] sm:$0xff]   ;;  %v7220_v27 = vmov 0   ;;  %v6969_v30 = vld [vmem:[%s8947_s1 + $0x48] sm:$0xff]   ;;  %v1458_v19 = vlaneseq  ;;  %vm1360_vm0 = vcmask 519168  }
  0xb1   :  { %v6966_v26 = vld [vmem:[%s8947_s1 + $0xc0] sm:$0xff]   ;;  %6963 = vset.pattern.permute.xlu0 %v7220_v27  ;;  %6964 = vset.pattern.permute.xlu1 %v7220_v27  ;;  %v6970_v31 = vld [vmem:[%s8947_s1 + $0xc8] sm:$0xff]   ;;  %v6973_v34 = vld [vmem:[%s8947_s1 + $0x50] sm:$0xff]   ;;  %1363 = vst.msk [vmem:[#allocation2 + $0x8] sm:$0xf] %vm1360_vm0, %v7220_v27  ;;  %vm1986_vm1 = vcmask 1046528  }
  0xb2   :  { %6341 = vmatprep.subr.bf16.mxu0 %v6965_v25  ;;  %v6967_v28 = vld [vmem:[%s8947_s1] sm:$0xff]   ;;  %6381 = vmatprep.subr.bf16.mxu1 %v6966_v26  ;;  %v6971_v32 = vld [vmem:[%s8947_s1 + $0x8] sm:$0xff]   ;;  %v6974_v35 = vld [vmem:[%s8947_s1 + $0xd0] sm:$0xff]   ;;  %v8276_v20 = vshrl.u32 %v1458_v19, 7  ;;  %1361 = vst.msk [vmem:[#allocation2] sm:$0xf] %vm1360_vm0, %v7220_v27 }
  0xb3   :  { %v6968_v29 = vld [vmem:[%s8947_s1 + $0x80] sm:$0xff]   ;;  %6342 = vmatpush3.bf16.msra.mxu0 %v6967_v28  ;;  %v6972_v33 = vld [vmem:[%s8947_s1 + $0x88] sm:$0xff]   ;;  %v6975_v36 = vld [vmem:[%s8947_s1 + $0x10] sm:$0xff]   ;;  %1362 = vst.msk [vmem:[#allocation2 + $0x4] sm:$0xf] %vm1360_vm0, %v7220_v27  ;;  %vm2018_vm2 = vcmask 523264  }
  0xb4   :  { %6382 = vmatpush3.bf16.msra.mxu1 %v6968_v29  ;;  %6343 = vmatprep.subr.bf16.mxu0 %v6969_v30  ;;  %v6976_v37 = vld [vmem:[%s8947_s1 + $0x90] sm:$0xff]   ;;  %v6977_v38 = vld [vmem:[%s8947_s1 + $0x58] sm:$0xff]   ;;  %v6981_v42 = vld [vmem:[%s8947_s1 + $0x60] sm:$0xff]   ;;  %v3157_v21 = vsub.s32 1, %v8276_v20  ;;  %1364 = vst.msk [vmem:[#allocation2 + $0xc] sm:$0xf] %vm1360_vm0, %v7220_v27 }
  0xb5   :  { %6383 = vmatprep.subr.bf16.mxu1 %v6970_v31  ;;  %v6978_v39 = vld [vmem:[%s8947_s1 + $0xd8] sm:$0xff]   ;;  %v6982_v43 = vld [vmem:[%s8947_s1 + $0xe0] sm:$0xff]   ;;  %v6985_v46 = vld [vmem:[%s8947_s1 + $0x68] sm:$0xff]   ;;  %1365 = vst.msk [vmem:[#allocation2 + $0x10] sm:$0xf] %vm1360_vm0, %v7220_v27  ;;  %v1460_v30 = vsub.s32 0, %v8276_v20 }
  0xb6   :  { %v6979_v40 = vld [vmem:[%s8947_s1 + $0x18] sm:$0xff]   ;;  %v6983_v44 = vld [vmem:[%s8947_s1 + $0x20] sm:$0xff]   ;;  %v6986_v47 = vld [vmem:[%s8947_s1 + $0xe8] sm:$0xff]   ;;  %1366 = vst.msk [vmem:[#allocation2 + $0x14] sm:$0xf] %vm1360_vm0, %v7220_v27  ;;  %vm2215_vm3 = vcmask 1045504  }
  0xb7   :  { %6344 = vmatpush3.bf16.msra.mxu0 %v6971_v32  ;;  %v6980_v41 = vld [vmem:[%s8947_s1 + $0x98] sm:$0xff]   ;;  %v6984_v45 = vld [vmem:[%s8947_s1 + $0xa0] sm:$0xff]   ;;  %v6987_v48 = vld [vmem:[%s8947_s1 + $0x28] sm:$0xff]   ;;  %1367 = vst.msk [vmem:[#allocation2 + $0x18] sm:$0xf] %vm1360_vm0, %v7220_v27  ;;  %vm2366_vm4 = vcmask 1044480  }
  0xb8   :  { %6384 = vmatpush3.bf16.msra.mxu1 %v6972_v33  ;;  %6345 = vmatprep.subr.bf16.mxu0 %v6973_v34  ;;  %v6988_v49 = vld [vmem:[%s8947_s1 + $0xa8] sm:$0xff]   ;;  %v6989_v50 = vld [vmem:[%s8947_s1 + $0x70] sm:$0xff]   ;;  %v6993_v54 = vld [vmem:[%s8947_s1 + $0x78] sm:$0xff]   ;;  %1368 = vst.msk [vmem:[#allocation2 + $0x1c] sm:$0xf] %vm1360_vm0, %v7220_v27 }
  0xb9   :  { %6385 = vmatprep.subr.bf16.mxu1 %v6974_v35  ;;  %v6990_v51 = vld [vmem:[%s8947_s1 + $0xf0] sm:$0xff]   ;;  %v6994_v55 = vld [vmem:[%s8947_s1 + $0xf8] sm:$0xff]   ;;  %v1372_v3 = vld [vmem:[%s8950_s4] sm:$0xff]  ;;  %1369 = vst.msk [vmem:[#allocation2 + $0x20] sm:$0xf] %vm1360_vm0, %v7220_v27 }
  0xba   :  { %v6991_v52 = vld [vmem:[%s8947_s1 + $0x30] sm:$0xff]   ;;  %v6995_v56 = vld [vmem:[%s8947_s1 + $0x38] sm:$0xff]   ;;  %1865 = vperm.xlu0 %6963, %v1372_v3   ;;  %v1373_v6 = vld [vmem:[%s8950_s4 + $0x8] sm:$0xff]  ;;  %1370 = vst.msk [vmem:[#allocation2 + $0x24] sm:$0xf] %vm1360_vm0, %v7220_v27 }
  0xbb   :  { %6346 = vmatpush3.bf16.msra.mxu0 %v6975_v36  ;;  %v6992_v53 = vld [vmem:[%s8947_s1 + $0xb0] sm:$0xff]   ;;  %v6996_v57 = vld [vmem:[%s8947_s1 + $0xb8] sm:$0xff]   ;;  %v1392_v8 = vld [vmem:[%s8946_s0 + $0x60] sm:$0xff]  ;;  %1371 = vst.msk [vmem:[#allocation2 + $0x28] sm:$0xf] %vm1360_vm0, %v7220_v27 }
  0xbc   :  { %6386 = vmatpush3.bf16.msra.mxu1 %v6976_v37  ;;  %6347 = vmatprep.subr.bf16.mxu0 %v6977_v38  ;;  %v6997_v58 = vld [vmem:[%s8946_s0] ss:$16 sps:$4 sm:$0xff]   ;;  %v6999_v59 = vld [vmem:[%s8946_s0 + $0x4] ss:$16 sps:$4 sm:$0xff]   ;;  %v7000_v60 = vld [vmem:[%s8946_s0 + $0x8] ss:$16 sps:$4 sm:$0xff]   ;;  %v5999_v14 = vcombine.high %v1392_v8, %v1392_v8  ;;  %v5998_v17 = vcombine.low %v1392_v8, %v1392_v8 }
  0xbd   :  { %6387 = vmatprep.subr.bf16.mxu1 %v6978_v39  ;;  %v7002_v61 = vld [vmem:[%s8946_s0 + $0xc] ss:$16 sps:$4 sm:$0xff]   ;;  %1760 = vmatprep.mubr.bf16.mxu0 %v6999_v59  ;;  %v7003_v62 = vld [vmem:[%s8946_s0 + $0x24] ss:$16 sps:$4 sm:$0xff]   ;;  %v7007_v0 = vld [vmem:[%s8946_s0 + $0x20] ss:$16 sps:$4 sm:$0xff]  }
  0xbe   :  { %1824 = vmatprep.mubr.bf16.mxu1 %v7002_v61  ;;  %v7005_v63 = vld [vmem:[%s8946_s0 + $0x2c] ss:$16 sps:$4 sm:$0xff]   ;;  %v7008_v1 = vld [vmem:[%s8946_s0 + $0x28] ss:$16 sps:$4 sm:$0xff]   ;;  %v7009_v2 = vld [vmem:[%s8946_s0 + $0x44] ss:$16 sps:$4 sm:$0xff]   ;;  %1870 = vperm.xlu0 %6963, %v1373_v6  }
  0xbf   :  { %6348 = vmatpush3.bf16.msra.mxu0 %v6979_v40  ;;  %v1374_v4 = vld [vmem:[%s8950_s4 + $0x10] sm:$0xff]  ;;  %v7011_v5 = vld [vmem:[%s8946_s0 + $0x4c] ss:$16 sps:$4 sm:$0xff]   ;;  %v1376_v10 = vld [vmem:[%s8950_s4 + $0x20] sm:$0xff] }
  0xc0   :  { %6388 = vmatpush3.bf16.msra.mxu1 %v6980_v41  ;;  %6349 = vmatprep.subr.bf16.mxu0 %v6981_v42  ;;  %v1375_v7 = vld [vmem:[%s8950_s4 + $0x18] sm:$0xff]  ;;  %v1393_v9 = vld [vmem:[%s8946_s0 + $0x68] sm:$0xff]  ;;  %v7013_v11 = vld [vmem:[%s8946_s0 + $0x40] ss:$16 sps:$4 sm:$0xff]  }
  0xc1   :  { %6389 = vmatprep.subr.bf16.mxu1 %v6982_v43  ;;  %1875 = vperm.xlu1 %6964, %v1374_v4   ;;  %v1377_v12 = vld [vmem:[%s8950_s4 + $0x28] sm:$0xff]  ;;  %v1378_v15 = vld [vmem:[%s8950_s4 + $0x30] sm:$0xff]  ;;  %v6001_v16 = vcombine.high %v1393_v9, %v1393_v9  ;;  %v6000_v18 = vcombine.low %v1393_v9, %v1393_v9  ;;  %v1379_v22 = vld [vmem:[%s8949_s3] sm:$0x3] }
  0xc2   :  { %v7014_v13 = vld [vmem:[%s8946_s0 + $0x48] ss:$16 sps:$4 sm:$0xff]   ;;  %1885 = vperm.xlu0 %6963, %v1376_v10   ;;  %v8284_v23 = vrot.slane %v1379_v22, %v3157_v21  ;;  %v7019_v24 = vld [vmem:[%s8948_s2 + $0x20] sm:$0xff]   ;;  %v7021_v26 = vld [vmem:[%s8948_s2 + $0x30] sm:$0xff]   ;;  %v8329_v32 = vrot.slane %v1379_v22, %v1460_v30 }
  0xc3   :  { %6350 = vmatpush3.bf16.msra.mxu0 %v6983_v44  ;;  %v7020_v25 = vld [vmem:[%s8948_s2 + $0x28] sm:$0xff]   ;;  %v7022_v28 = vld [vmem:[%s8948_s2 + $0x38] sm:$0xff]   ;;  %v8323_v29 = vld [vmem:[%s8948_s2] sm:$0xff]  }
  0xc4   :  { %6390 = vmatpush3.bf16.msra.mxu1 %v6984_v45  ;;  %6351 = vmatprep.subr.bf16.mxu0 %v6985_v46 }
  0xc5   :  { %6391 = vmatprep.subr.bf16.mxu1 %v6986_v47  ;;  %1880 = vperm.xlu1 %6964, %v1375_v7  }
  0xc6   :  { %1895 = vperm.xlu0 %6963, %v1378_v15  }
  0xc7   :  { %6352 = vmatpush3.bf16.msra.mxu0 %v6987_v48 }
  0xc8   :  { %6392 = vmatpush3.bf16.msra.mxu1 %v6988_v49  ;;  %6353 = vmatprep.subr.bf16.mxu0 %v6989_v50 }
  0xc9   :  { %6393 = vmatprep.subr.bf16.mxu1 %v6990_v51  ;;  %1890 = vperm.xlu1 %6964, %v1377_v12   ;;  %v8347_v12 = vld [vmem:[#allocation2 + $0x4] sm:$0xf] }
  0xcb   :  { %6354 = vmatpush3.bf16.msra.mxu0 %v6991_v52 }
  0xcc   :  { %6394 = vmatpush3.bf16.msra.mxu1 %v6992_v53  ;;  %6355 = vmatprep.subr.bf16.mxu0 %v6993_v54 }
  0xcd   :  { %6395 = vmatprep.subr.bf16.mxu1 %v6994_v55 }
  0xcf   :  { %6356 = vmatpush3.bf16.msra.mxu0 %v6995_v56 }
  0xd0   :  { %6396 = vmatpush3.bf16.msra.mxu1 %v6996_v57  ;;  %6609 = vmatprep.subr.bf16.mxu0 %v7019_v24 }
  0xd2   :  { %1761 = vmatmul.mubr.bf16.vlgmr.msra.gmra.mrb[0].mxu0 %v6997_v58 }
  0xd3   :  { %1825 = vmatmul.mubr.bf16.vlgmr.msra.gmra.mrb[0].mxu1 %v7000_v60  ;;  %1768 = vmatprep.mubr.bf16.mxu0 %v7003_v62 }
  0xd4   :  { %1832 = vmatprep.mubr.bf16.mxu1 %v7005_v63  ;;  %6610 = vmatpush3.bf16.msra.mxu0 %v7019_v24 }
  0xd5   :  { %6611 = vmatprep.subr.bf16.mxu0 %v7020_v25 }
  0xd8   :  { %6612 = vmatpush3.bf16.msra.mxu0 %v7020_v25 }
  0xd9   :  { %6613 = vmatprep.subr.bf16.mxu0 %v7021_v26 }
  0xda   :  { %1769 = vmatmul.mubr.bf16.gmra.mrb[4].mxu0 %v7007_v0 }
  0xdb   :  { %1833 = vmatmul.mubr.bf16.gmra.mrb[4].mxu1 %v7008_v1  ;;  %1776 = vmatprep.mubr.bf16.mxu0 %v7009_v2 }
  0xdc   :  { %1840 = vmatprep.mubr.bf16.mxu1 %v7011_v5  ;;  %6614 = vmatpush3.bf16.msra.mxu0 %v7021_v26 }
  0xdd   :  { %6615 = vmatprep.subr.bf16.mxu0 %v7022_v28 }
  0xe0   :  { %6616 = vmatpush3.bf16.msra.mxu0 %v7022_v28 }
  0xe1   :  { %6625 = vmatprep.subr.bf16.mxu0 %v8323_v29 }
  0xe2   :  { %1777 = vmatmul.mubr.bf16.gmra.mrb[8].mxu0 %v7013_v11 }
  0xe3   :  { %1841 = vmatmul.mubr.bf16.gmra.mrb[8].mxu1 %v7014_v13  ;;  %1784 = vmatprep.mubr.bf16.mxu0 %v5999_v14  ;;  %v1956_v13 = vld [vmem:[#allocation2] sm:$0xe] }
  0xe4   :  { %1848 = vmatprep.mubr.bf16.mxu1 %v6001_v16  ;;  %v6041_v28 = vcombine.low %v1956_v13, %v8347_v12 }
  0xea   :  { %1785 = vmatmul.mubr.bf16.gmra.mrb[12].mxu0 %v5998_v17 }
  0xeb   :  { %1849 = vmatmul.mubr.bf16.gmra.mrb[12].mxu1 %v6000_v18 }
 0x139   :  { %v8331_v33 = vpop.permute.xlu0 %1865 }
 0x13d   :  { %v8337_v51 = vpop.permute.xlu0 %1870 }
 0x140   :  { %v8335_v48 = vpop.permute.xlu1 %1875 }
 0x144   :  { %v8345_v10 = vpop.permute.xlu1 %1880 }
 0x1a5   :  { %v6357_v31 = vpop.f32.mrb[0].mxu0 }
 0x1a6   :  { %v6397_v34 = vpop.f32.mrb[0].mxu1  ;;  %v6358_v35 = vpop.f32.mrb[1].mxu0 }
 0x1a7   :  { %v6359_v36 = vadd.f32 %v6358_v35, %v6357_v31  ;;  %v6398_v37 = vpop.f32.mrb[1].mxu1  ;;  %v6360_v38 = vpop.f32.mrb[2].mxu0 }
 0x1a8   :  { %v6399_v39 = vadd.f32 %v6398_v37, %v6397_v34  ;;  %v6400_v40 = vpop.f32.mrb[2].mxu1  ;;  %v6361_v41 = vpop.f32.mrb[3].mxu0 }
 0x1a9   :  { %v1763_v42 = vadd.f32 %v6359_v36, %v8329_v32  ;;  %v6362_v43 = vadd.f32 %v6361_v41, %v6360_v38  ;;  %v6401_v44 = vpop.f32.mrb[3].mxu1 }
 0x1aa   :  { %v6402_v45 = vadd.f32 %v6401_v44, %v6400_v40  ;;  %v1987_v44 = vrot.slane %v6041_v28, 1  ;;  %v7033_v28 = vld [vmem:[%s8948_s2 + $0x48] sm:$0xff]  }
 0x1ab   :  { %v1827_v46 = vadd.f32 %v6399_v39, %v1763_v42  ;;  %v1766_v47 = vadd.f32 %v6362_v43, %v8329_v32  ;;  %v8355_v42 = vpop.permute.xlu0 %1885 }
 0x1ad   :  { %v1856_v49 = vmax.f32 %v1827_v46, 0.0  ;;  %v1830_v50 = vadd.f32 %v6402_v45, %v1766_v47  ;;  %v6363_v52 = vpop.f32.mrb[4].mxu0  ;;  %v8360_v45 = vpop.permute.xlu1 %1890 }
 0x1ae   :  { %v6403_v53 = vpop.f32.mrb[4].mxu1  ;;  %v6364_v54 = vpop.f32.mrb[5].mxu0 }
 0x1af   :  { %v1857_v55 = vmax.f32 %v1830_v50, 0.0  ;;  %v1898_v56 = vmul.f32 %v8331_v33, %v1856_v49  ;;  %v6365_v57 = vadd.f32 %v6364_v54, %v6363_v52  ;;  %v6404_v58 = vpop.f32.mrb[5].mxu1  ;;  %v6366_v59 = vpop.f32.mrb[6].mxu0 }
 0x1b0   :  { %v6405_v60 = vadd.f32 %v6404_v58, %v6403_v53  ;;  %v6406_v61 = vpop.f32.mrb[6].mxu1  ;;  %v6367_v62 = vpop.f32.mrb[7].mxu0 }
 0x1b1   :  { %v6320_v63 = vpack.c.bf16 %v1898_v56, %v1898_v56  ;;  %v1899_v0 = vmul.f32 %v8337_v51, %v1857_v55  ;;  %v1771_v1 = vadd.f32 %v6365_v57, %v8329_v32  ;;  %v6368_v2 = vadd.f32 %v6367_v62, %v6366_v59  ;;  %v6407_v3 = vpop.f32.mrb[7].mxu1 }
 0x1b2   :  { %v6408_v4 = vadd.f32 %v6407_v3, %v6406_v61 }
 0x1b3   :  { %1934 = vst.msk [vmem:[#allocation2 + $0x8] sm:$0xf] %vm1360_vm0, %v6320_v63  ;;  %v6321_v5 = vpack.c.bf16 %v1899_v0, %v1899_v0  ;;  %v1835_v6 = vadd.f32 %v6405_v60, %v1771_v1  ;;  %v1774_v7 = vadd.f32 %v6368_v2, %v8329_v32 }
 0x1b5   :  { %1935 = vst.msk [vmem:[#allocation2 + $0xc] sm:$0xf] %vm1360_vm0, %v6321_v5  ;;  %v1858_v8 = vmax.f32 %v1835_v6, 0.0  ;;  %v1838_v9 = vadd.f32 %v6408_v4, %v1774_v7  ;;  %v6369_v11 = vpop.f32.mrb[8].mxu0  ;;  %v8372_v7 = vpop.permute.xlu0 %1895 }
 0x1b6   :  { %v6409_v14 = vpop.f32.mrb[8].mxu1  ;;  %v6370_v15 = vpop.f32.mrb[9].mxu0 }
 0x1b7   :  { %v1900_v16 = vmul.f32 %v8335_v48, %v1858_v8  ;;  %v1859_v17 = vmax.f32 %v1838_v9, 0.0  ;;  %v6371_v18 = vadd.f32 %v6370_v15, %v6369_v11  ;;  %v6410_v19 = vpop.f32.mrb[9].mxu1  ;;  %v6372_v22 = vpop.f32.mrb[10].mxu0 }
 0x1b8   :  { %v6411_v24 = vadd.f32 %v6410_v19, %v6409_v14  ;;  %v6412_v25 = vpop.f32.mrb[10].mxu1  ;;  %v6373_v26 = vpop.f32.mrb[11].mxu0  ;;  %v7029_v14 = vld [vmem:[%s8948_s2 + $0x10] sm:$0xff]  }
 0x1b9   :  { %v6322_v31 = vpack.c.bf16 %v1900_v16, %v1900_v16  ;;  %v1901_v34 = vmul.f32 %v8345_v10, %v1859_v17  ;;  %v1779_v35 = vadd.f32 %v6371_v18, %v8329_v32  ;;  %v6374_v36 = vadd.f32 %v6373_v26, %v6372_v22  ;;  %v6413_v37 = vpop.f32.mrb[11].mxu1  ;;  %v1941_v18 = vld [vmem:[#allocation2] sm:$0xf]  ;;  %v7030_v22 = vld [vmem:[%s8948_s2 + $0x18] sm:$0xff]  }
 0x1ba   :  { %v6414_v38 = vadd.f32 %v6413_v37, %v6412_v25  ;;  %v7032_v25 = vld [vmem:[%s8948_s2 + $0x40] sm:$0xff]  }
 0x1bb   :  { %1936 = vst.msk [vmem:[#allocation2 + $0x10] sm:$0xf] %vm1360_vm0, %v6322_v31  ;;  %v6323_v39 = vpack.c.bf16 %v1901_v34, %v1901_v34  ;;  %v1843_v40 = vadd.f32 %v6411_v24, %v1779_v35  ;;  %v1782_v41 = vadd.f32 %v6374_v36, %v8329_v32  ;;  %v2199_v26 = vld [vmem:[#allocation2] sm:$0xc]  ;;  %v7034_v34 = vld [vmem:[%s8948_s2 + $0x50] sm:$0xff]  }
 0x1bc   :  { %v8357_v43 = vld [vmem:[#allocation2 + $0x8] sm:$0xff]   ;;  %v6063_v31 = vcombine.low %v2199_v26, %v8347_v12 }
 0x1bd   :  { %1937 = vst.msk [vmem:[#allocation2 + $0x14] sm:$0xf] %vm1360_vm0, %v6323_v39  ;;  %v1860_v46 = vmax.f32 %v1843_v40, 0.0  ;;  %v1846_v47 = vadd.f32 %v6414_v38, %v1782_v41  ;;  %v6375_v49 = vpop.f32.mrb[12].mxu0  ;;  %v1988_v53 = vrot.slane %v8357_v43, 1  ;;  %v2217_v36 = vrot.slane %v8357_v43, 2 }
 0x1be   :  { %v6376_v50 = vpop.f32.mrb[13].mxu0  ;;  %v6415_v52 = vpop.f32.mrb[12].mxu1  ;;  %v2216_v35 = vrot.slane %v6063_v31, 2  ;;  %v7038_v41 = vld [vmem:[%s8948_s2 + $0x60] sm:$0xff]  }
 0x1bf   :  { %v1902_v54 = vmul.f32 %v8355_v42, %v1860_v46  ;;  %v1861_v55 = vmax.f32 %v1846_v47, 0.0  ;;  %v6377_v56 = vadd.f32 %v6376_v50, %v6375_v49  ;;  %v6416_v57 = vpop.f32.mrb[13].mxu1  ;;  %v6378_v58 = vpop.f32.mrb[14].mxu0  ;;  %v1989_v60 = vsel %vm1986_vm1, %v1987_v44, %v1988_v53  ;;  %v7040_v47 = vld [vmem:[%s8948_s2 + $0x68] sm:$0xff]   ;;  %v2330_v50 = vld [vmem:[#allocation2 + $0x4] sm:$0x8] }
 0x1c0   :  { %v6417_v59 = vadd.f32 %v6416_v57, %v6415_v52  ;;  %v6379_v61 = vpop.f32.mrb[15].mxu0  ;;  %v6418_v62 = vpop.f32.mrb[14].mxu1  ;;  %6617 = vmatprep.mubr.msk.bf16.mxu0 %vm2018_vm2, %v1989_v60  ;;  %v2218_v39 = vsel %vm2215_vm3, %v2216_v35, %v2217_v36  ;;  %v2331_v52 = vld [vmem:[#allocation2 + $0x8] sm:$0xf] }
 0x1c1   :  { %v6324_v63 = vpack.c.bf16 %v1902_v54, %v1902_v54  ;;  %v1903_v0 = vmul.f32 %v8360_v45, %v1861_v55  ;;  %v1787_v1 = vadd.f32 %v6377_v56, %v8329_v32  ;;  %v6419_v2 = vpop.f32.mrb[15].mxu1  ;;  %v7027_v32 = vld [vmem:[%s8948_s2 + $0x8] sm:$0xff]   ;;  %v7041_v56 = vld [vmem:[%s8948_s2 + $0x70] sm:$0xff]   ;;  %v6073_v57 = vcombine.low %v2330_v50, %v2331_v52 }
 0x1c2   :  { %v2333_v46 = vld [vmem:[#allocation2 + $0x10] sm:$0xf] }
 0x1c3   :  { %1938 = vst.msk [vmem:[#allocation2 + $0x18] sm:$0xf] %vm1360_vm0, %v6324_v63  ;;  %v6325_v3 = vpack.c.bf16 %v1903_v0, %v1903_v0  ;;  %v1851_v4 = vadd.f32 %v6417_v59, %v1787_v1  ;;  %v2367_v62 = vrot.slane %v6073_v57, 3  ;;  %v7045_v63 = vld [vmem:[%s8948_s2 + $0x78] sm:$0xff]  }
 0x1c4   :  { %v8369_v5 = vld [vmem:[#allocation2 + $0x10] sm:$0xff]   ;;  %v7068_v57 = vld [vmem:[%s8948_s2 + $0xd8] sm:$0xff]  }
 0x1c5   :  { %1939 = vst.msk [vmem:[#allocation2 + $0x1c] sm:$0xf] %vm1360_vm0, %v6325_v3  ;;  %v1862_v6 = vmax.f32 %v1851_v4, 0.0  ;;  %v1990_v8 = vrot.slane %v8369_v5, 1  ;;  %v2334_v61 = vld [vmem:[#allocation2 + $0x14] sm:$0xf] }
 0x1c6   :  { %v7046_v4 = vld [vmem:[%s8948_s2 + $0x80] sm:$0xff]  }
 0x1c7   :  { %v1904_v9 = vmul.f32 %v8372_v7, %v1862_v6  ;;  %v1991_v11 = vsel %vm1986_vm1, %v1988_v53, %v1990_v8  ;;  %v2332_v53 = vld [vmem:[#allocation2 + $0xc] sm:$0xf] }
 0x1c8   :  { %6618 = vmatmul.mubr.msk.bf16.vlgmr.msra.gmra.mrb[16].mxu0 %vm2018_vm2, %v1991_v11  ;;  %v6074_v55 = vcombine.low %v2332_v53, %v2333_v46  ;;  %v7050_v11 = vld [vmem:[%s8948_s2 + $0x90] sm:$0xff]  }
 0x1c9   :  { %v6326_v13 = vpack.c.bf16 %v1904_v9, %v1904_v9  ;;  %6626 = vmatpush3.bf16.msra.mxu0 %v8323_v29  ;;  %v6053_v29 = vcombine.low %v1941_v18, %v8347_v12  ;;  %v7037_v12 = vld [vmem:[%s8948_s2 + $0x58] sm:$0xff]  }
 0x1ca   :  { %6627 = vmatprep.subr.bf16.mxu0 %v7027_v32  ;;  %v1947_v15 = vld [vmem:[#allocation2 + $0x18] sm:$0xf]  ;;  %v2368_v58 = vrot.slane %v6074_v55, 3  ;;  %v2760_v55 = vld [vmem:[#allocation2 + $0x28] sm:$0x3] }
 0x1cb   :  { %1940 = vst.msk [vmem:[#allocation2 + $0x20] sm:$0xf] %vm1360_vm0, %v6326_v13  ;;  %v6054_v38 = vcombine.low %v1947_v15, %v1947_v15  ;;  %v2335_v59 = vld [vmem:[#allocation2 + $0x18] sm:$0xf] }
 0x1cc   :  { %v1957_v16 = vld [vmem:[#allocation2 + $0x1c] sm:$0x1]  ;;  %v6075_v0 = vcombine.low %v2334_v61, %v2335_v59  ;;  %v2369_v2 = vsel %vm2366_vm4, %v2367_v62, %v2368_v58  ;;  %v7069_v62 = vld [vmem:[%s8948_s2 + $0xe0] sm:$0xff]  }
 0x1cd   :  { %v6044_v17 = vcombine.low %v1947_v15, %v1957_v16  ;;  %6628 = vmatpush3.bf16.msra.mxu0 %v7027_v32  ;;  %v2200_v37 = vld [vmem:[#allocation2 + $0x1c] sm:$0x3]  ;;  %v6086_v16 = vcombine.low %v2333_v46, %v2334_v61 }
 0x1ce   :  { %6629 = vmatprep.subr.bf16.mxu0 %v7029_v14  ;;  %v6064_v40 = vcombine.low %v1947_v15, %v2200_v37  ;;  %v2336_v1 = vld [vmem:[#allocation2 + $0x1c] sm:$0xf]  ;;  %v7053_v15 = vld [vmem:[%s8948_s2 + $0xa0] sm:$0xff]  }
 0x1cf   :  { %v1992_v19 = vrot.slane %v6044_v17, 1  ;;  %v7052_v13 = vld [vmem:[%s8948_s2 + $0x98] sm:$0xff]   ;;  %v7055_v17 = vld [vmem:[%s8948_s2 + $0xa8] sm:$0xff]   ;;  %v6087_v18 = vcombine.low %v2335_v59, %v2336_v1 }
 0x1d0   :  { %v2221_v44 = vrot.slane %v6064_v40, 2  ;;  %v7062_v31 = vld [vmem:[#allocation2 + $0x18] sm:$0xff]  }
 0x1d1   :  { %v1993_v24 = vsel %vm1986_vm1, %v1990_v8, %v1992_v19  ;;  %6630 = vmatpush3.bf16.msra.mxu0 %v7029_v14  ;;  %v7049_v8 = vld [vmem:[%s8948_s2 + $0x88] sm:$0xff]   ;;  %v6085_v14 = vcombine.low %v2331_v52, %v2332_v53  ;;  %v2642_v37 = vrot.slane %v7062_v31, 1 }
 0x1d2   :  { %6621 = vmatprep.mubr.msk.bf16.mxu0 %vm2018_vm2, %v1993_v24  ;;  %6631 = vmatprep.subr.bf16.mxu0 %v7030_v22  ;;  %v2337_v60 = vld [vmem:[#allocation2 + $0x20] sm:$0x7]  ;;  %v7084_v31 = vld [vmem:[#allocation2 + $0x28] ss:$0 sps:$4 sm:$0xff]  }
 0x1d3   :  { %6622 = vmatmul.mubr.msk.bf16.gmra.mrb[20].mxu0 %vm2018_vm2, %v1992_v19  ;;  %v6076_v3 = vcombine.low %v2336_v1, %v2337_v60  ;;  %v7059_v19 = vld [vmem:[#allocation2 + $0x10] sm:$0xff]   ;;  %v7063_v35 = vld [vmem:[#allocation2 + $0x20] sm:$0x1f]   ;;  %v7072_v1 = vld [vmem:[%s8948_s2 + $0xe8] sm:$0xff]  }
 0x1d4   :  { %6633 = vmatprep.mubr.msk.bf16.mxu0 %vm2018_vm2, %v6053_v29  ;;  %v7058_v29 = vld [vmem:[#allocation2 + $0x8] sm:$0xfe]   ;;  %v2640_v24 = vrot.slane %v7059_v19, 1  ;;  %v8492_v53 = vld [vmem:[#allocation2 + $0x20] sm:$0xf] }
 0x1d5   :  { %6632 = vmatpush3.bf16.msra.mxu0 %v7030_v22  ;;  %v2372_v6 = vrot.slane %v6076_v3, 3  ;;  %v7056_v22 = vld [vmem:[%s8948_s2 + $0xb0] sm:$0xff]   ;;  %v2639_v26 = vrot.slane %v7058_v29, 1 }
 0x1d6   :  { %6641 = vmatprep.subr.bf16.mxu0 %v7032_v25  ;;  %v2643_v40 = vsel %vm1986_vm1, %v2640_v24, %v2642_v37  ;;  %v7079_v29 = vld [vmem:[%s8948_s2 + $0x110] sm:$0xff]  }
 0x1db   :  { %6634 = vmatmul.mubr.msk.bf16.vlgmr.msra.gmra.mrb[16].mxu0 %vm2018_vm2, %v8357_v43  ;;  %v2219_v43 = vrot.slane %v8369_v5, 2 }
 0x1dc   :  { %6642 = vmatpush3.bf16.msra.mxu0 %v7032_v25  ;;  %6637 = vmatprep.mubr.msk.bf16.mxu0 %vm2018_vm2, %v8369_v5  ;;  %v2370_v5 = vrot.slane %v6075_v0, 3  ;;  %v7057_v25 = vld [vmem:[#allocation2 + $0x20] ss:$0 sps:$4 sm:$0xff]  }
 0x1dd   :  { %6643 = vmatprep.subr.bf16.mxu0 %v7033_v28  ;;  %v2220_v49 = vsel %vm2215_vm3, %v2217_v36, %v2219_v43  ;;  %v2222_v54 = vsel %vm2215_vm3, %v2219_v43, %v2221_v44  ;;  %v7061_v36 = vld [vmem:[%s8948_s2 + $0xc0] sm:$0xff]   ;;  %v8481_v43 = vld [vmem:[#allocation2 + $0x14] sm:$0xf] }
 0x1de   :  { %v2371_v9 = vsel %vm2366_vm4, %v2368_v58, %v2370_v5  ;;  %v2373_v32 = vsel %vm2366_vm4, %v2370_v5, %v2372_v6  ;;  %v2757_v58 = vld [vmem:[#allocation2 + $0x1c] sm:$0xf]  ;;  %v7073_v5 = vld [vmem:[%s8948_s2 + $0xf0] sm:$0xff]  }
 0x1df   :  { %v6111_v59 = vcombine.low %v2757_v58, %v8492_v53 }
 0x1e0   :  { %6644 = vmatpush3.bf16.msra.mxu0 %v7033_v28  ;;  %v7060_v28 = vld [vmem:[%s8948_s2 + $0xb8] sm:$0xff]  }
 0x1e1   :  { %6645 = vmatprep.subr.bf16.mxu0 %v7034_v34 }
 0x1e3   :  { %6638 = vmatmul.mubr.msk.bf16.gmra.mrb[24].mxu0 %vm2018_vm2, %v6054_v38  ;;  %v2644_v38 = vrot.slane %v7063_v35, 1 }
 0x1e4   :  { %6646 = vmatpush3.bf16.msra.mxu0 %v7034_v34  ;;  %6649 = vmatprep.mubr.msk.bf16.mxu0 %vm2018_vm2, %v2218_v39  ;;  %v2641_v34 = vsel %vm1986_vm1, %v2639_v26, %v2640_v24  ;;  %v7064_v39 = vld [vmem:[%s8948_s2 + $0xc8] sm:$0xff]   ;;  %v7081_v24 = vld [vmem:[%s8948_s2 + $0x118] sm:$0xff]  }
 0x1e5   :  { %6647 = vmatprep.subr.bf16.mxu0 %v7037_v12 }
 0x1e8   :  { %6648 = vmatpush3.bf16.msra.mxu0 %v7037_v12  ;;  %v8473_v12 = vld [vmem:[#allocation2 + $0x18] sm:$0xf] }
 0x1e9   :  { %6657 = vmatprep.subr.bf16.mxu0 %v7038_v41  ;;  %v6110_v46 = vcombine.low %v8481_v43, %v8473_v12  ;;  %v6132_v26 = vcombine.low %v8473_v12, %v2757_v58  ;;  %v7086_v12 = vld [vmem:[%s8948_s2 + $0x28] sm:$0xff]  }
 0x1eb   :  { %6650 = vmatmul.mubr.msk.bf16.vlgmr.msra.gmra.mrb[16].mxu0 %vm2018_vm2, %v2220_v49  ;;  %v7065_v49 = vld [vmem:[%s8948_s2 + $0xd0] sm:$0xff]   ;;  %v2790_v52 = vrot.slane %v6110_v46, 2 }
 0x1ec   :  { %6658 = vmatpush3.bf16.msra.mxu0 %v7038_v41  ;;  %6653 = vmatprep.mubr.msk.bf16.mxu0 %vm2018_vm2, %v2222_v54  ;;  %v8479_v41 = vld [vmem:[#allocation2 + $0x10] sm:$0xf]  ;;  %v8494_v54 = vld [vmem:[#allocation2 + $0x24] sm:$0xf] }
 0x1ed   :  { %6659 = vmatprep.subr.bf16.mxu0 %v7040_v47  ;;  %v6112_v61 = vcombine.low %v8494_v54, %v2760_v55 }
 0x1ef   :  { %v2794_v0 = vrot.slane %v6112_v61, 2 }
 0x1f0   :  { %6660 = vmatpush3.bf16.msra.mxu0 %v7040_v47  ;;  %v2753_v47 = vld [vmem:[#allocation2 + $0xc] sm:$0xc] }
 0x1f1   :  { %6661 = vmatprep.subr.bf16.mxu0 %v7041_v56  ;;  %v6109_v50 = vcombine.low %v2753_v47, %v8479_v41 }
 0x1f3   :  { %6654 = vmatmul.mubr.msk.bf16.gmra.mrb[28].mxu0 %vm2018_vm2, %v2221_v44  ;;  %v2645_v44 = vsel %vm1986_vm1, %v2642_v37, %v2644_v38 }
 0x1f4   :  { %6662 = vmatpush3.bf16.msra.mxu0 %v7041_v56  ;;  %6665 = vmatprep.mubr.msk.bf16.mxu0 %vm2018_vm2, %v2369_v2  ;;  %v2789_v56 = vrot.slane %v6109_v50, 2 }
 0x1f5   :  { %6663 = vmatprep.subr.bf16.mxu0 %v7045_v63 }
 0x1f6   :  { %v2791_v60 = vsel %vm2215_vm3, %v2789_v56, %v2790_v52 }
 0x1f8   :  { %6664 = vmatpush3.bf16.msra.mxu0 %v7045_v63  ;;  %v2792_v63 = vrot.slane %v6111_v59, 2 }
 0x1f9   :  { %6673 = vmatprep.subr.bf16.mxu0 %v7046_v4 }
 0x1fa   :  { %v2793_v2 = vsel %vm2215_vm3, %v2790_v52, %v2792_v63  ;;  %v2795_v3 = vsel %vm2215_vm3, %v2792_v63, %v2794_v0 }
 0x1fb   :  { %6666 = vmatmul.mubr.msk.bf16.vlgmr.msra.gmra.mrb[16].mxu0 %vm2018_vm2, %v2371_v9  ;;  %v2904_v9 = vld [vmem:[#allocation2 + $0x28] sm:$0x7] }
 0x1fc   :  { %6674 = vmatpush3.bf16.msra.mxu0 %v7046_v4  ;;  %6669 = vmatprep.mubr.msk.bf16.mxu0 %vm2018_vm2, %v2373_v32  ;;  %v2903_v4 = vld [vmem:[#allocation2 + $0xc] sm:$0x8] }
 0x1fd   :  { %6675 = vmatprep.subr.bf16.mxu0 %v7049_v8 }
 0x200   :  { %6676 = vmatpush3.bf16.msra.mxu0 %v7049_v8  ;;  %v2920_v8 = vrot.slane %v6110_v46, 3  ;;  %v8566_v46 = vld [vmem:[%s8948_s2] sm:$0xff]  }
 0x201   :  { %6677 = vmatprep.subr.bf16.mxu0 %v7050_v11 }
 0x203   :  { %6670 = vmatmul.mubr.msk.bf16.gmra.mrb[32].mxu0 %vm2018_vm2, %v2372_v6  ;;  %v6121_v6 = vcombine.low %v2903_v4, %v8479_v41 }
 0x204   :  { %6678 = vmatpush3.bf16.msra.mxu0 %v7050_v11  ;;  %6681 = vmatprep.mubr.msk.bf16.mxu0 %vm2018_vm2, %v6085_v14  ;;  %v7075_v11 = vld [vmem:[%s8948_s2 + $0xf8] sm:$0xff]   ;;  %v6122_v14 = vcombine.low %v8494_v54, %v2904_v9 }
 0x205   :  { %6679 = vmatprep.subr.bf16.mxu0 %v7052_v13  ;;  %v2919_v32 = vrot.slane %v6121_v6, 3 }
 0x208   :  { %6680 = vmatpush3.bf16.msra.mxu0 %v7052_v13  ;;  %v2921_v13 = vsel %vm2366_vm4, %v2919_v32, %v2920_v8 }
 0x209   :  { %6689 = vmatprep.subr.bf16.mxu0 %v7053_v15 }
 0x20b   :  { %6682 = vmatmul.mubr.msk.bf16.vlgmr.msra.gmra.mrb[16].mxu0 %vm2018_vm2, %v6086_v16  ;;  %v2922_v16 = vrot.slane %v6111_v59, 3 }
 0x20c   :  { %6690 = vmatpush3.bf16.msra.mxu0 %v7053_v15  ;;  %6685 = vmatprep.mubr.msk.bf16.mxu0 %vm2018_vm2, %v6087_v18  ;;  %v7076_v15 = vld [vmem:[%s8948_s2 + $0x100] sm:$0xff]   ;;  %v7078_v18 = vld [vmem:[%s8948_s2 + $0x108] sm:$0xff]  }
 0x20d   :  { %6691 = vmatprep.subr.bf16.mxu0 %v7055_v17  ;;  %v2923_v19 = vsel %vm2366_vm4, %v2920_v8, %v2922_v16 }
 0x210   :  { %6692 = vmatpush3.bf16.msra.mxu0 %v7055_v17  ;;  %v2924_v17 = vrot.slane %v6122_v14, 3 }
 0x211   :  { %6693 = vmatprep.subr.bf16.mxu0 %v7056_v22 }
 0x213   :  { %6686 = vmatmul.mubr.msk.bf16.gmra.mrb[36].mxu0 %vm2018_vm2, %v7057_v25  ;;  %v6131_v25 = vcombine.low %v8479_v41, %v8481_v43 }
 0x214   :  { %6694 = vmatpush3.bf16.msra.mxu0 %v7056_v22  ;;  %6697 = vmatprep.mubr.msk.bf16.mxu0 %vm2018_vm2, %v2641_v34  ;;  %v2925_v22 = vsel %vm2366_vm4, %v2922_v16, %v2924_v17  ;;  %v7085_v34 = vld [vmem:[%s8948_s2 + $0x20] sm:$0xff]  }
 0x215   :  { %6695 = vmatprep.subr.bf16.mxu0 %v7060_v28  ;;  %6753 = vmatprep.subr.bf16.mxu1 %v7085_v34 }
 0x216   :  { %6754 = vmatpush3.bf16.msra.mxu1 %v7085_v34 }
 0x217   :  { %6755 = vmatprep.subr.bf16.mxu1 %v7086_v12 }
 0x218   :  { %6696 = vmatpush3.bf16.msra.mxu0 %v7060_v28  ;;  %v6133_v28 = vcombine.low %v8492_v53, %v8494_v54 }
 0x219   :  { %6705 = vmatprep.subr.bf16.mxu0 %v7061_v36 }
 0x21a   :  { %6756 = vmatpush3.bf16.msra.mxu1 %v7086_v12 }
 0x21b   :  { %6698 = vmatmul.mubr.msk.bf16.vlgmr.msra.gmra.mrb[16].mxu0 %vm2018_vm2, %v2643_v40  ;;  %v7088_v40 = vld [vmem:[%s8948_s2 + $0x38] sm:$0xff]  }
 0x21c   :  { %6706 = vmatpush3.bf16.msra.mxu0 %v7061_v36  ;;  %6701 = vmatprep.mubr.msk.bf16.mxu0 %vm2018_vm2, %v2645_v44 }
 0x21d   :  { %6707 = vmatprep.subr.bf16.mxu0 %v7064_v39 }
 0x220   :  { %6708 = vmatpush3.bf16.msra.mxu0 %v7064_v39  ;;  %v7087_v39 = vld [vmem:[%s8948_s2 + $0x30] sm:$0xff]  }
 0x221   :  { %6709 = vmatprep.subr.bf16.mxu0 %v7065_v49  ;;  %6757 = vmatprep.subr.bf16.mxu1 %v7087_v39 }
 0x222   :  { %6758 = vmatpush3.bf16.msra.mxu1 %v7087_v39 }
 0x223   :  { %6702 = vmatmul.mubr.msk.bf16.gmra.mrb[40].mxu0 %vm2018_vm2, %v2644_v38  ;;  %6759 = vmatprep.subr.bf16.mxu1 %v7088_v40 }
 0x224   :  { %6710 = vmatpush3.bf16.msra.mxu0 %v7065_v49  ;;  %6713 = vmatprep.mubr.msk.bf16.mxu0 %vm2018_vm2, %v2791_v60 }
 0x225   :  { %6711 = vmatprep.subr.bf16.mxu0 %v7068_v57 }
 0x226   :  { %6760 = vmatpush3.bf16.msra.mxu1 %v7088_v40 }
 0x227   :  { %6769 = vmatprep.subr.bf16.mxu1 %v8566_v46 }
 0x228   :  { %6712 = vmatpush3.bf16.msra.mxu0 %v7068_v57 }
 0x229   :  { %6721 = vmatprep.subr.bf16.mxu0 %v7069_v62 }
 0x22b   :  { %6714 = vmatmul.mubr.msk.bf16.vlgmr.msra.gmra.mrb[16].mxu0 %vm2018_vm2, %v2793_v2 }
 0x22c   :  { %6722 = vmatpush3.bf16.msra.mxu0 %v7069_v62  ;;  %6717 = vmatprep.mubr.msk.bf16.mxu0 %vm2018_vm2, %v2795_v3 }
 0x22d   :  { %6723 = vmatprep.subr.bf16.mxu0 %v7072_v1 }
 0x230   :  { %6724 = vmatpush3.bf16.msra.mxu0 %v7072_v1 }
 0x231   :  { %6725 = vmatprep.subr.bf16.mxu0 %v7073_v5 }
 0x233   :  { %6718 = vmatmul.mubr.msk.bf16.gmra.mrb[44].mxu0 %vm2018_vm2, %v2794_v0 }
 0x234   :  { %6726 = vmatpush3.bf16.msra.mxu0 %v7073_v5  ;;  %6729 = vmatprep.mubr.msk.bf16.mxu0 %vm2018_vm2, %v2921_v13 }
 0x235   :  { %6727 = vmatprep.subr.bf16.mxu0 %v7075_v11 }
 0x238   :  { %6728 = vmatpush3.bf16.msra.mxu0 %v7075_v11 }
 0x239   :  { %6737 = vmatprep.subr.bf16.mxu0 %v7076_v15 }
 0x23b   :  { %6730 = vmatmul.mubr.msk.bf16.vlgmr.msra.gmra.mrb[16].mxu0 %vm2018_vm2, %v2923_v19 }
 0x23c   :  { %6738 = vmatpush3.bf16.msra.mxu0 %v7076_v15  ;;  %6733 = vmatprep.mubr.msk.bf16.mxu0 %vm2018_vm2, %v2925_v22 }
 0x23d   :  { %6739 = vmatprep.subr.bf16.mxu0 %v7078_v18 }
 0x240   :  { %6740 = vmatpush3.bf16.msra.mxu0 %v7078_v18 }
 0x241   :  { %6741 = vmatprep.subr.bf16.mxu0 %v7079_v29 }
 0x243   :  { %6734 = vmatmul.mubr.msk.bf16.gmra.mrb[48].mxu0 %vm2018_vm2, %v2924_v17 }
 0x244   :  { %6742 = vmatpush3.bf16.msra.mxu0 %v7079_v29  ;;  %6745 = vmatprep.mubr.msk.bf16.mxu0 %vm2018_vm2, %v6131_v25 }
 0x245   :  { %6743 = vmatprep.subr.bf16.mxu0 %v7081_v24 }
 0x248   :  { %6744 = vmatpush3.bf16.msra.mxu0 %v7081_v24 }
 0x24b   :  { %6746 = vmatmul.mubr.msk.bf16.vlgmr.msra.gmra.mrb[16].mxu0 %vm2018_vm2, %v6132_v26 }
 0x24c   :  { %6749 = vmatprep.mubr.msk.bf16.mxu0 %vm2018_vm2, %v6133_v28 }
 0x253   :  { %6750 = vmatmul.mubr.msk.bf16.gmra.mrb[52].mxu0 %vm2018_vm2, %v7084_v31 }
 0x2a6   :  { %v6623_v35 = vpop.f32.mrb[20].mxu0 }
 0x2a7   :  { %v2081_v36 = vpop.f32.mrb[21].mxu0 }
 0x2a8   :  { %v6624_v37 = vpop.f32.mrb[22].mxu0 }
 0x2a9   :  { %v2084_v38 = vpop.f32.mrb[23].mxu0 }
 0x2b6   :  { %v6639_v41 = vpop.f32.mrb[24].mxu0 }
 0x2b7   :  { %v2194_v43 = vadd.f32 %v6639_v41, %v6623_v35  ;;  %v2185_v44 = vpop.f32.mrb[25].mxu0 }
 0x2b8   :  { %v2186_v47 = vadd.f32 %v2185_v44, %v2081_v36  ;;  %v6640_v49 = vpop.f32.mrb[26].mxu0 }
 0x2b9   :  { %v2188_v50 = vpop.f32.mrb[27].mxu0 }
 0x2ba   :  { %v2189_v52 = vadd.f32 %v2188_v50, %v2084_v38 }
 0x2c6   :  { %v6655_v53 = vpop.f32.mrb[28].mxu0 }
 0x2c7   :  { %v2329_v54 = vadd.f32 %v6655_v53, %v2194_v43  ;;  %v2309_v55 = vpop.f32.mrb[29].mxu0 }
 0x2c8   :  { %v2327_v56 = vadd.f32 %v2309_v55, %v2186_v47  ;;  %v6656_v57 = vpop.f32.mrb[30].mxu0 }
 0x2c9   :  { %v2312_v58 = vpop.f32.mrb[31].mxu0 }
 0x2ca   :  { %v2328_v59 = vadd.f32 %v2312_v58, %v2189_v52 }
 0x2d6   :  { %v6671_v60 = vpop.f32.mrb[32].mxu0 }
 0x2d7   :  { %v2480_v61 = vadd.f32 %v6671_v60, %v2329_v54  ;;  %v2460_v62 = vpop.f32.mrb[33].mxu0 }
 0x2d8   :  { %v2478_v63 = vadd.f32 %v2460_v62, %v2327_v56  ;;  %v6672_v0 = vpop.f32.mrb[34].mxu0 }
 0x2d9   :  { %v2463_v1 = vpop.f32.mrb[35].mxu0 }
 0x2da   :  { %v2479_v2 = vadd.f32 %v2463_v1, %v2328_v59 }
 0x2e6   :  { %v6687_v3 = vpop.f32.mrb[36].mxu0 }
 0x2e7   :  { %v2602_v4 = vadd.f32 %v6687_v3, %v2480_v61  ;;  %v2582_v5 = vpop.f32.mrb[37].mxu0 }
 0x2e8   :  { %v2600_v6 = vadd.f32 %v2582_v5, %v2478_v63  ;;  %v6688_v8 = vpop.f32.mrb[38].mxu0 }
 0x2e9   :  { %v2585_v9 = vpop.f32.mrb[39].mxu0 }
 0x2ea   :  { %v2601_v32 = vadd.f32 %v2585_v9, %v2479_v2 }
 0x2f6   :  { %v6703_v11 = vpop.f32.mrb[40].mxu0 }
 0x2f7   :  { %v2752_v13 = vadd.f32 %v6703_v11, %v2602_v4  ;;  %v2732_v14 = vpop.f32.mrb[41].mxu0  ;;  %v3231_v11 = vld [vmem:[#allocation2] sm:$0xe] }
 0x2f8   :  { %v2750_v15 = vadd.f32 %v2732_v14, %v2600_v6  ;;  %v6704_v16 = vpop.f32.mrb[42].mxu0 }
 0x2f9   :  { %v2735_v17 = vpop.f32.mrb[43].mxu0 }
 0x2fa   :  { %v2751_v18 = vadd.f32 %v2735_v17, %v2601_v32  ;;  %v3217_v32 = vld [vmem:[#allocation2 + $0x4] sm:$0xf] }
 0x2fb   :  { %v6150_v17 = vcombine.low %v3231_v11, %v3217_v32  ;;  %v7107_v11 = vld [vmem:[%s8948_s2 + $0x70] sm:$0xff]  }
 0x306   :  { %v6719_v19 = vpop.f32.mrb[44].mxu0 }
 0x307   :  { %v2902_v22 = vadd.f32 %v6719_v19, %v2752_v13  ;;  %v2882_v29 = vpop.f32.mrb[45].mxu0 }
 0x308   :  { %v2900_v24 = vadd.f32 %v2882_v29, %v2750_v15  ;;  %v6720_v25 = vpop.f32.mrb[46].mxu0 }
 0x309   :  { %v2885_v26 = vpop.f32.mrb[47].mxu0 }
 0x30a   :  { %v2901_v28 = vadd.f32 %v2885_v26, %v2751_v18 }
 0x316   :  { %v6735_v31 = vpop.f32.mrb[48].mxu0 }
 0x317   :  { %v3032_v34 = vadd.f32 %v6735_v31, %v2902_v22  ;;  %v3012_v35 = vpop.f32.mrb[49].mxu0 }
 0x318   :  { %v3030_v36 = vadd.f32 %v3012_v35, %v2900_v24  ;;  %v6736_v37 = vpop.f32.mrb[50].mxu0 }
 0x319   :  { %v3015_v38 = vpop.f32.mrb[51].mxu0 }
 0x31a   :  { %v3031_v12 = vadd.f32 %v3015_v38, %v2901_v28  ;;  %v3261_v28 = vrot.slane %v6150_v17, 1  ;;  %v7093_v38 = vld [vmem:[%s8948_s2 + $0x8] sm:$0xff]  }
 0x31e   :  { %v6747_v39 = vpop.f32.mrb[16].mxu0 }
 0x31f   :  { %v3161_v40 = vadd.f32 %v6747_v39, %v8284_v23  ;;  %v3118_v41 = vpop.f32.mrb[17].mxu0 }
 0x320   :  { %v3159_v43 = vadd.f32 %v8284_v23, %v3118_v41  ;;  %v6748_v44 = vpop.f32.mrb[18].mxu0 }
 0x321   :  { %v3168_v47 = vmax.f32 %v3161_v40, 0.0  ;;  %v3162_v49 = vadd.f32 %v6748_v44, %v8284_v23  ;;  %v3121_v50 = vpop.f32.mrb[19].mxu0  ;;  %v7096_v44 = vld [vmem:[%s8948_s2 + $0x18] sm:$0xff]  }
 0x322   :  { %v3166_v52 = vmax.f32 %v3159_v43, 0.0  ;;  %v3160_v53 = vadd.f32 %v8284_v23, %v3121_v50  ;;  %v3216_v43 = vld [vmem:[#allocation2] sm:$0xf] }
 0x323   :  { %v3175_v54 = vmul.f32 %v3168_v47, %v8335_v48  ;;  %v3169_v55 = vmax.f32 %v3162_v49, 0.0  ;;  %v6162_v49 = vcombine.low %v3216_v43, %v3217_v32 }
 0x324   :  { %v3173_v56 = vmul.f32 %v3166_v52, %v8331_v33  ;;  %v3167_v57 = vmax.f32 %v3160_v53, 0.0  ;;  %v3472_v52 = vld [vmem:[#allocation2] sm:$0xc]  ;;  %v7099_v53 = vld [vmem:[%s8948_s2 + $0x48] sm:$0xff]  }
 0x325   :  { %v6329_v58 = vpack.c.bf16 %v3175_v54, %v3175_v54  ;;  %v3176_v59 = vmul.f32 %v3169_v55, %v8345_v10  ;;  %v6172_v54 = vcombine.low %v3472_v52, %v3217_v32  ;;  %v7100_v55 = vld [vmem:[%s8948_s2 + $0x50] sm:$0xff]  }
 0x326   :  { %v6327_v60 = vpack.c.bf16 %v3173_v56, %v3173_v56  ;;  %v3174_v61 = vmul.f32 %v3167_v57, %v8337_v51  ;;  %v6751_v62 = vpop.f32.mrb[52].mxu0 }
 0x327   :  { %3211 = vst.msk [vmem:[#allocation2 + $0x10] sm:$0xf] %vm1360_vm0, %v6329_v58  ;;  %v6330_v63 = vpack.c.bf16 %v3176_v59, %v3176_v59  ;;  %v3154_v0 = vadd.f32 %v6751_v62, %v3032_v34  ;;  %v3134_v1 = vpop.f32.mrb[53].mxu0  ;;  %v3488_v56 = vrot.slane %v6172_v54, 2 }
 0x328   :  { %3209 = vst.msk [vmem:[#allocation2 + $0x8] sm:$0xf] %vm1360_vm0, %v6327_v60  ;;  %v6328_v2 = vpack.c.bf16 %v3174_v61, %v3174_v61  ;;  %v3152_v3 = vadd.f32 %v3134_v1, %v3030_v36  ;;  %v6752_v4 = vpop.f32.mrb[54].mxu0  ;;  %v7103_v60 = vld [vmem:[%s8948_s2 + $0x58] sm:$0xff]  }
 0x329   :  { %3212 = vst.msk [vmem:[#allocation2 + $0x14] sm:$0xf] %vm1360_vm0, %v6330_v63  ;;  %v3165_v5 = vadd.f32 %v8284_v23, %v3154_v0  ;;  %v3137_v6 = vpop.f32.mrb[55].mxu0  ;;  %v7104_v63 = vld [vmem:[%s8948_s2 + $0x60] sm:$0xff]  }
 0x32a   :  { %3210 = vst.msk [vmem:[#allocation2 + $0xc] sm:$0xf] %vm1360_vm0, %v6328_v2  ;;  %v3163_v8 = vadd.f32 %v8284_v23, %v3152_v3  ;;  %v3153_v9 = vadd.f32 %v3137_v6, %v3031_v12  ;;  %v7095_v12 = vld [vmem:[%s8948_s2 + $0x10] sm:$0xff]   ;;  %v7106_v3 = vld [vmem:[%s8948_s2 + $0x68] sm:$0xff]  }
 0x32b   :  { %v3172_v13 = vmax.f32 %v3165_v5, 0.0  ;;  %v3602_v5 = vld [vmem:[#allocation2 + $0x4] sm:$0x8] }
 0x32c   :  { %v3170_v14 = vmax.f32 %v3163_v8, 0.0  ;;  %v3164_v15 = vadd.f32 %v8284_v23, %v3153_v9 }
 0x32d   :  { %v3179_v16 = vmul.f32 %v3172_v13, %v8372_v7 }
 0x32e   :  { %v3177_v18 = vmul.f32 %v3170_v14, %v8355_v42  ;;  %v3171_v19 = vmax.f32 %v3164_v15, 0.0  ;;  %v3605_v8 = vld [vmem:[#allocation2 + $0x10] sm:$0xf] }
 0x32f   :  { %v6333_v22 = vpack.c.bf16 %v3179_v16, %v3179_v16  ;;  %v3603_v6 = vld [vmem:[#allocation2 + $0x8] sm:$0xf] }
 0x330   :  { %v6331_v29 = vpack.c.bf16 %v3177_v18, %v3177_v18  ;;  %v3178_v24 = vmul.f32 %v3171_v19, %v8360_v45  ;;  %v8587_v25 = vld [vmem:[#allocation2 + $0x10] sm:$0xff]   ;;  %v6182_v13 = vcombine.low %v3602_v5, %v3603_v6  ;;  %v7111_v19 = vld [vmem:[%s8948_s2 + $0x78] sm:$0xff]  }
 0x331   :  { %3215 = vst.msk [vmem:[#allocation2 + $0x20] sm:$0xf] %vm1360_vm0, %v6333_v22  ;;  %v8590_v26 = vld [vmem:[#allocation2 + $0x8] sm:$0xff]   ;;  %v3264_v34 = vrot.slane %v8587_v25, 1  ;;  %v3491_v0 = vrot.slane %v8587_v25, 2 }
 0x332   :  { %3213 = vst.msk [vmem:[#allocation2 + $0x18] sm:$0xf] %vm1360_vm0, %v6331_v29  ;;  %v6332_v31 = vpack.c.bf16 %v3178_v24, %v3178_v24  ;;  %v3262_v35 = vrot.slane %v8590_v26, 1  ;;  %v3489_v57 = vrot.slane %v8590_v26, 2  ;;  %v3604_v2 = vld [vmem:[#allocation2 + $0xc] sm:$0xf] }
 0x333   :  { %v6183_v32 = vcombine.low %v3604_v2, %v3605_v8  ;;  %v3606_v17 = vld [vmem:[#allocation2 + $0x14] sm:$0xf]  ;;  %v3638_v18 = vrot.slane %v6182_v13, 3 }
 0x334   :  { %3214 = vst.msk [vmem:[#allocation2 + $0x1c] sm:$0xf] %vm1360_vm0, %v6332_v31  ;;  %v3263_v36 = vsel %vm1986_vm1, %v3261_v28, %v3262_v35  ;;  %v3265_v37 = vsel %vm1986_vm1, %v3262_v35, %v3264_v34  ;;  %v3490_v61 = vsel %vm2215_vm3, %v3488_v56, %v3489_v57  ;;  %v3492_v4 = vsel %vm2215_vm3, %v3489_v57, %v3491_v0  ;;  %v7127_v56 = vld [vmem:[%s8948_s2 + $0xc0] sm:$0xff]  }
 0x335   :  { %6761 = vmatprep.mubr.msk.bf16.mxu1 %vm2018_vm2, %v3263_v36  ;;  %v3639_v14 = vrot.slane %v6183_v32, 3 }
 0x336   :  { %6762 = vmatmul.mubr.msk.bf16.vlgmr.msra.gmra.mrb[16].mxu1 %vm2018_vm2, %v3265_v37  ;;  %v7116_v37 = vld [vmem:[%s8948_s2 + $0x90] sm:$0xff]  }
 0x337   :  { %6770 = vmatpush3.bf16.msra.mxu1 %v8566_v46  ;;  %v7098_v46 = vld [vmem:[%s8948_s2 + $0x40] sm:$0xff]   ;;  %v3640_v24 = vsel %vm2366_vm4, %v3638_v18, %v3639_v14 }
 0x338   :  { %6771 = vmatprep.subr.bf16.mxu1 %v7093_v38  ;;  %v3609_v29 = vld [vmem:[#allocation2 + $0x20] sm:$0x7] }
 0x339   :  { %v3222_v39 = vld [vmem:[#allocation2 + $0x18] sm:$0xf]  ;;  %v7123_v52 = vld [vmem:[#allocation2 + $0x20] ss:$0 sps:$4 sm:$0xff]  }
 0x33a   :  { %v6163_v59 = vcombine.low %v3222_v39, %v3222_v39  ;;  %v3607_v15 = vld [vmem:[#allocation2 + $0x18] sm:$0xf]  ;;  %v7129_v57 = vld [vmem:[#allocation2 + $0x20] sm:$0x1f]  }
 0x33b   :  { %v3232_v40 = vld [vmem:[#allocation2 + $0x1c] sm:$0x1]  ;;  %6772 = vmatpush3.bf16.msra.mxu1 %v7093_v38  ;;  %v6184_v22 = vcombine.low %v3606_v17, %v3607_v15  ;;  %v4029_v13 = vld [vmem:[#allocation2 + $0x20] sm:$0xf] }
 0x33c   :  { %v6153_v41 = vcombine.low %v3222_v39, %v3232_v40  ;;  %6773 = vmatprep.subr.bf16.mxu1 %v7095_v12  ;;  %v3473_v58 = vld [vmem:[#allocation2 + $0x1c] sm:$0x3]  ;;  %v6195_v40 = vcombine.low %v3605_v8, %v3606_v17  ;;  %v7136_v18 = vld [vmem:[%s8948_s2 + $0xe0] sm:$0xff]  }
 0x33d   :  { %v6173_v62 = vcombine.low %v3222_v39, %v3473_v58  ;;  %v3608_v16 = vld [vmem:[#allocation2 + $0x1c] sm:$0xf]  ;;  %v3641_v28 = vrot.slane %v6184_v22, 3  ;;  %v7119_v39 = vld [vmem:[%s8948_s2 + $0xa0] sm:$0xff]  }
 0x33e   :  { %v3266_v47 = vrot.slane %v6153_v41, 1  ;;  %v7118_v38 = vld [vmem:[%s8948_s2 + $0x98] sm:$0xff]   ;;  %v7121_v41 = vld [vmem:[%s8948_s2 + $0xa8] sm:$0xff]   ;;  %v6196_v43 = vcombine.low %v3607_v15, %v3608_v16  ;;  %v4030_v15 = vld [vmem:[#allocation2 + $0x24] sm:$0xf] }
 0x33f   :  { %6774 = vmatpush3.bf16.msra.mxu1 %v7095_v12  ;;  %v3493_v1 = vrot.slane %v6173_v62, 2  ;;  %v3642_v35 = vsel %vm2366_vm4, %v3639_v14, %v3641_v28  ;;  %v6194_v12 = vcombine.low %v3603_v6, %v3604_v2  ;;  %v7128_v54 = vld [vmem:[#allocation2 + $0x18] sm:$0xff]  }
 0x340   :  { %v3267_v50 = vsel %vm1986_vm1, %v3264_v34, %v3266_v47  ;;  %6775 = vmatprep.subr.bf16.mxu1 %v7096_v44  ;;  %v7115_v34 = vld [vmem:[%s8948_s2 + $0x88] sm:$0xff]   ;;  %v3913_v58 = vrot.slane %v7128_v54, 1  ;;  %v8711_v6 = vld [vmem:[#allocation2 + $0x1c] sm:$0xf] }
 0x341   :  { %6765 = vmatprep.mubr.msk.bf16.mxu1 %vm2018_vm2, %v3267_v50  ;;  %v3494_v9 = vsel %vm2215_vm3, %v3491_v0, %v3493_v1  ;;  %v8698_v0 = vld [vmem:[#allocation2 + $0x14] sm:$0xf]  ;;  %v6220_v14 = vcombine.low %v8711_v6, %v4029_v13  ;;  %v7150_v54 = vld [vmem:[#allocation2 + $0x28] ss:$0 sps:$4 sm:$0xff]  }
 0x342   :  { %6766 = vmatmul.mubr.msk.bf16.gmra.mrb[20].mxu1 %vm2018_vm2, %v3266_v47  ;;  %v7125_v47 = vld [vmem:[#allocation2 + $0x10] sm:$0xff]  }
 0x343   :  { %6777 = vmatprep.mubr.msk.bf16.mxu1 %vm2018_vm2, %v6162_v49  ;;  %6776 = vmatpush3.bf16.msra.mxu1 %v7096_v44  ;;  %v7124_v44 = vld [vmem:[#allocation2 + $0x8] sm:$0xfe]   ;;  %v7122_v49 = vld [vmem:[%s8948_s2 + $0xb0] sm:$0xff]  }
 0x344   :  { %6785 = vmatprep.subr.bf16.mxu1 %v7098_v46  ;;  %v3910_v50 = vrot.slane %v7124_v44, 1 }
 0x34a   :  { %6778 = vmatmul.mubr.msk.bf16.vlgmr.msra.gmra.mrb[16].mxu1 %vm2018_vm2, %v8590_v26  ;;  %v7112_v26 = vld [vmem:[%s8948_s2 + $0x80] sm:$0xff]  }
 0x34b   :  { %6786 = vmatpush3.bf16.msra.mxu1 %v7098_v46  ;;  %6781 = vmatprep.mubr.msk.bf16.mxu1 %vm2018_vm2, %v8587_v25  ;;  %v6185_v25 = vcombine.low %v3608_v16, %v3609_v29  ;;  %v3911_v46 = vrot.slane %v7125_v47, 1  ;;  %v7139_v29 = vld [vmem:[%s8948_s2 + $0xe8] sm:$0xff]  }
 0x34c   :  { %6787 = vmatprep.subr.bf16.mxu1 %v7099_v53 }
 0x34d   :  { %v3643_v31 = vrot.slane %v6185_v25, 3  ;;  %v3914_v62 = vsel %vm1986_vm1, %v3911_v46, %v3913_v58  ;;  %v4174_v25 = vld [vmem:[#allocation2 + $0xc] sm:$0x8] }
 0x34f   :  { %6788 = vmatpush3.bf16.msra.mxu1 %v7099_v53  ;;  %v3644_v36 = vsel %vm2366_vm4, %v3641_v28, %v3643_v31  ;;  %v7126_v53 = vld [vmem:[%s8948_s2 + $0xb8] sm:$0xff]   ;;  %v7140_v28 = vld [vmem:[%s8948_s2 + $0xf0] sm:$0xff]  }
 0x350   :  { %6789 = vmatprep.subr.bf16.mxu1 %v7100_v55 }
 0x352   :  { %6782 = vmatmul.mubr.msk.bf16.gmra.mrb[24].mxu1 %vm2018_vm2, %v6163_v59  ;;  %v8692_v59 = vld [vmem:[#allocation2 + $0x18] sm:$0xf] }
 0x353   :  { %6790 = vmatpush3.bf16.msra.mxu1 %v7100_v55  ;;  %6793 = vmatprep.mubr.msk.bf16.mxu1 %vm2018_vm2, %v3490_v61  ;;  %v3912_v55 = vsel %vm1986_vm1, %v3910_v50, %v3911_v46  ;;  %v7130_v61 = vld [vmem:[%s8948_s2 + $0xc8] sm:$0xff]   ;;  %v6219_v2 = vcombine.low %v8698_v0, %v8692_v59  ;;  %v7148_v50 = vld [vmem:[%s8948_s2 + $0x118] sm:$0xff]  }
 0x354   :  { %6791 = vmatprep.subr.bf16.mxu1 %v7103_v60 }
 0x355   :  { %v4061_v8 = vrot.slane %v6219_v2, 2 }
 0x357   :  { %6792 = vmatpush3.bf16.msra.mxu1 %v7103_v60  ;;  %v3915_v60 = vrot.slane %v7129_v57, 1 }
 0x358   :  { %6801 = vmatprep.subr.bf16.mxu1 %v7104_v63 }
 0x35a   :  { %6794 = vmatmul.mubr.msk.bf16.vlgmr.msra.gmra.mrb[16].mxu1 %vm2018_vm2, %v3492_v4  ;;  %v7131_v4 = vld [vmem:[%s8948_s2 + $0xd0] sm:$0xff]  }
 0x35b   :  { %6802 = vmatpush3.bf16.msra.mxu1 %v7104_v63  ;;  %6797 = vmatprep.mubr.msk.bf16.mxu1 %vm2018_vm2, %v3494_v9  ;;  %v4024_v63 = vld [vmem:[#allocation2 + $0xc] sm:$0xc]  ;;  %v4031_v9 = vld [vmem:[#allocation2 + $0x28] sm:$0x3] }
 0x35c   :  { %6803 = vmatprep.subr.bf16.mxu1 %v7106_v3  ;;  %v6221_v17 = vcombine.low %v4030_v15, %v4031_v9 }
 0x35e   :  { %v4065_v22 = vrot.slane %v6221_v17, 2 }
 0x35f   :  { %6804 = vmatpush3.bf16.msra.mxu1 %v7106_v3  ;;  %v8705_v3 = vld [vmem:[#allocation2 + $0x10] sm:$0xf] }
 0x360   :  { %6805 = vmatprep.subr.bf16.mxu1 %v7107_v11  ;;  %v6218_v5 = vcombine.low %v4024_v63, %v8705_v3  ;;  %v6240_v46 = vcombine.low %v8705_v3, %v8698_v0 }
 0x362   :  { %6798 = vmatmul.mubr.msk.bf16.gmra.mrb[28].mxu1 %vm2018_vm2, %v3493_v1  ;;  %v3916_v1 = vsel %vm1986_vm1, %v3913_v58, %v3915_v60  ;;  %v4060_v32 = vrot.slane %v6218_v5, 2 }
 0x363   :  { %6806 = vmatpush3.bf16.msra.mxu1 %v7107_v11  ;;  %6809 = vmatprep.mubr.msk.bf16.mxu1 %vm2018_vm2, %v3640_v24  ;;  %v7135_v11 = vld [vmem:[%s8948_s2 + $0xd8] sm:$0xff]  }
 0x364   :  { %6807 = vmatprep.subr.bf16.mxu1 %v7111_v19  ;;  %v4062_v16 = vsel %vm2215_vm3, %v4060_v32, %v4061_v8 }
 0x367   :  { %6808 = vmatpush3.bf16.msra.mxu1 %v7111_v19  ;;  %v4063_v19 = vrot.slane %v6220_v14, 2 }
 0x368   :  { %6817 = vmatprep.subr.bf16.mxu1 %v7112_v26 }
 0x369   :  { %v4064_v24 = vsel %vm2215_vm3, %v4061_v8, %v4063_v19 }
 0x36a   :  { %6810 = vmatmul.mubr.msk.bf16.vlgmr.msra.gmra.mrb[16].mxu1 %vm2018_vm2, %v3642_v35  ;;  %v4175_v35 = vld [vmem:[#allocation2 + $0x28] sm:$0x7] }
 0x36b   :  { %6818 = vmatpush3.bf16.msra.mxu1 %v7112_v26  ;;  %6813 = vmatprep.mubr.msk.bf16.mxu1 %vm2018_vm2, %v3644_v36  ;;  %v4066_v26 = vsel %vm2215_vm3, %v4063_v19, %v4065_v22 }
 0x36c   :  { %6819 = vmatprep.subr.bf16.mxu1 %v7115_v34 }
 0x36f   :  { %6820 = vmatpush3.bf16.msra.mxu1 %v7115_v34  ;;  %v4191_v34 = vrot.slane %v6219_v2, 3 }
 0x370   :  { %6821 = vmatprep.subr.bf16.mxu1 %v7116_v37 }
 0x372   :  { %6814 = vmatmul.mubr.msk.bf16.gmra.mrb[32].mxu1 %vm2018_vm2, %v3643_v31  ;;  %v6230_v31 = vcombine.low %v4174_v25, %v8705_v3 }
 0x373   :  { %6822 = vmatpush3.bf16.msra.mxu1 %v7116_v37  ;;  %6825 = vmatprep.mubr.msk.bf16.mxu1 %vm2018_vm2, %v6194_v12  ;;  %v7142_v37 = vld [vmem:[%s8948_s2 + $0xf8] sm:$0xff]   ;;  %v6231_v12 = vcombine.low %v4030_v15, %v4175_v35 }
 0x374   :  { %6823 = vmatprep.subr.bf16.mxu1 %v7118_v38  ;;  %v4190_v36 = vrot.slane %v6230_v31, 3 }
 0x377   :  { %6824 = vmatpush3.bf16.msra.mxu1 %v7118_v38  ;;  %v4192_v38 = vsel %vm2366_vm4, %v4190_v36, %v4191_v34 }
 0x378   :  { %6833 = vmatprep.subr.bf16.mxu1 %v7119_v39 }
 0x37a   :  { %6826 = vmatmul.mubr.msk.bf16.vlgmr.msra.gmra.mrb[16].mxu1 %vm2018_vm2, %v6195_v40  ;;  %v4193_v40 = vrot.slane %v6220_v14, 3 }
 0x37b   :  { %6834 = vmatpush3.bf16.msra.mxu1 %v7119_v39  ;;  %6829 = vmatprep.mubr.msk.bf16.mxu1 %vm2018_vm2, %v6196_v43  ;;  %v7143_v39 = vld [vmem:[%s8948_s2 + $0x100] sm:$0xff]   ;;  %v7145_v43 = vld [vmem:[%s8948_s2 + $0x108] sm:$0xff]  }
 0x37c   :  { %6835 = vmatprep.subr.bf16.mxu1 %v7121_v41  ;;  %v4194_v44 = vsel %vm2366_vm4, %v4191_v34, %v4193_v40 }
 0x37f   :  { %6836 = vmatpush3.bf16.msra.mxu1 %v7121_v41  ;;  %v4195_v41 = vrot.slane %v6231_v12, 3 }
 0x380   :  { %6837 = vmatprep.subr.bf16.mxu1 %v7122_v49 }
 0x381   :  { %v4196_v47 = vsel %vm2366_vm4, %v4193_v40, %v4195_v41 }
 0x382   :  { %6830 = vmatmul.mubr.msk.bf16.gmra.mrb[36].mxu1 %vm2018_vm2, %v7123_v52  ;;  %v6241_v52 = vcombine.low %v8692_v59, %v8711_v6 }
 0x383   :  { %6838 = vmatpush3.bf16.msra.mxu1 %v7122_v49  ;;  %6841 = vmatprep.mubr.msk.bf16.mxu1 %vm2018_vm2, %v3912_v55  ;;  %v7146_v49 = vld [vmem:[%s8948_s2 + $0x110] sm:$0xff]  }
 0x384   :  { %6839 = vmatprep.subr.bf16.mxu1 %v7126_v53 }
 0x387   :  { %6840 = vmatpush3.bf16.msra.mxu1 %v7126_v53  ;;  %v6242_v53 = vcombine.low %v4029_v13, %v4030_v15 }
 0x388   :  { %6849 = vmatprep.subr.bf16.mxu1 %v7127_v56 }
 0x38a   :  { %6842 = vmatmul.mubr.msk.bf16.vlgmr.msra.gmra.mrb[16].mxu1 %vm2018_vm2, %v3914_v62 }
 0x38b   :  { %6850 = vmatpush3.bf16.msra.mxu1 %v7127_v56  ;;  %6845 = vmatprep.mubr.msk.bf16.mxu1 %vm2018_vm2, %v3916_v1 }
 0x38c   :  { %6851 = vmatprep.subr.bf16.mxu1 %v7130_v61 }
 0x38f   :  { %6852 = vmatpush3.bf16.msra.mxu1 %v7130_v61 }
 0x390   :  { %6853 = vmatprep.subr.bf16.mxu1 %v7131_v4 }
 0x392   :  { %6846 = vmatmul.mubr.msk.bf16.gmra.mrb[40].mxu1 %vm2018_vm2, %v3915_v60 }
 0x393   :  { %6854 = vmatpush3.bf16.msra.mxu1 %v7131_v4  ;;  %6857 = vmatprep.mubr.msk.bf16.mxu1 %vm2018_vm2, %v4062_v16 }
 0x394   :  { %6855 = vmatprep.subr.bf16.mxu1 %v7135_v11 }
 0x397   :  { %6856 = vmatpush3.bf16.msra.mxu1 %v7135_v11 }
 0x398   :  { %6865 = vmatprep.subr.bf16.mxu1 %v7136_v18 }
 0x39a   :  { %6858 = vmatmul.mubr.msk.bf16.vlgmr.msra.gmra.mrb[16].mxu1 %vm2018_vm2, %v4064_v24 }
 0x39b   :  { %6866 = vmatpush3.bf16.msra.mxu1 %v7136_v18  ;;  %6861 = vmatprep.mubr.msk.bf16.mxu1 %vm2018_vm2, %v4066_v26 }
 0x39c   :  { %6867 = vmatprep.subr.bf16.mxu1 %v7139_v29 }
 0x39f   :  { %6868 = vmatpush3.bf16.msra.mxu1 %v7139_v29 }
 0x3a0   :  { %6869 = vmatprep.subr.bf16.mxu1 %v7140_v28 }
 0x3a2   :  { %6862 = vmatmul.mubr.msk.bf16.gmra.mrb[44].mxu1 %vm2018_vm2, %v4065_v22 }
 0x3a3   :  { %6870 = vmatpush3.bf16.msra.mxu1 %v7140_v28  ;;  %6873 = vmatprep.mubr.msk.bf16.mxu1 %vm2018_vm2, %v4192_v38 }
 0x3a4   :  { %6871 = vmatprep.subr.bf16.mxu1 %v7142_v37 }
 0x3a7   :  { %6872 = vmatpush3.bf16.msra.mxu1 %v7142_v37 }
 0x3a8   :  { %6881 = vmatprep.subr.bf16.mxu1 %v7143_v39 }
 0x3aa   :  { %6874 = vmatmul.mubr.msk.bf16.vlgmr.msra.gmra.mrb[16].mxu1 %vm2018_vm2, %v4194_v44 }
 0x3ab   :  { %6882 = vmatpush3.bf16.msra.mxu1 %v7143_v39  ;;  %6877 = vmatprep.mubr.msk.bf16.mxu1 %vm2018_vm2, %v4196_v47 }
 0x3ac   :  { %6883 = vmatprep.subr.bf16.mxu1 %v7145_v43 }
 0x3af   :  { %6884 = vmatpush3.bf16.msra.mxu1 %v7145_v43 }
 0x3b0   :  { %6885 = vmatprep.subr.bf16.mxu1 %v7146_v49 }
 0x3b2   :  { %6878 = vmatmul.mubr.msk.bf16.gmra.mrb[48].mxu1 %vm2018_vm2, %v4195_v41 }
 0x3b3   :  { %6886 = vmatpush3.bf16.msra.mxu1 %v7146_v49  ;;  %6889 = vmatprep.mubr.msk.bf16.mxu1 %vm2018_vm2, %v6240_v46 }
 0x3b4   :  { %6887 = vmatprep.subr.bf16.mxu1 %v7148_v50 }
 0x3b7   :  { %6888 = vmatpush3.bf16.msra.mxu1 %v7148_v50 }
 0x3ba   :  { %6890 = vmatmul.mubr.msk.bf16.vlgmr.msra.gmra.mrb[16].mxu1 %vm2018_vm2, %v6241_v52 }
 0x3bb   :  { %6893 = vmatprep.mubr.msk.bf16.mxu1 %vm2018_vm2, %v6242_v53 }
 0x3c2   :  { %6894 = vmatmul.mubr.msk.bf16.gmra.mrb[52].mxu1 %vm2018_vm2, %v7150_v54 }
 0x415   :  { %v6767_v55 = vpop.f32.mrb[20].mxu1 }
 0x416   :  { %v3354_v56 = vpop.f32.mrb[21].mxu1 }
 0x417   :  { %v6768_v57 = vpop.f32.mrb[22].mxu1 }
 0x418   :  { %v3357_v58 = vpop.f32.mrb[23].mxu1 }
 0x425   :  { %v6783_v60 = vpop.f32.mrb[24].mxu1 }
 0x426   :  { %v3467_v61 = vadd.f32 %v6783_v60, %v6767_v55  ;;  %v3458_v62 = vpop.f32.mrb[25].mxu1 }
 0x427   :  { %v3459_v63 = vadd.f32 %v3458_v62, %v3354_v56  ;;  %v6784_v0 = vpop.f32.mrb[26].mxu1 }
 0x428   :  { %v3461_v1 = vpop.f32.mrb[27].mxu1 }
 0x429   :  { %v3462_v2 = vadd.f32 %v3461_v1, %v3357_v58 }
 0x435   :  { %v6799_v59 = vpop.f32.mrb[28].mxu1 }
 0x436   :  { %v3601_v3 = vadd.f32 %v6799_v59, %v3467_v61  ;;  %v3581_v4 = vpop.f32.mrb[29].mxu1 }
 0x437   :  { %v3599_v5 = vadd.f32 %v3581_v4, %v3459_v63  ;;  %v6800_v6 = vpop.f32.mrb[30].mxu1 }
 0x438   :  { %v3584_v8 = vpop.f32.mrb[31].mxu1 }
 0x439   :  { %v3600_v9 = vadd.f32 %v3584_v8, %v3462_v2 }
 0x445   :  { %v6815_v32 = vpop.f32.mrb[32].mxu1 }
 0x446   :  { %v3751_v11 = vadd.f32 %v6815_v32, %v3601_v3  ;;  %v3731_v13 = vpop.f32.mrb[33].mxu1 }
 0x447   :  { %v3749_v14 = vadd.f32 %v3731_v13, %v3599_v5  ;;  %v6816_v15 = vpop.f32.mrb[34].mxu1 }
 0x448   :  { %v3734_v16 = vpop.f32.mrb[35].mxu1 }
 0x449   :  { %v3750_v17 = vadd.f32 %v3734_v16, %v3600_v9 }
 0x455   :  { %v6831_v18 = vpop.f32.mrb[36].mxu1 }
 0x456   :  { %v3873_v19 = vadd.f32 %v6831_v18, %v3751_v11  ;;  %v3853_v22 = vpop.f32.mrb[37].mxu1 }
 0x457   :  { %v3871_v29 = vadd.f32 %v3853_v22, %v3749_v14  ;;  %v6832_v24 = vpop.f32.mrb[38].mxu1 }
 0x458   :  { %v3856_v25 = vpop.f32.mrb[39].mxu1 }
 0x459   :  { %v3872_v26 = vadd.f32 %v3856_v25, %v3750_v17 }
 0x465   :  { %v6847_v28 = vpop.f32.mrb[40].mxu1 }
 0x466   :  { %v4023_v31 = vadd.f32 %v6847_v28, %v3873_v19  ;;  %v4003_v34 = vpop.f32.mrb[41].mxu1 }
 0x467   :  { %v4021_v35 = vadd.f32 %v4003_v34, %v3871_v29  ;;  %v6848_v36 = vpop.f32.mrb[42].mxu1 }
 0x468   :  { %v4006_v37 = vpop.f32.mrb[43].mxu1 }
 0x469   :  { %v4022_v38 = vadd.f32 %v4006_v37, %v3872_v26 }
 0x475   :  { %v6863_v12 = vpop.f32.mrb[44].mxu1 }
 0x476   :  { %v4173_v39 = vadd.f32 %v6863_v12, %v4023_v31  ;;  %v4153_v40 = vpop.f32.mrb[45].mxu1 }
 0x477   :  { %v4171_v41 = vadd.f32 %v4153_v40, %v4021_v35  ;;  %v6864_v43 = vpop.f32.mrb[46].mxu1 }
 0x478   :  { %v4156_v44 = vpop.f32.mrb[47].mxu1 }
 0x479   :  { %v4172_v47 = vadd.f32 %v4156_v44, %v4022_v38 }
 0x485   :  { %v6879_v49 = vpop.f32.mrb[48].mxu1 }
 0x486   :  { %v4303_v50 = vadd.f32 %v6879_v49, %v4173_v39  ;;  %v4283_v46 = vpop.f32.mrb[49].mxu1 }
 0x487   :  { %v4301_v52 = vadd.f32 %v4283_v46, %v4171_v41  ;;  %v6880_v53 = vpop.f32.mrb[50].mxu1 }
 0x488   :  { %v4286_v54 = vpop.f32.mrb[51].mxu1 }
 0x489   :  { %v4302_v55 = vadd.f32 %v4286_v54, %v4172_v47 }
 0x48d   :  { %v6891_v56 = vpop.f32.mrb[16].mxu1 }
 0x48e   :  { %v4428_v57 = vadd.f32 %v6891_v56, %v8284_v23  ;;  %v4389_v58 = vpop.f32.mrb[17].mxu1 }
 0x48f   :  { %v4426_v60 = vadd.f32 %v4389_v58, %v8284_v23  ;;  %v6892_v61 = vpop.f32.mrb[18].mxu1 }
 0x490   :  { %v4435_v62 = vmax.f32 %v4428_v57, 0.0  ;;  %v4429_v63 = vadd.f32 %v6892_v61, %v8284_v23  ;;  %v4392_v0 = vpop.f32.mrb[19].mxu1 }
 0x491   :  { %v4433_v1 = vmax.f32 %v4426_v60, 0.0  ;;  %v4427_v2 = vadd.f32 %v4392_v0, %v8284_v23 }
 0x492   :  { %v4442_v59 = vmul.f32 %v4435_v62, %v8335_v48  ;;  %v4436_v3 = vmax.f32 %v4429_v63, 0.0 }
 0x493   :  { %v4440_v4 = vmul.f32 %v4433_v1, %v8331_v33  ;;  %v4434_v5 = vmax.f32 %v4427_v2, 0.0 }
 0x494   :  { %v6336_v6 = vpack.c.bf16 %v4442_v59, %v4442_v59  ;;  %v4443_v8 = vmul.f32 %v4436_v3, %v8345_v10 }
 0x495   :  { %v6334_v9 = vpack.c.bf16 %v4440_v4, %v4440_v4  ;;  %v4441_v32 = vmul.f32 %v4434_v5, %v8337_v51  ;;  %v6895_v11 = vpop.f32.mrb[52].mxu1 }
 0x496   :  { %4478 = vst.msk [vmem:[#allocation2 + $0x10] sm:$0xf] %vm1360_vm0, %v6336_v6  ;;  %v6337_v13 = vpack.c.bf16 %v4443_v8, %v4443_v8  ;;  %v4425_v14 = vadd.f32 %v6895_v11, %v4303_v50  ;;  %v4405_v15 = vpop.f32.mrb[53].mxu1 }
 0x497   :  { %4476 = vst.msk [vmem:[#allocation2 + $0x8] sm:$0xf] %vm1360_vm0, %v6334_v9  ;;  %v6335_v16 = vpack.c.bf16 %v4441_v32, %v4441_v32  ;;  %v4423_v48 = vadd.f32 %v4405_v15, %v4301_v52  ;;  %v6896_v17 = vpop.f32.mrb[54].mxu1 }
 0x498   :  { %4479 = vst.msk [vmem:[#allocation2 + $0x14] sm:$0xf] %vm1360_vm0, %v6337_v13  ;;  %v4432_v33 = vadd.f32 %v4425_v14, %v8284_v23  ;;  %v4408_v18 = vpop.f32.mrb[55].mxu1 }
 0x499   :  { %4477 = vst.msk [vmem:[#allocation2 + $0xc] sm:$0xf] %vm1360_vm0, %v6335_v16  ;;  %v4430_v51 = vadd.f32 %v4423_v48, %v8284_v23  ;;  %v4424_v10 = vadd.f32 %v4408_v18, %v4302_v55 }
 0x49a   :  { %v4439_v19 = vmax.f32 %v4432_v33, 0.0 }
 0x49b   :  { %v4437_v22 = vmax.f32 %v4430_v51, 0.0  ;;  %v4431_v29 = vadd.f32 %v4424_v10, %v8284_v23 }
 0x49c   :  { %v4446_v24 = vmul.f32 %v4439_v19, %v8372_v7 }
 0x49d   :  { %v4444_v25 = vmul.f32 %v4437_v22, %v8355_v42  ;;  %v4438_v26 = vmax.f32 %v4431_v29, 0.0 }
 0x49e   :  { %v6340_v28 = vpack.c.bf16 %v4446_v24, %v4446_v24 }
 0x49f   :  { %v6338_v31 = vpack.c.bf16 %v4444_v25, %v4444_v25  ;;  %v4445_v34 = vmul.f32 %v4438_v26, %v8360_v45 }
 0x4a0   :  { %4482 = vst.msk [vmem:[#allocation2 + $0x20] sm:$0xf] %vm1360_vm0, %v6340_v28 }
 0x4a1   :  { %4480 = vst.msk [vmem:[#allocation2 + $0x18] sm:$0xf] %vm1360_vm0, %v6338_v31  ;;  %v6339_v35 = vpack.c.bf16 %v4445_v34, %v4445_v34 }
 0x4a3   :  { %4481 = vst.msk [vmem:[#allocation2 + $0x1c] sm:$0xf] %vm1360_vm0, %v6339_v35 }
 0x4a4   :  { %7216 = dma.done.wait [#allocation4], 20480 }
 0x4a5   :  { %7217 = vsyncadd [#allocation4], 4294946816  ;;  %4560 = vmatprep.mubr.bf16.mxu0 %v7220_v27  ;;  %4601 = vmatprep.mubr.bf16.mxu1 %v7220_v27  ;;  %v4506_v23 = vld [vmem:[#allocation3 + $0x88] sm:$0xff]  ;;  %v4508_v42 = vld [vmem:[#allocation3 + $0x98] sm:$0xff]  ;;  %s7221_s19 = smov [#allocation5]   ;;  %vm5950_vm5 = vcmask 9216  }
 0x4a6   :  { %v4505_v7 = vld [vmem:[#allocation3 + $0x80] sm:$0xff]  ;;  %4528 = vmatprep.subr.bf16.mxu0 %v4506_v23  ;;  %4569 = vmatprep.subr.bf16.mxu1 %v4508_v42  ;;  %v4507_v36 = vld [vmem:[#allocation3 + $0x90] sm:$0xff]  ;;  %v4510_v45 = vld [vmem:[#allocation3 + $0xa8] sm:$0xff]  ;;  %s5958_s3 = sshll.u32 %s7221_s19, 4  ;;  %s5959_s3 = int_to_ptr.vmem [resolvable:$true] %s5958_s3 }
 0x4a7   :  { %v4512_v37 = vld [vmem:[#allocation3 + $0xb8] sm:$0xff]  ;;  %4529 = vmatpush1.bf16.msra.mxu0 %v4505_v7  ;;  %4570 = vmatpush1.bf16.msra.mxu1 %v4507_v36  ;;  %v4509_v38 = vld [vmem:[#allocation3 + $0xa0] sm:$0xff]  ;;  %v4511_v12 = vld [vmem:[#allocation3 + $0xb0] sm:$0xff]  ;;  %p7199_p1 = scmp.lt.s32.totalorder %s5959_s3, %s5959_s3 }
 0x4a8   :  { %4530 = vmatprep.subr.bf16.mxu0 %v4510_v45  ;;  %4571 = vmatprep.subr.bf16.mxu1 %v4512_v37  ;;  %v4514_v39 = vld [vmem:[#allocation3 + $0xc8] sm:$0xff]  ;;  %v4516_v40 = vld [vmem:[#allocation3 + $0xd8] sm:$0xff]  ;;  %v4513_v41 = vld [vmem:[#allocation3 + $0xc0] sm:$0xff] }
 0x4a9   :  { %v4515_v43 = vld [vmem:[#allocation3 + $0xd0] sm:$0xff]  ;;  %v4518_v44 = vld [vmem:[#allocation3 + $0xe8] sm:$0xff]  ;;  %v4520_v47 = vld [vmem:[#allocation3 + $0xf8] sm:$0xff] }
 0x4aa   :  { %v7151_v49 = vld [vmem:[#allocation2 + $0x10] ss:$0 sps:$4 sm:$0x22]   ;;  %v4519_v46 = vld [vmem:[#allocation3 + $0xf0] sm:$0xff]  ;;  %v4489_v52 = vld [vmem:[#allocation3 + $0x8] sm:$0xff] }
 0x4ab   :  { %4531 = vmatpush1.bf16.msra.mxu0 %v4509_v38  ;;  %4572 = vmatpush1.bf16.msra.mxu1 %v4511_v12  ;;  %v4517_v50 = vld [vmem:[#allocation3 + $0xe0] sm:$0xff]  ;;  %v4491_v53 = vld [vmem:[#allocation3 + $0x18] sm:$0xff]  ;;  %v4524_v54 = vrot.slane %v7151_v49, 1  ;;  %v4490_v56 = vld [vmem:[#allocation3 + $0x10] sm:$0xff] }
 0x4ac   :  { %4532 = vmatprep.subr.bf16.mxu0 %v4514_v39  ;;  %4573 = vmatprep.subr.bf16.mxu1 %v4516_v40  ;;  %v4488_v55 = vld [vmem:[#allocation3] sm:$0xff]  ;;  %v4493_v57 = vld [vmem:[#allocation3 + $0x28] sm:$0xff]  ;;  %v4495_v58 = vld [vmem:[#allocation3 + $0x38] sm:$0xff] }
 0x4ad   :  { %v4492_v60 = vld [vmem:[#allocation3 + $0x20] sm:$0xff]  ;;  %v4494_v61 = vld [vmem:[#allocation3 + $0x30] sm:$0xff]  ;;  %v4497_v62 = vld [vmem:[#allocation3 + $0x48] sm:$0xff] }
 0x4ae   :  { %v4499_v63 = vld [vmem:[#allocation3 + $0x58] sm:$0xff]  ;;  %v4496_v0 = vld [vmem:[#allocation3 + $0x40] sm:$0xff]  ;;  %v4498_v1 = vld [vmem:[#allocation3 + $0x50] sm:$0xff] }
 0x4af   :  { %4533 = vmatpush1.bf16.msra.mxu0 %v4513_v41  ;;  %4574 = vmatpush1.bf16.msra.mxu1 %v4515_v43  ;;  %v4501_v2 = vld [vmem:[#allocation3 + $0x68] sm:$0xff]  ;;  %v4503_v59 = vld [vmem:[#allocation3 + $0x78] sm:$0xff]  ;;  %v4500_v3 = vld [vmem:[#allocation3 + $0x60] sm:$0xff] }
 0x4b0   :  { %4534 = vmatprep.subr.bf16.mxu0 %v4518_v44  ;;  %4575 = vmatprep.subr.bf16.mxu1 %v4520_v47  ;;  %v4502_v4 = vld [vmem:[#allocation3 + $0x70] sm:$0xff]  ;;  %v4697_v5 = vld [vmem:[#allocation3 + $0x108] sm:$0xff]  ;;  %v4699_v6 = vld [vmem:[#allocation3 + $0x118] sm:$0xff] }
 0x4b1   :  { %v4487_v8 = vld [vmem:[#allocation2 + $0x10] sm:$0x1]  ;;  %v4698_v32 = vld [vmem:[#allocation3 + $0x110] sm:$0xff]  ;;  %v4701_v11 = vld [vmem:[#allocation3 + $0x128] sm:$0xff] }
 0x4b2   :  { %v4696_v9 = vld [vmem:[#allocation3 + $0x100] sm:$0xff]  ;;  %v4703_v13 = vld [vmem:[#allocation3 + $0x138] sm:$0xff]  ;;  %v4702_v15 = vld [vmem:[#allocation3 + $0x130] sm:$0xff] }
 0x4b3   :  { %4535 = vmatpush1.bf16.msra.mxu0 %v4517_v50  ;;  %4576 = vmatpush1.bf16.msra.mxu1 %v4519_v46  ;;  %v4700_v14 = vld [vmem:[#allocation3 + $0x120] sm:$0xff]  ;;  %v4705_v16 = vld [vmem:[#allocation3 + $0x148] sm:$0xff]  ;;  %v4707_v48 = vld [vmem:[#allocation3 + $0x158] sm:$0xff] }
 0x4b4   :  { %4613 = vmatprep.subr.bf16.mxu0 %v4489_v52  ;;  %4654 = vmatprep.subr.bf16.mxu1 %v4491_v53  ;;  %v4704_v17 = vld [vmem:[#allocation3 + $0x140] sm:$0xff]  ;;  %v4706_v33 = vld [vmem:[#allocation3 + $0x150] sm:$0xff]  ;;  %v4709_v18 = vld [vmem:[#allocation3 + $0x168] sm:$0xff] }
 0x4b5   :  { %v4711_v51 = vld [vmem:[#allocation3 + $0x178] sm:$0xff]  ;;  %v7152_v10 = vld [vmem:[#allocation2 + $0x10] ss:$0 sps:$4 sm:$0x44]   ;;  %v4710_v22 = vld [vmem:[#allocation3 + $0x170] sm:$0xff] }
 0x4b6   :  { %6260 = vmatmul.mubr.msk.bf16.vlgmr.msra.gmra.mrb[56].mxu0 %vm2018_vm2, %v4524_v54  ;;  %6261 = vmatmul.mubr.msk.bf16.vlgmr.msra.gmra.mrb[56].mxu1 %vm2018_vm2, %v4524_v54  ;;  %v4708_v19 = vld [vmem:[#allocation3 + $0x160] sm:$0xff]  ;;  %v4807_v29 = vld [vmem:[#allocation3 + $0x188] sm:$0xff]  ;;  %v4809_v24 = vld [vmem:[#allocation3 + $0x198] sm:$0xff]  ;;  %v4715_v25 = vrot.slane %v7152_v10, 2 }
 0x4b7   :  { %4614 = vmatpush1.bf16.msra.mxu0 %v4488_v55  ;;  %4655 = vmatpush1.bf16.msra.mxu1 %v4490_v56  ;;  %v4806_v26 = vld [vmem:[#allocation3 + $0x180] sm:$0xff]  ;;  %v4808_v28 = vld [vmem:[#allocation3 + $0x190] sm:$0xff]  ;;  %v4811_v31 = vld [vmem:[#allocation3 + $0x1a8] sm:$0xff] }
 0x4b8   :  { %4615 = vmatprep.subr.bf16.mxu0 %v4493_v57  ;;  %4656 = vmatprep.subr.bf16.mxu1 %v4495_v58  ;;  %v4813_v34 = vld [vmem:[#allocation3 + $0x1b8] sm:$0xff]  ;;  %v4810_v35 = vld [vmem:[#allocation3 + $0x1a0] sm:$0xff]  ;;  %v4812_v23 = vld [vmem:[#allocation3 + $0x1b0] sm:$0xff] }
 0x4b9   :  { %4645 = vmatprep.mubr.bf16.mxu0 %v7220_v27  ;;  %4686 = vmatprep.mubr.bf16.mxu1 %v7220_v27  ;;  %v4815_v42 = vld [vmem:[#allocation3 + $0x1c8] sm:$0xff]  ;;  %v4817_v7 = vld [vmem:[#allocation3 + $0x1d8] sm:$0xff]  ;;  %v4814_v36 = vld [vmem:[#allocation3 + $0x1c0] sm:$0xff] }
 0x4ba   :  { %v4816_v45 = vld [vmem:[#allocation3 + $0x1d0] sm:$0xff]  ;;  %v4819_v37 = vld [vmem:[#allocation3 + $0x1e8] sm:$0xff]  ;;  %v4821_v38 = vld [vmem:[#allocation3 + $0x1f8] sm:$0xff] }
 0x4bb   :  { %4616 = vmatpush1.bf16.msra.mxu0 %v4492_v60  ;;  %4657 = vmatpush1.bf16.msra.mxu1 %v4494_v61  ;;  %v7153_v12 = vld [vmem:[#allocation2 + $0x10] ss:$0 sps:$4 sm:$0x88]   ;;  %v4820_v40 = vld [vmem:[#allocation3 + $0x1f0] sm:$0xff]  ;;  %v4917_v41 = vld [vmem:[#allocation3 + $0x208] sm:$0xff] }
 0x4bc   :  { %4617 = vmatprep.subr.bf16.mxu0 %v4497_v62  ;;  %4658 = vmatprep.subr.bf16.mxu1 %v4499_v63  ;;  %v4818_v39 = vld [vmem:[#allocation3 + $0x1e0] sm:$0xff]  ;;  %v4825_v43 = vrot.slane %v7153_v12, 3  ;;  %v4919_v44 = vld [vmem:[#allocation3 + $0x218] sm:$0xff]  ;;  %v4918_v49 = vld [vmem:[#allocation3 + $0x210] sm:$0xff] }
 0x4bd   :  { %v4916_v47 = vld [vmem:[#allocation3 + $0x200] sm:$0xff]  ;;  %v4921_v50 = vld [vmem:[#allocation3 + $0x228] sm:$0xff]  ;;  %v4923_v46 = vld [vmem:[#allocation3 + $0x238] sm:$0xff] }
 0x4be   :  { %v4920_v52 = vld [vmem:[#allocation3 + $0x220] sm:$0xff]  ;;  %v4922_v53 = vld [vmem:[#allocation3 + $0x230] sm:$0xff]  ;;  %v4925_v54 = vld [vmem:[#allocation3 + $0x248] sm:$0xff] }
 0x4bf   :  { %4618 = vmatpush1.bf16.msra.mxu0 %v4496_v0  ;;  %4659 = vmatpush1.bf16.msra.mxu1 %v4498_v1  ;;  %v4927_v55 = vld [vmem:[#allocation3 + $0x258] sm:$0xff]  ;;  %v4924_v56 = vld [vmem:[#allocation3 + $0x240] sm:$0xff]  ;;  %v4926_v57 = vld [vmem:[#allocation3 + $0x250] sm:$0xff] }
 0x4c0   :  { %4619 = vmatprep.subr.bf16.mxu0 %v4501_v2  ;;  %4660 = vmatprep.subr.bf16.mxu1 %v4503_v59  ;;  %v4929_v58 = vld [vmem:[#allocation3 + $0x268] sm:$0xff]  ;;  %v4931_v60 = vld [vmem:[#allocation3 + $0x278] sm:$0xff]  ;;  %v4928_v61 = vld [vmem:[#allocation3 + $0x260] sm:$0xff] }
 0x4c1   :  { %v4930_v62 = vld [vmem:[#allocation3 + $0x270] sm:$0xff]  ;;  %v5023_v63 = vld [vmem:[#allocation3 + $0x288] sm:$0xff]  ;;  %v5025_v0 = vld [vmem:[#allocation3 + $0x298] sm:$0xff] }
 0x4c2   :  { %v4915_v1 = vld [vmem:[#allocation2 + $0x14] sm:$0x1]  ;;  %v5022_v2 = vld [vmem:[#allocation3 + $0x280] sm:$0xff]  ;;  %v5024_v59 = vld [vmem:[#allocation3 + $0x290] sm:$0xff] }
 0x4c3   :  { %4620 = vmatpush1.bf16.msra.mxu0 %v4500_v3  ;;  %4661 = vmatpush1.bf16.msra.mxu1 %v4502_v4  ;;  %v5027_v3 = vld [vmem:[#allocation3 + $0x2a8] sm:$0xff]  ;;  %v5029_v4 = vld [vmem:[#allocation3 + $0x2b8] sm:$0xff]  ;;  %v5134_v10 = vld [vmem:[#allocation3 + $0x310] sm:$0xff] }
 0x4c4   :  { %4719 = vmatprep.subr.bf16.mxu0 %v4697_v5  ;;  %4760 = vmatprep.subr.bf16.mxu1 %v4699_v6  ;;  %v5026_v5 = vld [vmem:[#allocation3 + $0x2a0] sm:$0xff]  ;;  %v5028_v6 = vld [vmem:[#allocation3 + $0x2b0] sm:$0xff]  ;;  %v5243_v12 = vld [vmem:[#allocation3 + $0x3a8] sm:$0xff] }
 0x4c6   :  { %6262 = vmatmul.mubr.msk.bf16.vlgmr.msra.gmra.mrb[60].mxu0 %vm2018_vm2, %v4487_v8  ;;  %6263 = vmatmul.mubr.msk.bf16.vlgmr.msra.gmra.mrb[60].mxu1 %vm2018_vm2, %v4487_v8  ;;  %v5031_v8 = vld [vmem:[#allocation3 + $0x2c8] sm:$0xff] }
 0x4c7   :  { %4720 = vmatpush1.bf16.msra.mxu0 %v4696_v9  ;;  %4761 = vmatpush1.bf16.msra.mxu1 %v4698_v32  ;;  %v5033_v9 = vld [vmem:[#allocation3 + $0x2d8] sm:$0xff]  ;;  %v5030_v32 = vld [vmem:[#allocation3 + $0x2c0] sm:$0xff] }
 0x4c8   :  { %4721 = vmatprep.subr.bf16.mxu0 %v4701_v11  ;;  %4762 = vmatprep.subr.bf16.mxu1 %v4703_v13  ;;  %v5032_v11 = vld [vmem:[#allocation3 + $0x2d0] sm:$0xff]  ;;  %v5035_v13 = vld [vmem:[#allocation3 + $0x2e8] sm:$0xff] }
 0x4c9   :  { %4751 = vmatprep.mubr.bf16.mxu0 %v7220_v27  ;;  %4792 = vmatprep.mubr.bf16.mxu1 %v7220_v27 }
 0x4cb   :  { %4722 = vmatpush1.bf16.msra.mxu0 %v4700_v14  ;;  %4763 = vmatpush1.bf16.msra.mxu1 %v4702_v15  ;;  %v5037_v14 = vld [vmem:[#allocation3 + $0x2f8] sm:$0xff]  ;;  %v7154_v15 = vld [vmem:[#allocation2 + $0x14] ss:$0 sps:$4 sm:$0x88]  }
 0x4cc   :  { %4723 = vmatprep.subr.bf16.mxu0 %v4705_v16  ;;  %4764 = vmatprep.subr.bf16.mxu1 %v4707_v48  ;;  %v5034_v16 = vld [vmem:[#allocation3 + $0x2e0] sm:$0xff]  ;;  %v5036_v48 = vld [vmem:[#allocation3 + $0x2f0] sm:$0xff] }
 0x4cf   :  { %4724 = vmatpush1.bf16.msra.mxu0 %v4704_v17  ;;  %4765 = vmatpush1.bf16.msra.mxu1 %v4706_v33  ;;  %v5133_v17 = vld [vmem:[#allocation3 + $0x308] sm:$0xff]  ;;  %v5135_v33 = vld [vmem:[#allocation3 + $0x318] sm:$0xff] }
 0x4d0   :  { %4725 = vmatprep.subr.bf16.mxu0 %v4709_v18  ;;  %4766 = vmatprep.subr.bf16.mxu1 %v4711_v51  ;;  %v5041_v18 = vrot.slane %v7154_v15, 3  ;;  %v5132_v51 = vld [vmem:[#allocation3 + $0x300] sm:$0xff]  ;;  %v5460_v15 = vld [vmem:[#allocation3 + $0x490] sm:$0xff] }
 0x4d3   :  { %4726 = vmatpush1.bf16.msra.mxu0 %v4708_v19  ;;  %4767 = vmatpush1.bf16.msra.mxu1 %v4710_v22  ;;  %v5137_v19 = vld [vmem:[#allocation3 + $0x328] sm:$0xff]  ;;  %v5139_v22 = vld [vmem:[#allocation3 + $0x338] sm:$0xff] }
 0x4d4   :  { %4829 = vmatprep.subr.bf16.mxu0 %v4807_v29  ;;  %4870 = vmatprep.subr.bf16.mxu1 %v4809_v24  ;;  %v5136_v29 = vld [vmem:[#allocation3 + $0x320] sm:$0xff]  ;;  %v5138_v24 = vld [vmem:[#allocation3 + $0x330] sm:$0xff] }
 0x4d6   :  { %6265 = vmatmul.mubr.msk.bf16.vlgmr.msra.gmra.mrb[64].mxu0 %vm2018_vm2, %v4715_v25  ;;  %6266 = vmatmul.mubr.msk.bf16.vlgmr.msra.gmra.mrb[64].mxu1 %vm2018_vm2, %v4715_v25  ;;  %v5141_v25 = vld [vmem:[#allocation3 + $0x348] sm:$0xff] }
 0x4d7   :  { %4830 = vmatpush1.bf16.msra.mxu0 %v4806_v26  ;;  %4871 = vmatpush1.bf16.msra.mxu1 %v4808_v28  ;;  %v5143_v26 = vld [vmem:[#allocation3 + $0x358] sm:$0xff]  ;;  %v5140_v28 = vld [vmem:[#allocation3 + $0x340] sm:$0xff] }
 0x4d8   :  { %4831 = vmatprep.subr.bf16.mxu0 %v4811_v31  ;;  %4872 = vmatprep.subr.bf16.mxu1 %v4813_v34  ;;  %v5142_v31 = vld [vmem:[#allocation3 + $0x350] sm:$0xff]  ;;  %v5145_v34 = vld [vmem:[#allocation3 + $0x368] sm:$0xff] }
 0x4d9   :  { %4861 = vmatprep.mubr.bf16.mxu0 %v7220_v27  ;;  %4902 = vmatprep.mubr.bf16.mxu1 %v7220_v27 }
 0x4db   :  { %4832 = vmatpush1.bf16.msra.mxu0 %v4810_v35  ;;  %4873 = vmatpush1.bf16.msra.mxu1 %v4812_v23  ;;  %v5147_v35 = vld [vmem:[#allocation3 + $0x378] sm:$0xff]  ;;  %v5144_v23 = vld [vmem:[#allocation3 + $0x360] sm:$0xff] }
 0x4dc   :  { %4833 = vmatprep.subr.bf16.mxu0 %v4815_v42  ;;  %4874 = vmatprep.subr.bf16.mxu1 %v4817_v7  ;;  %v5146_v42 = vld [vmem:[#allocation3 + $0x370] sm:$0xff]  ;;  %v5239_v7 = vld [vmem:[#allocation3 + $0x388] sm:$0xff] }
 0x4df   :  { %4834 = vmatpush1.bf16.msra.mxu0 %v4814_v36  ;;  %4875 = vmatpush1.bf16.msra.mxu1 %v4816_v45  ;;  %v5241_v36 = vld [vmem:[#allocation3 + $0x398] sm:$0xff]  ;;  %v5131_v45 = vld [vmem:[#allocation2 + $0x18] sm:$0x1] }
 0x4e0   :  { %4835 = vmatprep.subr.bf16.mxu0 %v4819_v37  ;;  %4876 = vmatprep.subr.bf16.mxu1 %v4821_v38  ;;  %v5238_v37 = vld [vmem:[#allocation3 + $0x380] sm:$0xff]  ;;  %v5240_v38 = vld [vmem:[#allocation3 + $0x390] sm:$0xff] }
 0x4e3   :  { %4836 = vmatpush1.bf16.msra.mxu0 %v4818_v39  ;;  %4877 = vmatpush1.bf16.msra.mxu1 %v4820_v40  ;;  %v5245_v39 = vld [vmem:[#allocation3 + $0x3b8] sm:$0xff]  ;;  %v5242_v40 = vld [vmem:[#allocation3 + $0x3a0] sm:$0xff] }
 0x4e4   :  { %4935 = vmatprep.subr.bf16.mxu0 %v4917_v41  ;;  %4976 = vmatprep.subr.bf16.mxu1 %v4919_v44  ;;  %v5244_v41 = vld [vmem:[#allocation3 + $0x3b0] sm:$0xff]  ;;  %v5249_v44 = vld [vmem:[#allocation3 + $0x3d8] sm:$0xff] }
 0x4e6   :  { %6268 = vmatmul.mubr.msk.bf16.vlgmr.msra.gmra.mrb[68].mxu0 %vm2018_vm2, %v4825_v43  ;;  %6269 = vmatmul.mubr.msk.bf16.vlgmr.msra.gmra.mrb[68].mxu1 %vm2018_vm2, %v4825_v43  ;;  %v5247_v43 = vld [vmem:[#allocation3 + $0x3c8] sm:$0xff] }
 0x4e7   :  { %4936 = vmatpush1.bf16.msra.mxu0 %v4916_v47  ;;  %4977 = vmatpush1.bf16.msra.mxu1 %v4918_v49  ;;  %v5246_v47 = vld [vmem:[#allocation3 + $0x3c0] sm:$0xff]  ;;  %v5248_v49 = vld [vmem:[#allocation3 + $0x3d0] sm:$0xff] }
 0x4e8   :  { %4937 = vmatprep.subr.bf16.mxu0 %v4921_v50  ;;  %4978 = vmatprep.subr.bf16.mxu1 %v4923_v46  ;;  %v5251_v50 = vld [vmem:[#allocation3 + $0x3e8] sm:$0xff]  ;;  %v5253_v46 = vld [vmem:[#allocation3 + $0x3f8] sm:$0xff] }
 0x4e9   :  { %4967 = vmatprep.mubr.bf16.mxu0 %v7220_v27  ;;  %5008 = vmatprep.mubr.bf16.mxu1 %v7220_v27 }
 0x4eb   :  { %4938 = vmatpush1.bf16.msra.mxu0 %v4920_v52  ;;  %4979 = vmatpush1.bf16.msra.mxu1 %v4922_v53  ;;  %v7155_v52 = vld [vmem:[#allocation2 + $0x18] ss:$0 sps:$4 sm:$0x22]   ;;  %v5250_v53 = vld [vmem:[#allocation3 + $0x3e0] sm:$0xff] }
 0x4ec   :  { %4939 = vmatprep.subr.bf16.mxu0 %v4925_v54  ;;  %4980 = vmatprep.subr.bf16.mxu1 %v4927_v55  ;;  %v5252_v54 = vld [vmem:[#allocation3 + $0x3f0] sm:$0xff]  ;;  %v5349_v55 = vld [vmem:[#allocation3 + $0x408] sm:$0xff] }
 0x4ef   :  { %4940 = vmatpush1.bf16.msra.mxu0 %v4924_v56  ;;  %4981 = vmatpush1.bf16.msra.mxu1 %v4926_v57  ;;  %v5351_v56 = vld [vmem:[#allocation3 + $0x418] sm:$0xff]  ;;  %v5257_v57 = vrot.slane %v7155_v52, 1  ;;  %v7171_v52 = vld [vmem:[%s8953_s7 + $0xd8] sm:$0xff]  }
 0x4f0   :  { %4941 = vmatprep.subr.bf16.mxu0 %v4929_v58  ;;  %4982 = vmatprep.subr.bf16.mxu1 %v4931_v60  ;;  %v5348_v58 = vld [vmem:[#allocation3 + $0x400] sm:$0xff]  ;;  %v5350_v60 = vld [vmem:[#allocation3 + $0x410] sm:$0xff] }
 0x4f3   :  { %4942 = vmatpush1.bf16.msra.mxu0 %v4928_v61  ;;  %4983 = vmatpush1.bf16.msra.mxu1 %v4930_v62  ;;  %v5353_v61 = vld [vmem:[#allocation3 + $0x428] sm:$0xff]  ;;  %v5355_v62 = vld [vmem:[#allocation3 + $0x438] sm:$0xff] }
 0x4f4   :  { %5045 = vmatprep.subr.bf16.mxu0 %v5023_v63  ;;  %5086 = vmatprep.subr.bf16.mxu1 %v5025_v0  ;;  %v5352_v63 = vld [vmem:[#allocation3 + $0x420] sm:$0xff]  ;;  %v5354_v0 = vld [vmem:[#allocation3 + $0x430] sm:$0xff] }
 0x4f6   :  { %6270 = vmatmul.mubr.msk.bf16.vlgmr.msra.gmra.mrb[72].mxu0 %vm2018_vm2, %v4915_v1  ;;  %6271 = vmatmul.mubr.msk.bf16.vlgmr.msra.gmra.mrb[72].mxu1 %vm2018_vm2, %v4915_v1  ;;  %v5357_v1 = vld [vmem:[#allocation3 + $0x448] sm:$0xff] }
 0x4f7   :  { %5046 = vmatpush1.bf16.msra.mxu0 %v5022_v2  ;;  %5087 = vmatpush1.bf16.msra.mxu1 %v5024_v59  ;;  %v5359_v2 = vld [vmem:[#allocation3 + $0x458] sm:$0xff]  ;;  %v5356_v59 = vld [vmem:[#allocation3 + $0x440] sm:$0xff] }
 0x4f8   :  { %5047 = vmatprep.subr.bf16.mxu0 %v5027_v3  ;;  %5088 = vmatprep.subr.bf16.mxu1 %v5029_v4  ;;  %v5358_v3 = vld [vmem:[#allocation3 + $0x450] sm:$0xff]  ;;  %v5361_v4 = vld [vmem:[#allocation3 + $0x468] sm:$0xff] }
 0x4f9   :  { %5077 = vmatprep.mubr.bf16.mxu0 %v7220_v27  ;;  %5118 = vmatprep.mubr.bf16.mxu1 %v7220_v27 }
 0x4fb   :  { %5048 = vmatpush1.bf16.msra.mxu0 %v5026_v5  ;;  %5089 = vmatpush1.bf16.msra.mxu1 %v5028_v6  ;;  %v5363_v5 = vld [vmem:[#allocation3 + $0x478] sm:$0xff]  ;;  %v7156_v6 = vld [vmem:[#allocation2 + $0x18] ss:$0 sps:$4 sm:$0x44]  }
 0x4fc   :  { %5049 = vmatprep.subr.bf16.mxu0 %v5031_v8  ;;  %5090 = vmatprep.subr.bf16.mxu1 %v5033_v9  ;;  %v5360_v8 = vld [vmem:[#allocation3 + $0x460] sm:$0xff]  ;;  %v5362_v9 = vld [vmem:[#allocation3 + $0x470] sm:$0xff] }
 0x4ff   :  { %5050 = vmatpush1.bf16.msra.mxu0 %v5030_v32  ;;  %5091 = vmatpush1.bf16.msra.mxu1 %v5032_v11  ;;  %v5459_v32 = vld [vmem:[#allocation3 + $0x488] sm:$0xff]  ;;  %v5461_v11 = vld [vmem:[#allocation3 + $0x498] sm:$0xff] }
 0x500   :  { %5051 = vmatprep.subr.bf16.mxu0 %v5035_v13  ;;  %5092 = vmatprep.subr.bf16.mxu1 %v5037_v14  ;;  %v5367_v13 = vrot.slane %v7156_v6, 2  ;;  %v5458_v14 = vld [vmem:[#allocation3 + $0x480] sm:$0xff] }
 0x501   :  { %v7183_v6 = vld [vmem:[%s8953_s7 + $0xf0] sm:$0xff]  }
 0x503   :  { %5052 = vmatpush1.bf16.msra.mxu0 %v5034_v16  ;;  %5093 = vmatpush1.bf16.msra.mxu1 %v5036_v48  ;;  %v5463_v16 = vld [vmem:[#allocation3 + $0x4a8] sm:$0xff]  ;;  %v5465_v48 = vld [vmem:[#allocation3 + $0x4b8] sm:$0xff] }
 0x504   :  { %5151 = vmatprep.subr.bf16.mxu0 %v5133_v17  ;;  %5192 = vmatprep.subr.bf16.mxu1 %v5135_v33  ;;  %v5462_v17 = vld [vmem:[#allocation3 + $0x4a0] sm:$0xff]  ;;  %v5464_v33 = vld [vmem:[#allocation3 + $0x4b0] sm:$0xff] }
 0x506   :  { %6273 = vmatmul.mubr.msk.bf16.vlgmr.msra.gmra.mrb[76].mxu0 %vm2018_vm2, %v5041_v18  ;;  %6274 = vmatmul.mubr.msk.bf16.vlgmr.msra.gmra.mrb[76].mxu1 %vm2018_vm2, %v5041_v18  ;;  %v5467_v18 = vld [vmem:[#allocation3 + $0x4c8] sm:$0xff] }
 0x507   :  { %5152 = vmatpush1.bf16.msra.mxu0 %v5132_v51  ;;  %5193 = vmatpush1.bf16.msra.mxu1 %v5134_v10  ;;  %v5469_v51 = vld [vmem:[#allocation3 + $0x4d8] sm:$0xff]  ;;  %v5466_v10 = vld [vmem:[#allocation3 + $0x4c0] sm:$0xff] }
 0x508   :  { %5153 = vmatprep.subr.bf16.mxu0 %v5137_v19  ;;  %5194 = vmatprep.subr.bf16.mxu1 %v5139_v22  ;;  %v5468_v19 = vld [vmem:[#allocation3 + $0x4d0] sm:$0xff]  ;;  %v5471_v22 = vld [vmem:[#allocation3 + $0x4e8] sm:$0xff] }
 0x509   :  { %5183 = vmatprep.mubr.bf16.mxu0 %v7220_v27  ;;  %5224 = vmatprep.mubr.bf16.mxu1 %v7220_v27 }
 0x50b   :  { %5154 = vmatpush1.bf16.msra.mxu0 %v5136_v29  ;;  %5195 = vmatpush1.bf16.msra.mxu1 %v5138_v24  ;;  %v5473_v29 = vld [vmem:[#allocation3 + $0x4f8] sm:$0xff]  ;;  %v7157_v24 = vld [vmem:[#allocation2 + $0x18] ss:$0 sps:$4 sm:$0x88]  }
 0x50c   :  { %5155 = vmatprep.subr.bf16.mxu0 %v5141_v25  ;;  %5196 = vmatprep.subr.bf16.mxu1 %v5143_v26  ;;  %v5470_v25 = vld [vmem:[#allocation3 + $0x4e0] sm:$0xff]  ;;  %v5472_v26 = vld [vmem:[#allocation3 + $0x4f0] sm:$0xff] }
 0x50f   :  { %5156 = vmatpush1.bf16.msra.mxu0 %v5140_v28  ;;  %5197 = vmatpush1.bf16.msra.mxu1 %v5142_v31  ;;  %v5477_v28 = vrot.slane %v7157_v24, 3  ;;  %v7159_v31 = vld [vmem:[%s8953_s7 + $0xc0] sm:$0xff]  }
 0x510   :  { %5157 = vmatprep.subr.bf16.mxu0 %v5145_v34  ;;  %5198 = vmatprep.subr.bf16.mxu1 %v5147_v35  ;;  %v7160_v34 = vld [vmem:[%s8953_s7] sm:$0xff]  }
 0x511   :  { %v7161_v35 = vld [vmem:[%s8953_s7 + $0x80] sm:$0xff]  }
 0x513   :  { %5158 = vmatpush1.bf16.msra.mxu0 %v5144_v23  ;;  %5199 = vmatpush1.bf16.msra.mxu1 %v5146_v42  ;;  %v7162_v23 = vld [vmem:[%s8953_s7 + $0x48] sm:$0xff]  }
 0x514   :  { %5261 = vmatprep.subr.bf16.mxu0 %v5239_v7  ;;  %5302 = vmatprep.subr.bf16.mxu1 %v5241_v36  ;;  %v7163_v42 = vld [vmem:[%s8953_s7 + $0xc8] sm:$0xff]  }
 0x515   :  { %v7164_v7 = vld [vmem:[%s8953_s7 + $0x8] sm:$0xff]  }
 0x516   :  { %6275 = vmatmul.mubr.msk.bf16.vlgmr.msra.gmra.mrb[80].mxu0 %vm2018_vm2, %v5131_v45  ;;  %6276 = vmatmul.mubr.msk.bf16.vlgmr.msra.gmra.mrb[80].mxu1 %vm2018_vm2, %v5131_v45  ;;  %v7165_v36 = vld [vmem:[%s8953_s7 + $0x88] sm:$0xff]  }
 0x517   :  { %5262 = vmatpush1.bf16.msra.mxu0 %v5238_v37  ;;  %5303 = vmatpush1.bf16.msra.mxu1 %v5240_v38 }
 0x518   :  { %5263 = vmatprep.subr.bf16.mxu0 %v5243_v12  ;;  %5304 = vmatprep.subr.bf16.mxu1 %v5245_v39  ;;  %v7166_v39 = vld [vmem:[%s8953_s7 + $0x50] sm:$0xff]  }
 0x519   :  { %5293 = vmatprep.mubr.bf16.mxu0 %v7220_v27  ;;  %5334 = vmatprep.mubr.bf16.mxu1 %v7220_v27 }
 0x51b   :  { %5264 = vmatpush1.bf16.msra.mxu0 %v5242_v40  ;;  %5305 = vmatpush1.bf16.msra.mxu1 %v5244_v41  ;;  %v7167_v40 = vld [vmem:[%s8953_s7 + $0xd0] sm:$0xff]  }
 0x51c   :  { %5265 = vmatprep.subr.bf16.mxu0 %v5247_v43  ;;  %5306 = vmatprep.subr.bf16.mxu1 %v5249_v44  ;;  %v7168_v44 = vld [vmem:[%s8953_s7 + $0x10] sm:$0xff]  }
 0x51f   :  { %5266 = vmatpush1.bf16.msra.mxu0 %v5246_v47  ;;  %5307 = vmatpush1.bf16.msra.mxu1 %v5248_v49  ;;  %v7169_v47 = vld [vmem:[%s8953_s7 + $0x90] sm:$0xff]  }
 0x520   :  { %5267 = vmatprep.subr.bf16.mxu0 %v5251_v50  ;;  %5308 = vmatprep.subr.bf16.mxu1 %v5253_v46  ;;  %v7170_v46 = vld [vmem:[%s8953_s7 + $0x58] sm:$0xff]  }
 0x523   :  { %5268 = vmatpush1.bf16.msra.mxu0 %v5250_v53  ;;  %5309 = vmatpush1.bf16.msra.mxu1 %v5252_v54  ;;  %v7172_v53 = vld [vmem:[%s8953_s7 + $0x18] sm:$0xff]  }
 0x524   :  { %5371 = vmatprep.subr.bf16.mxu0 %v5349_v55  ;;  %5412 = vmatprep.subr.bf16.mxu1 %v5351_v56  ;;  %v7173_v54 = vld [vmem:[%s8953_s7 + $0x98] sm:$0xff]   ;;  %v7174_v55 = vld [vmem:[%s8953_s7 + $0x60] sm:$0xff]  }
 0x525   :  { %v7175_v56 = vld [vmem:[%s8953_s7 + $0xe0] sm:$0xff]  }
 0x526   :  { %6278 = vmatmul.mubr.msk.bf16.vlgmr.msra.gmra.mrb[84].mxu0 %vm2018_vm2, %v5257_v57  ;;  %6279 = vmatmul.mubr.msk.bf16.vlgmr.msra.gmra.mrb[84].mxu1 %vm2018_vm2, %v5257_v57  ;;  %v7176_v57 = vld [vmem:[%s8953_s7 + $0x20] sm:$0xff]  }
 0x527   :  { %5372 = vmatpush1.bf16.msra.mxu0 %v5348_v58  ;;  %5413 = vmatpush1.bf16.msra.mxu1 %v5350_v60  ;;  %v7177_v58 = vld [vmem:[%s8953_s7 + $0xa0] sm:$0xff]   ;;  %v7178_v60 = vld [vmem:[%s8953_s7 + $0x68] sm:$0xff]  }
 0x528   :  { %5373 = vmatprep.subr.bf16.mxu0 %v5353_v61  ;;  %5414 = vmatprep.subr.bf16.mxu1 %v5355_v62  ;;  %v7179_v61 = vld [vmem:[%s8953_s7 + $0xe8] sm:$0xff]  }
 0x529   :  { %5403 = vmatprep.mubr.bf16.mxu0 %v7220_v27  ;;  %5444 = vmatprep.mubr.bf16.mxu1 %v7220_v27  ;;  %v7180_v62 = vld [vmem:[%s8953_s7 + $0x28] sm:$0xff]  }
 0x52b   :  { %5374 = vmatpush1.bf16.msra.mxu0 %v5352_v63  ;;  %5415 = vmatpush1.bf16.msra.mxu1 %v5354_v0  ;;  %v7181_v63 = vld [vmem:[%s8953_s7 + $0xa8] sm:$0xff]  }
 0x52c   :  { %5375 = vmatprep.subr.bf16.mxu0 %v5357_v1  ;;  %5416 = vmatprep.subr.bf16.mxu1 %v5359_v2 }
 0x52f   :  { %5376 = vmatpush1.bf16.msra.mxu0 %v5356_v59  ;;  %5417 = vmatpush1.bf16.msra.mxu1 %v5358_v3 }
 0x530   :  { %5377 = vmatprep.subr.bf16.mxu0 %v5361_v4  ;;  %5418 = vmatprep.subr.bf16.mxu1 %v5363_v5  ;;  %v7182_v5 = vld [vmem:[%s8953_s7 + $0x70] sm:$0xff]  }
 0x533   :  { %5378 = vmatpush1.bf16.msra.mxu0 %v5360_v8  ;;  %5419 = vmatpush1.bf16.msra.mxu1 %v5362_v9 }
 0x534   :  { %5481 = vmatprep.subr.bf16.mxu0 %v5459_v32  ;;  %5522 = vmatprep.subr.bf16.mxu1 %v5461_v11 }
 0x536   :  { %6281 = vmatmul.mubr.msk.bf16.vlgmr.msra.gmra.mrb[88].mxu0 %vm2018_vm2, %v5367_v13  ;;  %6282 = vmatmul.mubr.msk.bf16.vlgmr.msra.gmra.mrb[88].mxu1 %vm2018_vm2, %v5367_v13  ;;  %v7184_v13 = vld [vmem:[%s8953_s7 + $0x30] sm:$0xff]  }
 0x537   :  { %5482 = vmatpush1.bf16.msra.mxu0 %v5458_v14  ;;  %5523 = vmatpush1.bf16.msra.mxu1 %v5460_v15  ;;  %v7185_v14 = vld [vmem:[%s8953_s7 + $0xb0] sm:$0xff]  }
 0x538   :  { %5483 = vmatprep.subr.bf16.mxu0 %v5463_v16  ;;  %5524 = vmatprep.subr.bf16.mxu1 %v5465_v48  ;;  %v7186_v48 = vld [vmem:[%s8953_s7 + $0x78] sm:$0xff]  }
 0x539   :  { %5513 = vmatprep.mubr.bf16.mxu0 %v7220_v27  ;;  %5554 = vmatprep.mubr.bf16.mxu1 %v7220_v27  ;;  %v7158_v27 = vld [vmem:[%s8953_s7 + $0x40] sm:$0xff]  }
 0x53b   :  { %5484 = vmatpush1.bf16.msra.mxu0 %v5462_v17  ;;  %5525 = vmatpush1.bf16.msra.mxu1 %v5464_v33  ;;  %v7187_v17 = vld [vmem:[%s8953_s7 + $0xf8] sm:$0xff]  }
 0x53c   :  { %5485 = vmatprep.subr.bf16.mxu0 %v5467_v18  ;;  %5526 = vmatprep.subr.bf16.mxu1 %v5469_v51  ;;  %v7188_v33 = vld [vmem:[%s8953_s7 + $0x38] sm:$0xff]  }
 0x53d   :  { %v7189_v18 = vld [vmem:[%s8953_s7 + $0xb8] sm:$0xff]  }
 0x53f   :  { %5486 = vmatpush1.bf16.msra.mxu0 %v5466_v10  ;;  %5527 = vmatpush1.bf16.msra.mxu1 %v5468_v19 }
 0x540   :  { %5487 = vmatprep.subr.bf16.mxu0 %v5471_v22  ;;  %5528 = vmatprep.subr.bf16.mxu1 %v5473_v29 }
 0x543   :  { %5488 = vmatpush1.bf16.msra.mxu0 %v5470_v25  ;;  %5529 = vmatpush1.bf16.msra.mxu1 %v5472_v26 }
 0x544   :  { %6565 = vmatprep.subr.bf16.mxu0 %v7158_v27  ;;  %6587 = vmatprep.subr.bf16.mxu1 %v7159_v31 }
 0x546   :  { %6284 = vmatmul.mubr.msk.bf16.vlgmr.msra.gmra.mrb[92].mxu0 %vm2018_vm2, %v5477_v28  ;;  %6285 = vmatmul.mubr.msk.bf16.vlgmr.msra.gmra.mrb[92].mxu1 %vm2018_vm2, %v5477_v28 }
 0x547   :  { %6566 = vmatpush3.bf16.msra.mxu0 %v7160_v34  ;;  %6588 = vmatpush3.bf16.msra.mxu1 %v7161_v35 }
 0x548   :  { %6567 = vmatprep.subr.bf16.mxu0 %v7162_v23  ;;  %6589 = vmatprep.subr.bf16.mxu1 %v7163_v42 }
 0x54b   :  { %6568 = vmatpush3.bf16.msra.mxu0 %v7164_v7  ;;  %6590 = vmatpush3.bf16.msra.mxu1 %v7165_v36 }
 0x54c   :  { %6569 = vmatprep.subr.bf16.mxu0 %v7166_v39  ;;  %6591 = vmatprep.subr.bf16.mxu1 %v7167_v40 }
 0x54f   :  { %6570 = vmatpush3.bf16.msra.mxu0 %v7168_v44  ;;  %6592 = vmatpush3.bf16.msra.mxu1 %v7169_v47 }
 0x550   :  { %6571 = vmatprep.subr.bf16.mxu0 %v7170_v46  ;;  %6593 = vmatprep.subr.bf16.mxu1 %v7171_v52 }
 0x553   :  { %6572 = vmatpush3.bf16.msra.mxu0 %v7172_v53  ;;  %6594 = vmatpush3.bf16.msra.mxu1 %v7173_v54 }
 0x554   :  { %6573 = vmatprep.subr.bf16.mxu0 %v7174_v55  ;;  %6595 = vmatprep.subr.bf16.mxu1 %v7175_v56 }
 0x557   :  { %6574 = vmatpush3.bf16.msra.mxu0 %v7176_v57  ;;  %6596 = vmatpush3.bf16.msra.mxu1 %v7177_v58 }
 0x558   :  { %6575 = vmatprep.subr.bf16.mxu0 %v7178_v60  ;;  %6597 = vmatprep.subr.bf16.mxu1 %v7179_v61 }
 0x55b   :  { %6576 = vmatpush3.bf16.msra.mxu0 %v7180_v62  ;;  %6598 = vmatpush3.bf16.msra.mxu1 %v7181_v63 }
 0x55c   :  { %6577 = vmatprep.subr.bf16.mxu0 %v7182_v5  ;;  %6599 = vmatprep.subr.bf16.mxu1 %v7183_v6 }
 0x55f   :  { %6578 = vmatpush3.bf16.msra.mxu0 %v7184_v13  ;;  %6600 = vmatpush3.bf16.msra.mxu1 %v7185_v14 }
 0x560   :  { %6579 = vmatprep.subr.bf16.mxu0 %v7186_v48  ;;  %6601 = vmatprep.subr.bf16.mxu1 %v7187_v17 }
 0x563   :  { %6580 = vmatpush3.bf16.msra.mxu0 %v7188_v33  ;;  %6602 = vmatpush3.bf16.msra.mxu1 %v7189_v18 }
 0x589   :  { %v4562_v45 = vpop.f32.mrb[56].mxu0  ;;  %v4603_v37 = vpop.f32.mrb[56].mxu1 }
 0x58a   :  { %v4564_v38 = vpop.f32.mrb[57].mxu0  ;;  %v4605_v12 = vpop.f32.mrb[57].mxu1 }
 0x58b   :  { %v4566_v41 = vpop.f32.mrb[58].mxu0  ;;  %v4607_v43 = vpop.f32.mrb[58].mxu1 }
 0x58c   :  { %v4567_v49 = vpop.f32.mrb[59].mxu0  ;;  %v4608_v50 = vpop.f32.mrb[59].mxu1 }
 0x599   :  { %v4647_v0 = vpop.f32.mrb[60].mxu0  ;;  %v4688_v1 = vpop.f32.mrb[60].mxu1 }
 0x59a   :  { %v4648_v2 = vadd.f32 %v4647_v0, %v4562_v45  ;;  %v4689_v59 = vadd.f32 %v4688_v1, %v4603_v37  ;;  %v4649_v3 = vpop.f32.mrb[61].mxu0  ;;  %v4690_v4 = vpop.f32.mrb[61].mxu1 }
 0x59b   :  { %v4650_v8 = vadd.f32 %v4649_v3, %v4564_v38  ;;  %v4691_v9 = vadd.f32 %v4690_v4, %v4605_v12  ;;  %v4651_v32 = vpop.f32.mrb[62].mxu0  ;;  %v4692_v11 = vpop.f32.mrb[62].mxu1 }
 0x59c   :  { %v4652_v15 = vpop.f32.mrb[63].mxu0  ;;  %v4693_v16 = vpop.f32.mrb[63].mxu1 }
 0x5a9   :  { %v4753_v51 = vpop.f32.mrb[64].mxu0  ;;  %v4794_v10 = vpop.f32.mrb[64].mxu1 }
 0x5aa   :  { %v4801_v19 = vadd.f32 %v4753_v51, %v4648_v2  ;;  %v4803_v22 = vadd.f32 %v4794_v10, %v4689_v59  ;;  %v4755_v29 = vpop.f32.mrb[65].mxu0  ;;  %v4796_v24 = vpop.f32.mrb[65].mxu1 }
 0x5ab   :  { %v4802_v25 = vadd.f32 %v4755_v29, %v4650_v8  ;;  %v4804_v26 = vadd.f32 %v4796_v24, %v4691_v9  ;;  %v4757_v28 = vpop.f32.mrb[66].mxu0  ;;  %v4798_v27 = vpop.f32.mrb[66].mxu1 }
 0x5ac   :  { %v4758_v31 = vpop.f32.mrb[67].mxu0  ;;  %v4799_v34 = vpop.f32.mrb[67].mxu1 }
 0x5b9   :  { %v4863_v35 = vpop.f32.mrb[68].mxu0  ;;  %v4904_v23 = vpop.f32.mrb[68].mxu1 }
 0x5ba   :  { %v4911_v42 = vadd.f32 %v4863_v35, %v4801_v19  ;;  %v4913_v7 = vadd.f32 %v4904_v23, %v4803_v22  ;;  %v4865_v36 = vpop.f32.mrb[69].mxu0  ;;  %v4906_v45 = vpop.f32.mrb[69].mxu1 }
 0x5bb   :  { %v4912_v37 = vadd.f32 %v4865_v36, %v4802_v25  ;;  %v4914_v38 = vadd.f32 %v4906_v45, %v4804_v26  ;;  %v4867_v12 = vpop.f32.mrb[70].mxu0  ;;  %v4908_v39 = vpop.f32.mrb[70].mxu1 }
 0x5bc   :  { %v4868_v40 = vpop.f32.mrb[71].mxu0  ;;  %v4909_v41 = vpop.f32.mrb[71].mxu1 }
 0x5bd   :  { %v5579_v41 = vsub.s32 2, %v8276_v20 }
 0x5c9   :  { %v4969_v43 = vpop.f32.mrb[72].mxu0  ;;  %v5010_v44 = vpop.f32.mrb[72].mxu1 }
 0x5ca   :  { %v5017_v47 = vadd.f32 %v4969_v43, %v4911_v42  ;;  %v5019_v49 = vadd.f32 %v5010_v44, %v4913_v7  ;;  %v4971_v50 = vpop.f32.mrb[73].mxu0  ;;  %v5012_v46 = vpop.f32.mrb[73].mxu1  ;;  %v5567_v43 = vld [vmem:[%s8952_s6] sm:$0xf]  ;;  %v5583_v44 = vsub.s32 3, %v8276_v20 }
 0x5cb   :  { %v5018_v52 = vadd.f32 %v4971_v50, %v4912_v37  ;;  %v5020_v53 = vadd.f32 %v5012_v46, %v4914_v38  ;;  %v4973_v54 = vpop.f32.mrb[74].mxu0  ;;  %v5014_v55 = vpop.f32.mrb[74].mxu1 }
 0x5cc   :  { %v4974_v56 = vpop.f32.mrb[75].mxu0  ;;  %v5015_v57 = vpop.f32.mrb[75].mxu1 }
 0x5d9   :  { %v5079_v58 = vpop.f32.mrb[76].mxu0  ;;  %v5120_v60 = vpop.f32.mrb[76].mxu1 }
 0x5da   :  { %v5127_v61 = vadd.f32 %v5079_v58, %v5017_v47  ;;  %v5129_v62 = vadd.f32 %v5120_v60, %v5019_v49  ;;  %v5081_v63 = vpop.f32.mrb[77].mxu0  ;;  %v5122_v0 = vpop.f32.mrb[77].mxu1  ;;  %v5572_v47 = vrot.slane %v5567_v43, %v1460_v30  ;;  %v5580_v49 = vrot.slane %v5567_v43, %v5579_v41 }
 0x5db   :  { %v5128_v1 = vadd.f32 %v5081_v63, %v5018_v52  ;;  %v5130_v2 = vadd.f32 %v5122_v0, %v5020_v53  ;;  %v5083_v59 = vpop.f32.mrb[78].mxu0  ;;  %v5124_v3 = vpop.f32.mrb[78].mxu1  ;;  %v5576_v52 = vrot.slane %v5567_v43, %v3157_v21  ;;  %v5584_v53 = vrot.slane %v5567_v43, %v5583_v44 }
 0x5dc   :  { %v5084_v4 = vpop.f32.mrb[79].mxu0  ;;  %v5125_v5 = vpop.f32.mrb[79].mxu1 }
 0x5e9   :  { %v5185_v6 = vpop.f32.mrb[80].mxu0  ;;  %v5226_v8 = vpop.f32.mrb[80].mxu1 }
 0x5ea   :  { %v5233_v9 = vadd.f32 %v5185_v6, %v5127_v61  ;;  %v5235_v32 = vadd.f32 %v5226_v8, %v5129_v62  ;;  %v5187_v11 = vpop.f32.mrb[81].mxu0  ;;  %v5228_v13 = vpop.f32.mrb[81].mxu1 }
 0x5eb   :  { %v5234_v14 = vadd.f32 %v5187_v11, %v5128_v1  ;;  %v5236_v15 = vadd.f32 %v5228_v13, %v5130_v2  ;;  %v5189_v16 = vpop.f32.mrb[82].mxu0  ;;  %v5230_v48 = vpop.f32.mrb[82].mxu1  ;;  %v6286_v13 = vld [vmem:[%s8954_s8] ss:$0 sm:$0xff]  ;;  %s7194_s8 = scalar_lea.vmem %s5959_s3, 32 }
 0x5ec   :  { %v5190_v17 = vpop.f32.mrb[83].mxu0  ;;  %v5231_v33 = vpop.f32.mrb[83].mxu1  ;;  %p7195_p0 = scmp.ne.s32.totalorder %s5959_s3, %s7194_s8  ;;  %p7200_p2 = scmp.lt.s32.totalorder %s7194_s8, %s7194_s8 }
 0x5ee   :  { %p7201_p3 = por %p7200_p2, %p7199_p1 }
 0x5f0   :  { %p7202_p4 = pnand %p7201_p3, %p7195_p0 }
 0x5f9   :  { %v5295_v18 = vpop.f32.mrb[84].mxu0  ;;  %v5336_v51 = vpop.f32.mrb[84].mxu1 }
 0x5fa   :  { %v5343_v10 = vadd.f32 %v5295_v18, %v5233_v9  ;;  %v5345_v19 = vadd.f32 %v5336_v51, %v5235_v32  ;;  %v5297_v22 = vpop.f32.mrb[85].mxu0  ;;  %v5338_v29 = vpop.f32.mrb[85].mxu1 }
 0x5fb   :  { %v5344_v24 = vadd.f32 %v5297_v22, %v5234_v14  ;;  %v5346_v25 = vadd.f32 %v5338_v29, %v5236_v15  ;;  %v5299_v26 = vpop.f32.mrb[86].mxu0  ;;  %v5340_v28 = vpop.f32.mrb[86].mxu1 }
 0x5fc   :  { %v5300_v27 = vpop.f32.mrb[87].mxu0  ;;  %v5341_v31 = vpop.f32.mrb[87].mxu1 }
 0x609   :  { %v5405_v34 = vpop.f32.mrb[88].mxu0  ;;  %v5446_v35 = vpop.f32.mrb[88].mxu1 }
 0x60a   :  { %v5453_v23 = vadd.f32 %v5405_v34, %v5343_v10  ;;  %v5455_v42 = vadd.f32 %v5446_v35, %v5345_v19  ;;  %v5407_v7 = vpop.f32.mrb[89].mxu0  ;;  %v5448_v36 = vpop.f32.mrb[89].mxu1 }
 0x60b   :  { %v5454_v45 = vadd.f32 %v5407_v7, %v5344_v24  ;;  %v5456_v37 = vadd.f32 %v5448_v36, %v5346_v25  ;;  %v5409_v38 = vpop.f32.mrb[90].mxu0  ;;  %v5450_v12 = vpop.f32.mrb[90].mxu1 }
 0x60c   :  { %v5410_v39 = vpop.f32.mrb[91].mxu0  ;;  %v5451_v40 = vpop.f32.mrb[91].mxu1 }
 0x619   :  { %v5515_v50 = vpop.f32.mrb[92].mxu0  ;;  %v5556_v46 = vpop.f32.mrb[92].mxu1 }
 0x61a   :  { %v5563_v54 = vadd.f32 %v5515_v50, %v5453_v23  ;;  %v5565_v55 = vadd.f32 %v5556_v46, %v5455_v42  ;;  %v5517_v56 = vpop.f32.mrb[93].mxu0  ;;  %v5558_v57 = vpop.f32.mrb[93].mxu1 }
 0x61b   :  { %v5564_v58 = vadd.f32 %v5517_v56, %v5454_v45  ;;  %v5566_v60 = vadd.f32 %v5558_v57, %v5456_v37  ;;  %v5519_v61 = vpop.f32.mrb[94].mxu0  ;;  %v5560_v62 = vpop.f32.mrb[94].mxu1 }
 0x61c   :  { %v5589_v63 = vadd.f32 %v5572_v47, %v5563_v54  ;;  %v5591_v0 = vadd.f32 %v5580_v49, %v5565_v55  ;;  %v5520_v1 = vpop.f32.mrb[95].mxu0  ;;  %v5561_v2 = vpop.f32.mrb[95].mxu1 }
 0x61d   :  { %v5590_v30 = vadd.f32 %v5576_v52, %v5564_v58  ;;  %v5592_v59 = vadd.f32 %v5584_v53, %v5566_v60 }
 0x61e   :  { %v5593_v3 = vmax.f32 %v5589_v63, 0.0  ;;  %v5595_v4 = vmax.f32 %v5591_v0, 0.0 }
 0x61f   :  { %v5594_v5 = vmax.f32 %v5590_v30, 0.0  ;;  %v5596_v20 = vmax.f32 %v5592_v59, 0.0 }
 0x620   :  { %v5597_v8 = vpack.c.bf16 %v5593_v3, %v5593_v3  ;;  %v5599_v9 = vpack.c.bf16 %v5595_v4, %v5595_v4 }
 0x621   :  { %v5598_v21 = vpack.c.bf16 %v5594_v5, %v5594_v5  ;;  %v5600_v6 = vpack.c.bf16 %v5596_v20, %v5596_v20 }
 0x623   :  { %5896 = vmatprep.mubr.bf16.mxu0 %v5598_v21  ;;  %5936 = vmatprep.mubr.bf16.mxu1 %v5600_v6 }
 0x624   :  { %5897 = vmatmul.mubr.bf16.vlgmr.msra.gmra.mrb[96].mxu0 %v5597_v8  ;;  %5937 = vmatmul.mubr.bf16.vlgmr.msra.gmra.mrb[96].mxu1 %v5599_v9 }
 0x6f7   :  { %v6581_v32 = vpop.f32.mrb[96].mxu0  ;;  %v6603_v11 = vpop.f32.mrb[96].mxu1 }
 0x6f8   :  { %v6582_v14 = vpop.f32.mrb[97].mxu0  ;;  %v6604_v15 = vpop.f32.mrb[97].mxu1 }
 0x6f9   :  { %v6583_v16 = vadd.f32 %v6582_v14, %v6581_v32  ;;  %v6605_v48 = vadd.f32 %v6604_v15, %v6603_v11  ;;  %v6584_v17 = vpop.f32.mrb[98].mxu0  ;;  %v6606_v33 = vpop.f32.mrb[98].mxu1 }
 0x6fa   :  { %v6585_v18 = vpop.f32.mrb[99].mxu0  ;;  %v6607_v51 = vpop.f32.mrb[99].mxu1 }
 0x6fb   :  { %v5899_v10 = vadd.f32 %v6583_v16, %v6286_v13 }
 0x6fd   :  { %v5939_v19 = vadd.f32 %v6605_v48, %v5899_v10 }
 0x6ff   :  { %v5944_v22 = vsub.f32 0.0, %v5939_v19 }
 0x701   :  { %v5945_v29 = vmul.f32 1.442695, %v5944_v22 }
 0x703   :  { %7190 = vpow2.f32 %v5945_v29 }
 0x70d   :  { %v7191_v24 = vpop.eup %7190 }
 0x70e   :  { %v5947_v25 = vadd.f32 1.0, %v7191_v24 }
 0x710   :  { %7192 = vrcp.f32 %v5947_v25 }
 0x71a   :  { %v7193_v26 = vpop.eup %7192 }
 0x71b   :  { %5951 = vst.msk [vmem:[#allocation5] sm:$0x3] %vm5950_vm5, %v7193_v26 }
 0x71c   :  { %7205 = shalt.err (!%p7202_p4)
}
 0x71d   :  { %s7206_s21 = scalar_lea.hbm %s8955_s9, 32 }
 0x71e   :  { %p7207_p5 = scmp.ne.s32.totalorder %s8955_s9, %s7206_s21  ;;  %p7210_p6 = scmp.lt.u32.totalorder %s7206_s21, %s8955_s9 }
 0x720   :  { %p7212_p7 = pnand %p7210_p6, %p7207_p5 }
 0x722   :  { %7215 = shalt.err (!%p7212_p7)
}
 0x723   :  { %5961 = dma.vmem_to_hbm [thread:$0]  %s5959_s3, 32, %s8955_s9, [#allocation6]  }
 0x724   :  { %7218 = dma.done.wait [#allocation6], 32  }
 0x725   :  { %7219 = vsyncadd [#allocation6], 4294967264 }
 0x726   :  { %5965 = vsyncpa [#allocation6], 1 }
 0x727   :  { %5966 = vsyncmov [#allocation4] }
 0x72a   :  { %s5967_s28 = vpop.sfrf %5966 }
 0x72b   :  { %p6319_p8 = scmp.ne.s32.totalorder %s5967_s28, 0 }
 0x72d   :  { %5971 = shalt.err (%p6319_p8)  }

</bundles_post_ra>
